<compile_context>
chip_gen: v6e
topology: v6e:2x2x1
jax: 0.10.0
libtpu: 0.0.40
codegen_flags: <defaults>
</compile_context>

<pallas_src>
import functools

import jax
import jax.numpy as jnp
from jax import lax
from jax.experimental import pallas as pl
from jax.experimental.pallas import tpu as pltpu

EPS = 1e-5  # torch.nn.InstanceNorm2d default eps

MODES = ["relu", "in_relu", "in_relu", "in_relu", "relu",
         "in_relu", "in_relu", "in_relu", "in_relu", "sigmoid_round"]


# ----------------------------------------------------------------------------
# Fused Pallas kernel: all 10 blocks, B_TILE batch samples per grid step.
# ----------------------------------------------------------------------------
def _make_fused_generator_kernel(layer_meta, hw, bt):
    L = bt * hw
    inv_hw = 1.0 / hw

    def kernel(x_ref, w_ref, p_ref, m_ref, o_ref):
        # Layer-invariant boundary masks: loaded + sliced ONCE, reused by all
        # 10 blocks (JAX does not CSE broadcasts, so hoist manually).
        masks = m_ref[...]                                  # [n_off, L] f32
        mask_rows = [masks[i:i + 1, :] for i in range(masks.shape[0])]

        a = x_ref[...]                                      # [Cin0, L] f32
        for li, meta in enumerate(layer_meta):
            cout, kdim, mode = meta["cout"], meta["kdim"], meta["mode"]

            # Stacked-K activation: one shifted (XLU roll) + masked (VPU mul)
            # copy per tap, concatenated on the contraction axis.  Boundary
            # masks also prevent any cross-sample wrap of the lane roll.
            taps = []
            for off, midx in meta["tap_plan"]:
                t = a if off == 0 else pltpu.roll(a, (-off) % L, axis=1)
                if midx >= 0:
                    t = t * mask_rows[midx]
                taps.append(t)
            stacked = taps[0] if len(taps) == 1 else jnp.concatenate(taps, axis=0)

            # ONE MXU matmul per block (K = kh*kw*Cin); bf16 in, f32 accumulate.
            w_i = w_ref[li][:cout, :kdim]                   # [Cout, K] bf16
            y = jnp.dot(w_i, stacked.astype(jnp.bfloat16),
                        preferred_element_type=jnp.float32)  # [Cout, L] f32

            pb = p_ref[li]                                  # [Cmax, 3] f32
            y = y + pb[:cout, 0:1]                          # + bias

            if mode == "in_relu":
                # InstanceNorm2d per (sample, channel).  Fused one-pass stats:
                # sum / sum-of-squares back-to-back, var = E[y^2] - mean^2
                # (clamped >= 0; f32 cancellation is benign here since the
                # 0.1-scaled convs keep |mean| comparable to std).
                parts = []
                for b in range(bt):
                    yb = y[:, b * hw:(b + 1) * hw] if bt > 1 else y
                    s1 = jnp.sum(yb, axis=1, keepdims=True)
                    s2 = jnp.sum(yb * yb, axis=1, keepdims=True)
                    mean = s1 * inv_hw
                    var = jnp.maximum(s2 * inv_hw - mean * mean, 0.0)
                    parts.append((yb - mean) * lax.rsqrt(var + EPS))
                y = parts[0] if bt == 1 else jnp.concatenate(parts, axis=1)
                y = jnp.maximum(y * pb[:cout, 1:2] + pb[:cout, 2:3], 0.0)
            elif mode == "relu":
                y = jnp.maximum(y, 0.0)
            else:  # "sigmoid_round"
                # round(sigmoid(y)) == (y > 0) as a VPU compare+select.
                # Differs from torch only when f32 sigmoid of a tiny y>0
                # rounds to exactly 0.5 (torch round-half-to-even gives 0).
                # TODO(synk): straight-through gradient of _round is backward-only.
                y = jnp.where(y > 0.0, 1.0, 0.0)
            a = y

        o_ref[...] = a.astype(o_ref.dtype)

    return kernel


# ----------------------------------------------------------------------------
# Wrapper helpers
# ----------------------------------------------------------------------------
def _prep_layer(w, b, gamma, beta, is_transpose, stride, pad, mode):
    """Returns ([Cout, kh*kw*Cin] bf16 weight, [Cout, 3] f32 affine, meta)."""
    if is_transpose:
        # ConvTranspose2d (stride=1, output_padding=0) == Conv2d with the
        # spatially-flipped, channel-swapped kernel and padding (k - 1 - p).
        kh = w.shape[2]
        w_eq = jnp.flip(w, axis=(2, 3)).transpose(1, 0, 2, 3)
        pad_eq = kh - 1 - pad
    else:
        w_eq = w
        pad_eq = pad
    cout, cin, kh, kw = w_eq.shape
    # TODO(synk): the fused path supports stride-1 "same" convolutions only
    # (covers this config); stride>1 would need the subpixel decomposition.
    assert stride == 1 and 2 * pad_eq == kh - 1 and 2 * pad_eq == kw - 1, (
        "fused generator kernel requires stride-1 'same' convolutions")
    # K index = (di*kw + dj)*Cin + ci  -> matches the in-kernel tap stacking.
    w_flat = w_eq.transpose(0, 2, 3, 1).reshape(cout, kh * kw * cin)
    w_flat = w_flat.astype(jnp.bfloat16)
    affine = jnp.stack([b, gamma, beta], axis=1).astype(jnp.float32)  # [Cout,3]
    taps = tuple((di - pad_eq, dj - pad_eq)
                 for di in range(kh) for dj in range(kw))
    meta = dict(cin=cin, cout=cout, kdim=kh * kw * cin, mode=mode, taps=taps)
    return w_flat, affine, meta


def _pick_batch_tile(n, max_tile=8):
    """How many samples to pack onto the lane axis per grid step.

    Wider tiles amortize the ~0.35 us per-grid-step overhead and per-block
    fixed VPU cost; keeping >= 2 grid steps lets v7x's two TensorCores split
    the batch.  VMEM is a non-factor at these sizes (peak live stacked
    activation is [9*Cmax, B_TILE*HW] f32 ~ B_TILE * 72 KiB), but budget
    against v7x's 64 MiB per-TC VMEM before raising max_tile.
    """
    if n <= 2:
        return n
    for bt in range(min(n // 2, max_tile), 0, -1):
        if n % bt == 0:
            return bt
    return 1


def generator_forward(params, x, k, s, p, batch_tile=None):
    del k  # kernel sizes are taken from the weight shapes
    n_layers = len(params)
    N, C0, H, W = x.shape
    HW = H * W
    BT = _pick_batch_tile(N) if batch_tile is None else batch_tile
    assert N % BT == 0, (N, BT)
    L = BT * HW

    metas, w_flats, affines = [], [], []
    for i in range(n_layers):
        w, b, g, be = params[i]
        wf, af, meta = _prep_layer(w, b, g, be, i >= 5, s[i], p[i], MODES[i])
        w_flats.append(wf)
        affines.append(af)
        metas.append(meta)
    c_last = metas[-1]["cout"]
    cmax = max(m["cout"] for m in metas)
    kmax = max(m["kdim"] for m in metas)

    # Pack ALL layer weights / affine params into two arrays (2 constant-index
    # DMAs per grid step instead of 20 tiny double-buffered ones).
    w_all = jnp.zeros((n_layers, cmax, kmax), jnp.bfloat16)
    p_all = jnp.zeros((n_layers, cmax, 3), jnp.float32)
    for i, (wf, af) in enumerate(zip(w_flats, affines)):
        w_all = w_all.at[i, :wf.shape[0], :wf.shape[1]].set(wf)
        p_all = p_all.at[i, :af.shape[0], :].set(af)

    # Host-precomputed boundary masks: one row per distinct non-center tap
    # offset, shared by every block; tiled across the BT samples on the lanes.
    offsets = []
    for m in metas:
        for oh_ow in m["taps"]:
            if oh_ow != (0, 0) and oh_ow not in offsets:
                offsets.append(oh_ow)
    off_index = {o: i for i, o in enumerate(offsets)}
    row = jnp.arange(HW, dtype=jnp.int32) // W
    col = jnp.arange(HW, dtype=jnp.int32) % W
    mask_rows = []
    for (oh, ow) in offsets:
        v = jnp.ones((HW,), jnp.bool_)
        if oh > 0:
            v = v & (row < H - oh)
        elif oh < 0:
            v = v & (row >= -oh)
        if ow > 0:
            v = v & (col < W - ow)
        elif ow < 0:
            v = v & (col >= -ow)
        mask_rows.append(jnp.tile(v.astype(jnp.float32), BT))
    mask_arr = (jnp.stack(mask_rows, axis=0) if mask_rows
                else jnp.ones((1, L), jnp.float32))

    for m in metas:
        m["tap_plan"] = tuple(
            (oh * W + ow, off_index[(oh, ow)] if (oh, ow) != (0, 0) else -1)
            for (oh, ow) in m["taps"])

    # NCHW -> [C, N*HW]: spatial + packed-batch axis is lane-dense, so every
    # in-kernel matmul output / store is an unmasked full-lane vst.
    x2 = x.reshape(N, C0, HW).transpose(1, 0, 2).reshape(C0, N * HW)

    out = pl.pallas_call(
        _make_fused_generator_kernel(tuple(metas), HW, BT),
        out_shape=jax.ShapeDtypeStruct((c_last, N * HW), jnp.float32),
        grid_spec=pltpu.PrefetchScalarGridSpec(
            num_scalar_prefetch=0,
            grid=(N // BT,),
            in_specs=[
                pl.BlockSpec((C0, L), lambda n: (0, n)),                 # x
                pl.BlockSpec((n_layers, cmax, kmax), lambda n: (0, 0, 0)),  # weights
                pl.BlockSpec((n_layers, cmax, 3), lambda n: (0, 0, 0)),     # bias/gamma/beta
                pl.BlockSpec(mask_arr.shape, lambda n: (0, 0)),             # masks
            ],
            out_specs=pl.BlockSpec((c_last, L), lambda n: (0, n)),
        ),
        compiler_params=pltpu.CompilerParams(
            dimension_semantics=("parallel",),   # batch tiles -> both TCs on v7x
            vmem_limit_bytes=32 * 1024 * 1024,   # well under v7x's 64 MiB/TC
        ),
    )(x2, w_all, p_all, mask_arr)

    return out.reshape(c_last, N, HW).transpose(1, 0, 2).reshape(N, c_last, H, W)


# ----------------------------------------------------------------------------
# Parameters (same shapes as the nn.Module)
# ----------------------------------------------------------------------------
def init_generator_params(key, f, k):
    params = []
    keys = jax.random.split(key, 10)
    for i in range(10):
        cin, cout, ks = f[i], f[i + 1], k[i]
        kw1, kw2 = jax.random.split(keys[i])
        if i < 5:  # Conv2d: [Cout, Cin, kh, kw]
            w = 0.1 * jax.random.normal(kw1, (cout, cin, ks, ks), jnp.float32)
        else:      # ConvTranspose2d: [Cin, Cout, kh, kw]
            w = 0.1 * jax.random.normal(kw1, (cin, cout, ks, ks), jnp.float32)
        b = 0.01 * jax.random.normal(kw2, (cout,), jnp.float32)
        gamma = jnp.ones((cout,), jnp.float32)   # InstanceNorm2d affine init
        beta = jnp.zeros((cout,), jnp.float32)
        params.append((w, b, gamma, beta))
    return params


# ----------------------------------------------------------------------------
if __name__ == "__main__":
    # Small config: 5 Conv2d blocks + 5 ConvTranspose2d blocks, 16x16 spatial.
    f = [4, 8, 8, 8, 8, 8, 8, 8, 8, 8, 4]
    k = [3] * 10
    s = [1] * 10
    p = [1] * 10

    key = jax.random.PRNGKey(0)
    kx, kp = jax.random.split(key)
    x = jax.random.normal(kx, (2, 4, 16, 16), jnp.float32)  # NCHW, like PyTorch
    params = init_generator_params(kp, f, k)

    fwd = jax.jit(functools.partial(generator_forward, k=k, s=s, p=p))
    y = fwd(params, x)
    jax.block_until_ready(y)

    assert y.shape == (2, 4, 16, 16), y.shape
    # block10 ends in sigmoid + round -> outputs are exactly 0.0 / 1.0
    assert bool(jnp.all((y == 0.0) | (y == 1.0)))
    print("KERNEL_OK")
</pallas_src>

<mosaic_0001>
module attributes {stable_mosaic.version = 11 : i64} {
  func.func @kernel(%arg0: i32, %arg1: memref<4x512xf32, #tpu.memory_space<vmem>>, %arg2: memref<10x8x72xbf16, #tpu.memory_space<vmem>>, %arg3: memref<10x8x3xf32, #tpu.memory_space<vmem>>, %arg4: memref<8x512xf32, #tpu.memory_space<vmem>>, %arg5: memref<4x512xf32, #tpu.memory_space<vmem>>) attributes {dimension_semantics = [#tpu.dimension_semantics<parallel>], iteration_bounds = array<i64: 1>, scalar_prefetch = 0 : i64, scratch_operands = 0 : i64, tpu.core_type = #tpu.core_type<tc>, window_params = [{transform_indices = @transform_0, window_bounds = array<i64: 4, 512>}, {pipeline_mode = #tpu.pipeline_mode<synchronous>, transform_indices = @transform_1, window_bounds = array<i64: 10, 8, 72>}, {pipeline_mode = #tpu.pipeline_mode<synchronous>, transform_indices = @transform_2, window_bounds = array<i64: 10, 8, 3>}, {pipeline_mode = #tpu.pipeline_mode<synchronous>, transform_indices = @transform_3, window_bounds = array<i64: 8, 512>}, {transform_indices = @transform_4, window_bounds = array<i64: 4, 512>}]} {
    %c0 = arith.constant 0 : index
    %c0_0 = arith.constant 0 : index
    %0 = vector.load %arg4[%c0, %c0_0] : memref<8x512xf32, #tpu.memory_space<vmem>>, vector<8x512xf32>
    %1 = vector.extract_strided_slice %0 {offsets = [0, 0], sizes = [1, 512], strides = [1, 1]} : vector<8x512xf32> to vector<1x512xf32>
    %2 = vector.extract_strided_slice %0 {offsets = [1, 0], sizes = [1, 512], strides = [1, 1]} : vector<8x512xf32> to vector<1x512xf32>
    %3 = vector.extract_strided_slice %0 {offsets = [2, 0], sizes = [1, 512], strides = [1, 1]} : vector<8x512xf32> to vector<1x512xf32>
    %4 = vector.extract_strided_slice %0 {offsets = [3, 0], sizes = [1, 512], strides = [1, 1]} : vector<8x512xf32> to vector<1x512xf32>
    %5 = vector.extract_strided_slice %0 {offsets = [4, 0], sizes = [1, 512], strides = [1, 1]} : vector<8x512xf32> to vector<1x512xf32>
    %6 = vector.extract_strided_slice %0 {offsets = [5, 0], sizes = [1, 512], strides = [1, 1]} : vector<8x512xf32> to vector<1x512xf32>
    %7 = vector.extract_strided_slice %0 {offsets = [6, 0], sizes = [1, 512], strides = [1, 1]} : vector<8x512xf32> to vector<1x512xf32>
    %8 = vector.extract_strided_slice %0 {offsets = [7, 0], sizes = [1, 512], strides = [1, 1]} : vector<8x512xf32> to vector<1x512xf32>
    %c0_1 = arith.constant 0 : index
    %c0_2 = arith.constant 0 : index
    %9 = vector.load %arg1[%c0_1, %c0_2] : memref<4x512xf32, #tpu.memory_space<vmem>>, vector<4x512xf32>
    %c17_i32 = arith.constant 17 : i32
    %10 = tpu.dynamic_rotate %9 by %c17_i32 dim 1 : vector<4x512xf32>, i32 -> vector<4x512xf32>
    %11 = vector.broadcast %1 : vector<1x512xf32> to vector<4x512xf32>
    %12 = arith.mulf %10, %11 : vector<4x512xf32>
    %c16_i32 = arith.constant 16 : i32
    %13 = tpu.dynamic_rotate %9 by %c16_i32 dim 1 : vector<4x512xf32>, i32 -> vector<4x512xf32>
    %14 = vector.broadcast %2 : vector<1x512xf32> to vector<4x512xf32>
    %15 = arith.mulf %13, %14 : vector<4x512xf32>
    %c15_i32 = arith.constant 15 : i32
    %16 = tpu.dynamic_rotate %9 by %c15_i32 dim 1 : vector<4x512xf32>, i32 -> vector<4x512xf32>
    %17 = vector.broadcast %3 : vector<1x512xf32> to vector<4x512xf32>
    %18 = arith.mulf %16, %17 : vector<4x512xf32>
    %c1_i32 = arith.constant 1 : i32
    %19 = tpu.dynamic_rotate %9 by %c1_i32 dim 1 : vector<4x512xf32>, i32 -> vector<4x512xf32>
    %20 = vector.broadcast %4 : vector<1x512xf32> to vector<4x512xf32>
    %21 = arith.mulf %19, %20 : vector<4x512xf32>
    %c511_i32 = arith.constant 511 : i32
    %22 = tpu.dynamic_rotate %9 by %c511_i32 dim 1 : vector<4x512xf32>, i32 -> vector<4x512xf32>
    %23 = vector.broadcast %5 : vector<1x512xf32> to vector<4x512xf32>
    %24 = arith.mulf %22, %23 : vector<4x512xf32>
    %c497_i32 = arith.constant 497 : i32
    %25 = tpu.dynamic_rotate %9 by %c497_i32 dim 1 : vector<4x512xf32>, i32 -> vector<4x512xf32>
    %26 = vector.broadcast %6 : vector<1x512xf32> to vector<4x512xf32>
    %27 = arith.mulf %25, %26 : vector<4x512xf32>
    %c496_i32 = arith.constant 496 : i32
    %28 = tpu.dynamic_rotate %9 by %c496_i32 dim 1 : vector<4x512xf32>, i32 -> vector<4x512xf32>
    %29 = vector.broadcast %7 : vector<1x512xf32> to vector<4x512xf32>
    %30 = arith.mulf %28, %29 : vector<4x512xf32>
    %c495_i32 = arith.constant 495 : i32
    %31 = tpu.dynamic_rotate %9 by %c495_i32 dim 1 : vector<4x512xf32>, i32 -> vector<4x512xf32>
    %32 = vector.broadcast %8 : vector<1x512xf32> to vector<4x512xf32>
    %33 = arith.mulf %31, %32 : vector<4x512xf32>
    %34 = tpu.concatenate %12, %15, %18, %21, %9, %24, %27, %30, %33 in 0 : vector<4x512xf32>, vector<4x512xf32>, vector<4x512xf32>, vector<4x512xf32>, vector<4x512xf32>, vector<4x512xf32>, vector<4x512xf32>, vector<4x512xf32>, vector<4x512xf32> -> vector<36x512xf32>
    %c0_3 = arith.constant 0 : index
    %c0_4 = arith.constant 0 : index
    %c0_5 = arith.constant 0 : index
    %35 = vector.load %arg2[%c0_3, %c0_4, %c0_5] : memref<10x8x72xbf16, #tpu.memory_space<vmem>>, vector<1x8x72xbf16>
    %36 = vector.shape_cast %35 : vector<1x8x72xbf16> to vector<8x72xbf16>
    %37 = vector.extract_strided_slice %36 {offsets = [0, 0], sizes = [8, 36], strides = [1, 1]} : vector<8x72xbf16> to vector<8x36xbf16>
    %38 = arith.truncf %34 : vector<36x512xf32> to vector<36x512xbf16>
    %cst = arith.constant dense<0.000000e+00> : vector<8x512xf32>
    %39 = tpu.matmul %37, %38, %cst {dimension_numbers = #tpu.dot_dimension_numbers<[1], [0], [0], [1], [0, 0, 1, 1], [], []>} : vector<8x36xbf16>, vector<36x512xbf16>, vector<8x512xf32> -> vector<8x512xf32>
    %c0_6 = arith.constant 0 : index
    %c0_7 = arith.constant 0 : index
    %c0_8 = arith.constant 0 : index
    %40 = vector.load %arg3[%c0_6, %c0_7, %c0_8] : memref<10x8x3xf32, #tpu.memory_space<vmem>>, vector<1x8x3xf32>
    %41 = vector.shape_cast %40 : vector<1x8x3xf32> to vector<8x3xf32>
    %42 = vector.extract_strided_slice %41 {offsets = [0, 0], sizes = [8, 1], strides = [1, 1]} : vector<8x3xf32> to vector<8x1xf32>
    %43 = vector.broadcast %42 : vector<8x1xf32> to vector<8x512xf32>
    %44 = arith.addf %39, %43 : vector<8x512xf32>
    %cst_9 = arith.constant 0.000000e+00 : f32
    %45 = vector.broadcast %cst_9 : f32 to vector<8x512xf32>
    %46 = arith.maximumf %44, %45 : vector<8x512xf32>
    %c17_i32_10 = arith.constant 17 : i32
    %47 = tpu.dynamic_rotate %46 by %c17_i32_10 dim 1 : vector<8x512xf32>, i32 -> vector<8x512xf32>
    %48 = vector.broadcast %1 : vector<1x512xf32> to vector<8x512xf32>
    %49 = arith.mulf %47, %48 : vector<8x512xf32>
    %c16_i32_11 = arith.constant 16 : i32
    %50 = tpu.dynamic_rotate %46 by %c16_i32_11 dim 1 : vector<8x512xf32>, i32 -> vector<8x512xf32>
    %51 = vector.broadcast %2 : vector<1x512xf32> to vector<8x512xf32>
    %52 = arith.mulf %50, %51 : vector<8x512xf32>
    %c15_i32_12 = arith.constant 15 : i32
    %53 = tpu.dynamic_rotate %46 by %c15_i32_12 dim 1 : vector<8x512xf32>, i32 -> vector<8x512xf32>
    %54 = vector.broadcast %3 : vector<1x512xf32> to vector<8x512xf32>
    %55 = arith.mulf %53, %54 : vector<8x512xf32>
    %c1_i32_13 = arith.constant 1 : i32
    %56 = tpu.dynamic_rotate %46 by %c1_i32_13 dim 1 : vector<8x512xf32>, i32 -> vector<8x512xf32>
    %57 = vector.broadcast %4 : vector<1x512xf32> to vector<8x512xf32>
    %58 = arith.mulf %56, %57 : vector<8x512xf32>
    %c511_i32_14 = arith.constant 511 : i32
    %59 = tpu.dynamic_rotate %46 by %c511_i32_14 dim 1 : vector<8x512xf32>, i32 -> vector<8x512xf32>
    %60 = vector.broadcast %5 : vector<1x512xf32> to vector<8x512xf32>
    %61 = arith.mulf %59, %60 : vector<8x512xf32>
    %c497_i32_15 = arith.constant 497 : i32
    %62 = tpu.dynamic_rotate %46 by %c497_i32_15 dim 1 : vector<8x512xf32>, i32 -> vector<8x512xf32>
    %63 = vector.broadcast %6 : vector<1x512xf32> to vector<8x512xf32>
    %64 = arith.mulf %62, %63 : vector<8x512xf32>
    %c496_i32_16 = arith.constant 496 : i32
    %65 = tpu.dynamic_rotate %46 by %c496_i32_16 dim 1 : vector<8x512xf32>, i32 -> vector<8x512xf32>
    %66 = vector.broadcast %7 : vector<1x512xf32> to vector<8x512xf32>
    %67 = arith.mulf %65, %66 : vector<8x512xf32>
    %c495_i32_17 = arith.constant 495 : i32
    %68 = tpu.dynamic_rotate %46 by %c495_i32_17 dim 1 : vector<8x512xf32>, i32 -> vector<8x512xf32>
    %69 = vector.broadcast %8 : vector<1x512xf32> to vector<8x512xf32>
    %70 = arith.mulf %68, %69 : vector<8x512xf32>
    %71 = tpu.concatenate %49, %52, %55, %58, %46, %61, %64, %67, %70 in 0 : vector<8x512xf32>, vector<8x512xf32>, vector<8x512xf32>, vector<8x512xf32>, vector<8x512xf32>, vector<8x512xf32>, vector<8x512xf32>, vector<8x512xf32>, vector<8x512xf32> -> vector<72x512xf32>
    %c1 = arith.constant 1 : index
    %c0_18 = arith.constant 0 : index
    %c0_19 = arith.constant 0 : index
    %72 = vector.load %arg2[%c1, %c0_18, %c0_19] : memref<10x8x72xbf16, #tpu.memory_space<vmem>>, vector<1x8x72xbf16>
    %73 = vector.shape_cast %72 : vector<1x8x72xbf16> to vector<8x72xbf16>
    %74 = arith.truncf %71 : vector<72x512xf32> to vector<72x512xbf16>
    %cst_20 = arith.constant dense<0.000000e+00> : vector<8x512xf32>
    %75 = tpu.matmul %73, %74, %cst_20 {dimension_numbers = #tpu.dot_dimension_numbers<[1], [0], [0], [1], [0, 0, 1, 1], [], []>} : vector<8x72xbf16>, vector<72x512xbf16>, vector<8x512xf32> -> vector<8x512xf32>
    %c1_21 = arith.constant 1 : index
    %c0_22 = arith.constant 0 : index
    %c0_23 = arith.constant 0 : index
    %76 = vector.load %arg3[%c1_21, %c0_22, %c0_23] : memref<10x8x3xf32, #tpu.memory_space<vmem>>, vector<1x8x3xf32>
    %77 = vector.shape_cast %76 : vector<1x8x3xf32> to vector<8x3xf32>
    %78 = vector.extract_strided_slice %77 {offsets = [0, 0], sizes = [8, 1], strides = [1, 1]} : vector<8x3xf32> to vector<8x1xf32>
    %79 = vector.broadcast %78 : vector<8x1xf32> to vector<8x512xf32>
    %80 = arith.addf %75, %79 : vector<8x512xf32>
    %81 = vector.extract_strided_slice %80 {offsets = [0, 0], sizes = [8, 256], strides = [1, 1]} : vector<8x512xf32> to vector<8x256xf32>
    %cst_24 = arith.constant dense<0.000000e+00> : vector<8xf32>
    %82 = vector.multi_reduction <add>, %81, %cst_24 [1] : vector<8x256xf32> to vector<8xf32>
    %83 = vector.shape_cast %82 : vector<8xf32> to vector<8x1xf32>
    %84 = arith.mulf %81, %81 : vector<8x256xf32>
    %cst_25 = arith.constant dense<0.000000e+00> : vector<8xf32>
    %85 = vector.multi_reduction <add>, %84, %cst_25 [1] : vector<8x256xf32> to vector<8xf32>
    %86 = vector.shape_cast %85 : vector<8xf32> to vector<8x1xf32>
    %cst_26 = arith.constant 3.906250e-03 : f32
    %87 = vector.broadcast %cst_26 : f32 to vector<8x1xf32>
    %88 = arith.mulf %83, %87 : vector<8x1xf32>
    %cst_27 = arith.constant 3.906250e-03 : f32
    %89 = vector.broadcast %cst_27 : f32 to vector<8x1xf32>
    %90 = arith.mulf %86, %89 : vector<8x1xf32>
    %91 = arith.mulf %88, %88 : vector<8x1xf32>
    %92 = arith.subf %90, %91 : vector<8x1xf32>
    %cst_28 = arith.constant 0.000000e+00 : f32
    %93 = vector.broadcast %cst_28 : f32 to vector<8x1xf32>
    %94 = arith.maximumf %92, %93 : vector<8x1xf32>
    %95 = vector.broadcast %88 : vector<8x1xf32> to vector<8x256xf32>
    %96 = arith.subf %81, %95 : vector<8x256xf32>
    %cst_29 = arith.constant 9.99999974E-6 : f32
    %97 = vector.broadcast %cst_29 : f32 to vector<8x1xf32>
    %98 = arith.addf %94, %97 : vector<8x1xf32>
    %99 = math.rsqrt %98 : vector<8x1xf32>
    %100 = vector.broadcast %99 : vector<8x1xf32> to vector<8x256xf32>
    %101 = arith.mulf %96, %100 : vector<8x256xf32>
    %102 = vector.extract_strided_slice %80 {offsets = [0, 256], sizes = [8, 256], strides = [1, 1]} : vector<8x512xf32> to vector<8x256xf32>
    %cst_30 = arith.constant dense<0.000000e+00> : vector<8xf32>
    %103 = vector.multi_reduction <add>, %102, %cst_30 [1] : vector<8x256xf32> to vector<8xf32>
    %104 = vector.shape_cast %103 : vector<8xf32> to vector<8x1xf32>
    %105 = arith.mulf %102, %102 : vector<8x256xf32>
    %cst_31 = arith.constant dense<0.000000e+00> : vector<8xf32>
    %106 = vector.multi_reduction <add>, %105, %cst_31 [1] : vector<8x256xf32> to vector<8xf32>
    %107 = vector.shape_cast %106 : vector<8xf32> to vector<8x1xf32>
    %cst_32 = arith.constant 3.906250e-03 : f32
    %108 = vector.broadcast %cst_32 : f32 to vector<8x1xf32>
    %109 = arith.mulf %104, %108 : vector<8x1xf32>
    %cst_33 = arith.constant 3.906250e-03 : f32
    %110 = vector.broadcast %cst_33 : f32 to vector<8x1xf32>
    %111 = arith.mulf %107, %110 : vector<8x1xf32>
    %112 = arith.mulf %109, %109 : vector<8x1xf32>
    %113 = arith.subf %111, %112 : vector<8x1xf32>
    %cst_34 = arith.constant 0.000000e+00 : f32
    %114 = vector.broadcast %cst_34 : f32 to vector<8x1xf32>
    %115 = arith.maximumf %113, %114 : vector<8x1xf32>
    %116 = vector.broadcast %109 : vector<8x1xf32> to vector<8x256xf32>
    %117 = arith.subf %102, %116 : vector<8x256xf32>
    %cst_35 = arith.constant 9.99999974E-6 : f32
    %118 = vector.broadcast %cst_35 : f32 to vector<8x1xf32>
    %119 = arith.addf %115, %118 : vector<8x1xf32>
    %120 = math.rsqrt %119 : vector<8x1xf32>
    %121 = vector.broadcast %120 : vector<8x1xf32> to vector<8x256xf32>
    %122 = arith.mulf %117, %121 : vector<8x256xf32>
    %123 = tpu.concatenate %101, %122 in 1 : vector<8x256xf32>, vector<8x256xf32> -> vector<8x512xf32>
    %124 = vector.extract_strided_slice %77 {offsets = [0, 1], sizes = [8, 1], strides = [1, 1]} : vector<8x3xf32> to vector<8x1xf32>
    %125 = vector.broadcast %124 : vector<8x1xf32> to vector<8x512xf32>
    %126 = arith.mulf %123, %125 : vector<8x512xf32>
    %127 = vector.extract_strided_slice %77 {offsets = [0, 2], sizes = [8, 1], strides = [1, 1]} : vector<8x3xf32> to vector<8x1xf32>
    %128 = vector.broadcast %127 : vector<8x1xf32> to vector<8x512xf32>
    %129 = arith.addf %126, %128 : vector<8x512xf32>
    %cst_36 = arith.constant 0.000000e+00 : f32
    %130 = vector.broadcast %cst_36 : f32 to vector<8x512xf32>
    %131 = arith.maximumf %129, %130 : vector<8x512xf32>
    %c17_i32_37 = arith.constant 17 : i32
    %132 = tpu.dynamic_rotate %131 by %c17_i32_37 dim 1 : vector<8x512xf32>, i32 -> vector<8x512xf32>
    %133 = vector.broadcast %1 : vector<1x512xf32> to vector<8x512xf32>
    %134 = arith.mulf %132, %133 : vector<8x512xf32>
    %c16_i32_38 = arith.constant 16 : i32
    %135 = tpu.dynamic_rotate %131 by %c16_i32_38 dim 1 : vector<8x512xf32>, i32 -> vector<8x512xf32>
    %136 = vector.broadcast %2 : vector<1x512xf32> to vector<8x512xf32>
    %137 = arith.mulf %135, %136 : vector<8x512xf32>
    %c15_i32_39 = arith.constant 15 : i32
    %138 = tpu.dynamic_rotate %131 by %c15_i32_39 dim 1 : vector<8x512xf32>, i32 -> vector<8x512xf32>
    %139 = vector.broadcast %3 : vector<1x512xf32> to vector<8x512xf32>
    %140 = arith.mulf %138, %139 : vector<8x512xf32>
    %c1_i32_40 = arith.constant 1 : i32
    %141 = tpu.dynamic_rotate %131 by %c1_i32_40 dim 1 : vector<8x512xf32>, i32 -> vector<8x512xf32>
    %142 = vector.broadcast %4 : vector<1x512xf32> to vector<8x512xf32>
    %143 = arith.mulf %141, %142 : vector<8x512xf32>
    %c511_i32_41 = arith.constant 511 : i32
    %144 = tpu.dynamic_rotate %131 by %c511_i32_41 dim 1 : vector<8x512xf32>, i32 -> vector<8x512xf32>
    %145 = vector.broadcast %5 : vector<1x512xf32> to vector<8x512xf32>
    %146 = arith.mulf %144, %145 : vector<8x512xf32>
    %c497_i32_42 = arith.constant 497 : i32
    %147 = tpu.dynamic_rotate %131 by %c497_i32_42 dim 1 : vector<8x512xf32>, i32 -> vector<8x512xf32>
    %148 = vector.broadcast %6 : vector<1x512xf32> to vector<8x512xf32>
    %149 = arith.mulf %147, %148 : vector<8x512xf32>
    %c496_i32_43 = arith.constant 496 : i32
    %150 = tpu.dynamic_rotate %131 by %c496_i32_43 dim 1 : vector<8x512xf32>, i32 -> vector<8x512xf32>
    %151 = vector.broadcast %7 : vector<1x512xf32> to vector<8x512xf32>
    %152 = arith.mulf %150, %151 : vector<8x512xf32>
    %c495_i32_44 = arith.constant 495 : i32
    %153 = tpu.dynamic_rotate %131 by %c495_i32_44 dim 1 : vector<8x512xf32>, i32 -> vector<8x512xf32>
    %154 = vector.broadcast %8 : vector<1x512xf32> to vector<8x512xf32>
    %155 = arith.mulf %153, %154 : vector<8x512xf32>
    %156 = tpu.concatenate %134, %137, %140, %143, %131, %146, %149, %152, %155 in 0 : vector<8x512xf32>, vector<8x512xf32>, vector<8x512xf32>, vector<8x512xf32>, vector<8x512xf32>, vector<8x512xf32>, vector<8x512xf32>, vector<8x512xf32>, vector<8x512xf32> -> vector<72x512xf32>
    %c2 = arith.constant 2 : index
    %c0_45 = arith.constant 0 : index
    %c0_46 = arith.constant 0 : index
    %157 = vector.load %arg2[%c2, %c0_45, %c0_46] : memref<10x8x72xbf16, #tpu.memory_space<vmem>>, vector<1x8x72xbf16>
    %158 = vector.shape_cast %157 : vector<1x8x72xbf16> to vector<8x72xbf16>
    %159 = arith.truncf %156 : vector<72x512xf32> to vector<72x512xbf16>
    %cst_47 = arith.constant dense<0.000000e+00> : vector<8x512xf32>
    %160 = tpu.matmul %158, %159, %cst_47 {dimension_numbers = #tpu.dot_dimension_numbers<[1], [0], [0], [1], [0, 0, 1, 1], [], []>} : vector<8x72xbf16>, vector<72x512xbf16>, vector<8x512xf32> -> vector<8x512xf32>
    %c2_48 = arith.constant 2 : index
    %c0_49 = arith.constant 0 : index
    %c0_50 = arith.constant 0 : index
    %161 = vector.load %arg3[%c2_48, %c0_49, %c0_50] : memref<10x8x3xf32, #tpu.memory_space<vmem>>, vector<1x8x3xf32>
    %162 = vector.shape_cast %161 : vector<1x8x3xf32> to vector<8x3xf32>
    %163 = vector.extract_strided_slice %162 {offsets = [0, 0], sizes = [8, 1], strides = [1, 1]} : vector<8x3xf32> to vector<8x1xf32>
    %164 = vector.broadcast %163 : vector<8x1xf32> to vector<8x512xf32>
    %165 = arith.addf %160, %164 : vector<8x512xf32>
    %166 = vector.extract_strided_slice %165 {offsets = [0, 0], sizes = [8, 256], strides = [1, 1]} : vector<8x512xf32> to vector<8x256xf32>
    %cst_51 = arith.constant dense<0.000000e+00> : vector<8xf32>
    %167 = vector.multi_reduction <add>, %166, %cst_51 [1] : vector<8x256xf32> to vector<8xf32>
    %168 = vector.shape_cast %167 : vector<8xf32> to vector<8x1xf32>
    %169 = arith.mulf %166, %166 : vector<8x256xf32>
    %cst_52 = arith.constant dense<0.000000e+00> : vector<8xf32>
    %170 = vector.multi_reduction <add>, %169, %cst_52 [1] : vector<8x256xf32> to vector<8xf32>
    %171 = vector.shape_cast %170 : vector<8xf32> to vector<8x1xf32>
    %cst_53 = arith.constant 3.906250e-03 : f32
    %172 = vector.broadcast %cst_53 : f32 to vector<8x1xf32>
    %173 = arith.mulf %168, %172 : vector<8x1xf32>
    %cst_54 = arith.constant 3.906250e-03 : f32
    %174 = vector.broadcast %cst_54 : f32 to vector<8x1xf32>
    %175 = arith.mulf %171, %174 : vector<8x1xf32>
    %176 = arith.mulf %173, %173 : vector<8x1xf32>
    %177 = arith.subf %175, %176 : vector<8x1xf32>
    %cst_55 = arith.constant 0.000000e+00 : f32
    %178 = vector.broadcast %cst_55 : f32 to vector<8x1xf32>
    %179 = arith.maximumf %177, %178 : vector<8x1xf32>
    %180 = vector.broadcast %173 : vector<8x1xf32> to vector<8x256xf32>
    %181 = arith.subf %166, %180 : vector<8x256xf32>
    %cst_56 = arith.constant 9.99999974E-6 : f32
    %182 = vector.broadcast %cst_56 : f32 to vector<8x1xf32>
    %183 = arith.addf %179, %182 : vector<8x1xf32>
    %184 = math.rsqrt %183 : vector<8x1xf32>
    %185 = vector.broadcast %184 : vector<8x1xf32> to vector<8x256xf32>
    %186 = arith.mulf %181, %185 : vector<8x256xf32>
    %187 = vector.extract_strided_slice %165 {offsets = [0, 256], sizes = [8, 256], strides = [1, 1]} : vector<8x512xf32> to vector<8x256xf32>
    %cst_57 = arith.constant dense<0.000000e+00> : vector<8xf32>
    %188 = vector.multi_reduction <add>, %187, %cst_57 [1] : vector<8x256xf32> to vector<8xf32>
    %189 = vector.shape_cast %188 : vector<8xf32> to vector<8x1xf32>
    %190 = arith.mulf %187, %187 : vector<8x256xf32>
    %cst_58 = arith.constant dense<0.000000e+00> : vector<8xf32>
    %191 = vector.multi_reduction <add>, %190, %cst_58 [1] : vector<8x256xf32> to vector<8xf32>
    %192 = vector.shape_cast %191 : vector<8xf32> to vector<8x1xf32>
    %cst_59 = arith.constant 3.906250e-03 : f32
    %193 = vector.broadcast %cst_59 : f32 to vector<8x1xf32>
    %194 = arith.mulf %189, %193 : vector<8x1xf32>
    %cst_60 = arith.constant 3.906250e-03 : f32
    %195 = vector.broadcast %cst_60 : f32 to vector<8x1xf32>
    %196 = arith.mulf %192, %195 : vector<8x1xf32>
    %197 = arith.mulf %194, %194 : vector<8x1xf32>
    %198 = arith.subf %196, %197 : vector<8x1xf32>
    %cst_61 = arith.constant 0.000000e+00 : f32
    %199 = vector.broadcast %cst_61 : f32 to vector<8x1xf32>
    %200 = arith.maximumf %198, %199 : vector<8x1xf32>
    %201 = vector.broadcast %194 : vector<8x1xf32> to vector<8x256xf32>
    %202 = arith.subf %187, %201 : vector<8x256xf32>
    %cst_62 = arith.constant 9.99999974E-6 : f32
    %203 = vector.broadcast %cst_62 : f32 to vector<8x1xf32>
    %204 = arith.addf %200, %203 : vector<8x1xf32>
    %205 = math.rsqrt %204 : vector<8x1xf32>
    %206 = vector.broadcast %205 : vector<8x1xf32> to vector<8x256xf32>
    %207 = arith.mulf %202, %206 : vector<8x256xf32>
    %208 = tpu.concatenate %186, %207 in 1 : vector<8x256xf32>, vector<8x256xf32> -> vector<8x512xf32>
    %209 = vector.extract_strided_slice %162 {offsets = [0, 1], sizes = [8, 1], strides = [1, 1]} : vector<8x3xf32> to vector<8x1xf32>
    %210 = vector.broadcast %209 : vector<8x1xf32> to vector<8x512xf32>
    %211 = arith.mulf %208, %210 : vector<8x512xf32>
    %212 = vector.extract_strided_slice %162 {offsets = [0, 2], sizes = [8, 1], strides = [1, 1]} : vector<8x3xf32> to vector<8x1xf32>
    %213 = vector.broadcast %212 : vector<8x1xf32> to vector<8x512xf32>
    %214 = arith.addf %211, %213 : vector<8x512xf32>
    %cst_63 = arith.constant 0.000000e+00 : f32
    %215 = vector.broadcast %cst_63 : f32 to vector<8x512xf32>
    %216 = arith.maximumf %214, %215 : vector<8x512xf32>
    %c17_i32_64 = arith.constant 17 : i32
    %217 = tpu.dynamic_rotate %216 by %c17_i32_64 dim 1 : vector<8x512xf32>, i32 -> vector<8x512xf32>
    %218 = vector.broadcast %1 : vector<1x512xf32> to vector<8x512xf32>
    %219 = arith.mulf %217, %218 : vector<8x512xf32>
    %c16_i32_65 = arith.constant 16 : i32
    %220 = tpu.dynamic_rotate %216 by %c16_i32_65 dim 1 : vector<8x512xf32>, i32 -> vector<8x512xf32>
    %221 = vector.broadcast %2 : vector<1x512xf32> to vector<8x512xf32>
    %222 = arith.mulf %220, %221 : vector<8x512xf32>
    %c15_i32_66 = arith.constant 15 : i32
    %223 = tpu.dynamic_rotate %216 by %c15_i32_66 dim 1 : vector<8x512xf32>, i32 -> vector<8x512xf32>
    %224 = vector.broadcast %3 : vector<1x512xf32> to vector<8x512xf32>
    %225 = arith.mulf %223, %224 : vector<8x512xf32>
    %c1_i32_67 = arith.constant 1 : i32
    %226 = tpu.dynamic_rotate %216 by %c1_i32_67 dim 1 : vector<8x512xf32>, i32 -> vector<8x512xf32>
    %227 = vector.broadcast %4 : vector<1x512xf32> to vector<8x512xf32>
    %228 = arith.mulf %226, %227 : vector<8x512xf32>
    %c511_i32_68 = arith.constant 511 : i32
    %229 = tpu.dynamic_rotate %216 by %c511_i32_68 dim 1 : vector<8x512xf32>, i32 -> vector<8x512xf32>
    %230 = vector.broadcast %5 : vector<1x512xf32> to vector<8x512xf32>
    %231 = arith.mulf %229, %230 : vector<8x512xf32>
    %c497_i32_69 = arith.constant 497 : i32
    %232 = tpu.dynamic_rotate %216 by %c497_i32_69 dim 1 : vector<8x512xf32>, i32 -> vector<8x512xf32>
    %233 = vector.broadcast %6 : vector<1x512xf32> to vector<8x512xf32>
    %234 = arith.mulf %232, %233 : vector<8x512xf32>
    %c496_i32_70 = arith.constant 496 : i32
    %235 = tpu.dynamic_rotate %216 by %c496_i32_70 dim 1 : vector<8x512xf32>, i32 -> vector<8x512xf32>
    %236 = vector.broadcast %7 : vector<1x512xf32> to vector<8x512xf32>
    %237 = arith.mulf %235, %236 : vector<8x512xf32>
    %c495_i32_71 = arith.constant 495 : i32
    %238 = tpu.dynamic_rotate %216 by %c495_i32_71 dim 1 : vector<8x512xf32>, i32 -> vector<8x512xf32>
    %239 = vector.broadcast %8 : vector<1x512xf32> to vector<8x512xf32>
    %240 = arith.mulf %238, %239 : vector<8x512xf32>
    %241 = tpu.concatenate %219, %222, %225, %228, %216, %231, %234, %237, %240 in 0 : vector<8x512xf32>, vector<8x512xf32>, vector<8x512xf32>, vector<8x512xf32>, vector<8x512xf32>, vector<8x512xf32>, vector<8x512xf32>, vector<8x512xf32>, vector<8x512xf32> -> vector<72x512xf32>
    %c3 = arith.constant 3 : index
    %c0_72 = arith.constant 0 : index
    %c0_73 = arith.constant 0 : index
    %242 = vector.load %arg2[%c3, %c0_72, %c0_73] : memref<10x8x72xbf16, #tpu.memory_space<vmem>>, vector<1x8x72xbf16>
    %243 = vector.shape_cast %242 : vector<1x8x72xbf16> to vector<8x72xbf16>
    %244 = arith.truncf %241 : vector<72x512xf32> to vector<72x512xbf16>
    %cst_74 = arith.constant dense<0.000000e+00> : vector<8x512xf32>
    %245 = tpu.matmul %243, %244, %cst_74 {dimension_numbers = #tpu.dot_dimension_numbers<[1], [0], [0], [1], [0, 0, 1, 1], [], []>} : vector<8x72xbf16>, vector<72x512xbf16>, vector<8x512xf32> -> vector<8x512xf32>
    %c3_75 = arith.constant 3 : index
    %c0_76 = arith.constant 0 : index
    %c0_77 = arith.constant 0 : index
    %246 = vector.load %arg3[%c3_75, %c0_76, %c0_77] : memref<10x8x3xf32, #tpu.memory_space<vmem>>, vector<1x8x3xf32>
    %247 = vector.shape_cast %246 : vector<1x8x3xf32> to vector<8x3xf32>
    %248 = vector.extract_strided_slice %247 {offsets = [0, 0], sizes = [8, 1], strides = [1, 1]} : vector<8x3xf32> to vector<8x1xf32>
    %249 = vector.broadcast %248 : vector<8x1xf32> to vector<8x512xf32>
    %250 = arith.addf %245, %249 : vector<8x512xf32>
    %251 = vector.extract_strided_slice %250 {offsets = [0, 0], sizes = [8, 256], strides = [1, 1]} : vector<8x512xf32> to vector<8x256xf32>
    %cst_78 = arith.constant dense<0.000000e+00> : vector<8xf32>
    %252 = vector.multi_reduction <add>, %251, %cst_78 [1] : vector<8x256xf32> to vector<8xf32>
    %253 = vector.shape_cast %252 : vector<8xf32> to vector<8x1xf32>
    %254 = arith.mulf %251, %251 : vector<8x256xf32>
    %cst_79 = arith.constant dense<0.000000e+00> : vector<8xf32>
    %255 = vector.multi_reduction <add>, %254, %cst_79 [1] : vector<8x256xf32> to vector<8xf32>
    %256 = vector.shape_cast %255 : vector<8xf32> to vector<8x1xf32>
    %cst_80 = arith.constant 3.906250e-03 : f32
    %257 = vector.broadcast %cst_80 : f32 to vector<8x1xf32>
    %258 = arith.mulf %253, %257 : vector<8x1xf32>
    %cst_81 = arith.constant 3.906250e-03 : f32
    %259 = vector.broadcast %cst_81 : f32 to vector<8x1xf32>
    %260 = arith.mulf %256, %259 : vector<8x1xf32>
    %261 = arith.mulf %258, %258 : vector<8x1xf32>
    %262 = arith.subf %260, %261 : vector<8x1xf32>
    %cst_82 = arith.constant 0.000000e+00 : f32
    %263 = vector.broadcast %cst_82 : f32 to vector<8x1xf32>
    %264 = arith.maximumf %262, %263 : vector<8x1xf32>
    %265 = vector.broadcast %258 : vector<8x1xf32> to vector<8x256xf32>
    %266 = arith.subf %251, %265 : vector<8x256xf32>
    %cst_83 = arith.constant 9.99999974E-6 : f32
    %267 = vector.broadcast %cst_83 : f32 to vector<8x1xf32>
    %268 = arith.addf %264, %267 : vector<8x1xf32>
    %269 = math.rsqrt %268 : vector<8x1xf32>
    %270 = vector.broadcast %269 : vector<8x1xf32> to vector<8x256xf32>
    %271 = arith.mulf %266, %270 : vector<8x256xf32>
    %272 = vector.extract_strided_slice %250 {offsets = [0, 256], sizes = [8, 256], strides = [1, 1]} : vector<8x512xf32> to vector<8x256xf32>
    %cst_84 = arith.constant dense<0.000000e+00> : vector<8xf32>
    %273 = vector.multi_reduction <add>, %272, %cst_84 [1] : vector<8x256xf32> to vector<8xf32>
    %274 = vector.shape_cast %273 : vector<8xf32> to vector<8x1xf32>
    %275 = arith.mulf %272, %272 : vector<8x256xf32>
    %cst_85 = arith.constant dense<0.000000e+00> : vector<8xf32>
    %276 = vector.multi_reduction <add>, %275, %cst_85 [1] : vector<8x256xf32> to vector<8xf32>
    %277 = vector.shape_cast %276 : vector<8xf32> to vector<8x1xf32>
    %cst_86 = arith.constant 3.906250e-03 : f32
    %278 = vector.broadcast %cst_86 : f32 to vector<8x1xf32>
    %279 = arith.mulf %274, %278 : vector<8x1xf32>
    %cst_87 = arith.constant 3.906250e-03 : f32
    %280 = vector.broadcast %cst_87 : f32 to vector<8x1xf32>
    %281 = arith.mulf %277, %280 : vector<8x1xf32>
    %282 = arith.mulf %279, %279 : vector<8x1xf32>
    %283 = arith.subf %281, %282 : vector<8x1xf32>
    %cst_88 = arith.constant 0.000000e+00 : f32
    %284 = vector.broadcast %cst_88 : f32 to vector<8x1xf32>
    %285 = arith.maximumf %283, %284 : vector<8x1xf32>
    %286 = vector.broadcast %279 : vector<8x1xf32> to vector<8x256xf32>
    %287 = arith.subf %272, %286 : vector<8x256xf32>
    %cst_89 = arith.constant 9.99999974E-6 : f32
    %288 = vector.broadcast %cst_89 : f32 to vector<8x1xf32>
    %289 = arith.addf %285, %288 : vector<8x1xf32>
    %290 = math.rsqrt %289 : vector<8x1xf32>
    %291 = vector.broadcast %290 : vector<8x1xf32> to vector<8x256xf32>
    %292 = arith.mulf %287, %291 : vector<8x256xf32>
    %293 = tpu.concatenate %271, %292 in 1 : vector<8x256xf32>, vector<8x256xf32> -> vector<8x512xf32>
    %294 = vector.extract_strided_slice %247 {offsets = [0, 1], sizes = [8, 1], strides = [1, 1]} : vector<8x3xf32> to vector<8x1xf32>
    %295 = vector.broadcast %294 : vector<8x1xf32> to vector<8x512xf32>
    %296 = arith.mulf %293, %295 : vector<8x512xf32>
    %297 = vector.extract_strided_slice %247 {offsets = [0, 2], sizes = [8, 1], strides = [1, 1]} : vector<8x3xf32> to vector<8x1xf32>
    %298 = vector.broadcast %297 : vector<8x1xf32> to vector<8x512xf32>
    %299 = arith.addf %296, %298 : vector<8x512xf32>
    %cst_90 = arith.constant 0.000000e+00 : f32
    %300 = vector.broadcast %cst_90 : f32 to vector<8x512xf32>
    %301 = arith.maximumf %299, %300 : vector<8x512xf32>
    %c17_i32_91 = arith.constant 17 : i32
    %302 = tpu.dynamic_rotate %301 by %c17_i32_91 dim 1 : vector<8x512xf32>, i32 -> vector<8x512xf32>
    %303 = vector.broadcast %1 : vector<1x512xf32> to vector<8x512xf32>
    %304 = arith.mulf %302, %303 : vector<8x512xf32>
    %c16_i32_92 = arith.constant 16 : i32
    %305 = tpu.dynamic_rotate %301 by %c16_i32_92 dim 1 : vector<8x512xf32>, i32 -> vector<8x512xf32>
    %306 = vector.broadcast %2 : vector<1x512xf32> to vector<8x512xf32>
    %307 = arith.mulf %305, %306 : vector<8x512xf32>
    %c15_i32_93 = arith.constant 15 : i32
    %308 = tpu.dynamic_rotate %301 by %c15_i32_93 dim 1 : vector<8x512xf32>, i32 -> vector<8x512xf32>
    %309 = vector.broadcast %3 : vector<1x512xf32> to vector<8x512xf32>
    %310 = arith.mulf %308, %309 : vector<8x512xf32>
    %c1_i32_94 = arith.constant 1 : i32
    %311 = tpu.dynamic_rotate %301 by %c1_i32_94 dim 1 : vector<8x512xf32>, i32 -> vector<8x512xf32>
    %312 = vector.broadcast %4 : vector<1x512xf32> to vector<8x512xf32>
    %313 = arith.mulf %311, %312 : vector<8x512xf32>
    %c511_i32_95 = arith.constant 511 : i32
    %314 = tpu.dynamic_rotate %301 by %c511_i32_95 dim 1 : vector<8x512xf32>, i32 -> vector<8x512xf32>
    %315 = vector.broadcast %5 : vector<1x512xf32> to vector<8x512xf32>
    %316 = arith.mulf %314, %315 : vector<8x512xf32>
    %c497_i32_96 = arith.constant 497 : i32
    %317 = tpu.dynamic_rotate %301 by %c497_i32_96 dim 1 : vector<8x512xf32>, i32 -> vector<8x512xf32>
    %318 = vector.broadcast %6 : vector<1x512xf32> to vector<8x512xf32>
    %319 = arith.mulf %317, %318 : vector<8x512xf32>
    %c496_i32_97 = arith.constant 496 : i32
    %320 = tpu.dynamic_rotate %301 by %c496_i32_97 dim 1 : vector<8x512xf32>, i32 -> vector<8x512xf32>
    %321 = vector.broadcast %7 : vector<1x512xf32> to vector<8x512xf32>
    %322 = arith.mulf %320, %321 : vector<8x512xf32>
    %c495_i32_98 = arith.constant 495 : i32
    %323 = tpu.dynamic_rotate %301 by %c495_i32_98 dim 1 : vector<8x512xf32>, i32 -> vector<8x512xf32>
    %324 = vector.broadcast %8 : vector<1x512xf32> to vector<8x512xf32>
    %325 = arith.mulf %323, %324 : vector<8x512xf32>
    %326 = tpu.concatenate %304, %307, %310, %313, %301, %316, %319, %322, %325 in 0 : vector<8x512xf32>, vector<8x512xf32>, vector<8x512xf32>, vector<8x512xf32>, vector<8x512xf32>, vector<8x512xf32>, vector<8x512xf32>, vector<8x512xf32>, vector<8x512xf32> -> vector<72x512xf32>
    %c4 = arith.constant 4 : index
    %c0_99 = arith.constant 0 : index
    %c0_100 = arith.constant 0 : index
    %327 = vector.load %arg2[%c4, %c0_99, %c0_100] : memref<10x8x72xbf16, #tpu.memory_space<vmem>>, vector<1x8x72xbf16>
    %328 = vector.shape_cast %327 : vector<1x8x72xbf16> to vector<8x72xbf16>
    %329 = arith.truncf %326 : vector<72x512xf32> to vector<72x512xbf16>
    %cst_101 = arith.constant dense<0.000000e+00> : vector<8x512xf32>
    %330 = tpu.matmul %328, %329, %cst_101 {dimension_numbers = #tpu.dot_dimension_numbers<[1], [0], [0], [1], [0, 0, 1, 1], [], []>} : vector<8x72xbf16>, vector<72x512xbf16>, vector<8x512xf32> -> vector<8x512xf32>
    %c4_102 = arith.constant 4 : index
    %c0_103 = arith.constant 0 : index
    %c0_104 = arith.constant 0 : index
    %331 = vector.load %arg3[%c4_102, %c0_103, %c0_104] : memref<10x8x3xf32, #tpu.memory_space<vmem>>, vector<1x8x3xf32>
    %332 = vector.shape_cast %331 : vector<1x8x3xf32> to vector<8x3xf32>
    %333 = vector.extract_strided_slice %332 {offsets = [0, 0], sizes = [8, 1], strides = [1, 1]} : vector<8x3xf32> to vector<8x1xf32>
    %334 = vector.broadcast %333 : vector<8x1xf32> to vector<8x512xf32>
    %335 = arith.addf %330, %334 : vector<8x512xf32>
    %cst_105 = arith.constant 0.000000e+00 : f32
    %336 = vector.broadcast %cst_105 : f32 to vector<8x512xf32>
    %337 = arith.maximumf %335, %336 : vector<8x512xf32>
    %c17_i32_106 = arith.constant 17 : i32
    %338 = tpu.dynamic_rotate %337 by %c17_i32_106 dim 1 : vector<8x512xf32>, i32 -> vector<8x512xf32>
    %339 = vector.broadcast %1 : vector<1x512xf32> to vector<8x512xf32>
    %340 = arith.mulf %338, %339 : vector<8x512xf32>
    %c16_i32_107 = arith.constant 16 : i32
    %341 = tpu.dynamic_rotate %337 by %c16_i32_107 dim 1 : vector<8x512xf32>, i32 -> vector<8x512xf32>
    %342 = vector.broadcast %2 : vector<1x512xf32> to vector<8x512xf32>
    %343 = arith.mulf %341, %342 : vector<8x512xf32>
    %c15_i32_108 = arith.constant 15 : i32
    %344 = tpu.dynamic_rotate %337 by %c15_i32_108 dim 1 : vector<8x512xf32>, i32 -> vector<8x512xf32>
    %345 = vector.broadcast %3 : vector<1x512xf32> to vector<8x512xf32>
    %346 = arith.mulf %344, %345 : vector<8x512xf32>
    %c1_i32_109 = arith.constant 1 : i32
    %347 = tpu.dynamic_rotate %337 by %c1_i32_109 dim 1 : vector<8x512xf32>, i32 -> vector<8x512xf32>
    %348 = vector.broadcast %4 : vector<1x512xf32> to vector<8x512xf32>
    %349 = arith.mulf %347, %348 : vector<8x512xf32>
    %c511_i32_110 = arith.constant 511 : i32
    %350 = tpu.dynamic_rotate %337 by %c511_i32_110 dim 1 : vector<8x512xf32>, i32 -> vector<8x512xf32>
    %351 = vector.broadcast %5 : vector<1x512xf32> to vector<8x512xf32>
    %352 = arith.mulf %350, %351 : vector<8x512xf32>
    %c497_i32_111 = arith.constant 497 : i32
    %353 = tpu.dynamic_rotate %337 by %c497_i32_111 dim 1 : vector<8x512xf32>, i32 -> vector<8x512xf32>
    %354 = vector.broadcast %6 : vector<1x512xf32> to vector<8x512xf32>
    %355 = arith.mulf %353, %354 : vector<8x512xf32>
    %c496_i32_112 = arith.constant 496 : i32
    %356 = tpu.dynamic_rotate %337 by %c496_i32_112 dim 1 : vector<8x512xf32>, i32 -> vector<8x512xf32>
    %357 = vector.broadcast %7 : vector<1x512xf32> to vector<8x512xf32>
    %358 = arith.mulf %356, %357 : vector<8x512xf32>
    %c495_i32_113 = arith.constant 495 : i32
    %359 = tpu.dynamic_rotate %337 by %c495_i32_113 dim 1 : vector<8x512xf32>, i32 -> vector<8x512xf32>
    %360 = vector.broadcast %8 : vector<1x512xf32> to vector<8x512xf32>
    %361 = arith.mulf %359, %360 : vector<8x512xf32>
    %362 = tpu.concatenate %340, %343, %346, %349, %337, %352, %355, %358, %361 in 0 : vector<8x512xf32>, vector<8x512xf32>, vector<8x512xf32>, vector<8x512xf32>, vector<8x512xf32>, vector<8x512xf32>, vector<8x512xf32>, vector<8x512xf32>, vector<8x512xf32> -> vector<72x512xf32>
    %c5 = arith.constant 5 : index
    %c0_114 = arith.constant 0 : index
    %c0_115 = arith.constant 0 : index
    %363 = vector.load %arg2[%c5, %c0_114, %c0_115] : memref<10x8x72xbf16, #tpu.memory_space<vmem>>, vector<1x8x72xbf16>
    %364 = vector.shape_cast %363 : vector<1x8x72xbf16> to vector<8x72xbf16>
    %365 = arith.truncf %362 : vector<72x512xf32> to vector<72x512xbf16>
    %cst_116 = arith.constant dense<0.000000e+00> : vector<8x512xf32>
    %366 = tpu.matmul %364, %365, %cst_116 {dimension_numbers = #tpu.dot_dimension_numbers<[1], [0], [0], [1], [0, 0, 1, 1], [], []>} : vector<8x72xbf16>, vector<72x512xbf16>, vector<8x512xf32> -> vector<8x512xf32>
    %c5_117 = arith.constant 5 : index
    %c0_118 = arith.constant 0 : index
    %c0_119 = arith.constant 0 : index
    %367 = vector.load %arg3[%c5_117, %c0_118, %c0_119] : memref<10x8x3xf32, #tpu.memory_space<vmem>>, vector<1x8x3xf32>
    %368 = vector.shape_cast %367 : vector<1x8x3xf32> to vector<8x3xf32>
    %369 = vector.extract_strided_slice %368 {offsets = [0, 0], sizes = [8, 1], strides = [1, 1]} : vector<8x3xf32> to vector<8x1xf32>
    %370 = vector.broadcast %369 : vector<8x1xf32> to vector<8x512xf32>
    %371 = arith.addf %366, %370 : vector<8x512xf32>
    %372 = vector.extract_strided_slice %371 {offsets = [0, 0], sizes = [8, 256], strides = [1, 1]} : vector<8x512xf32> to vector<8x256xf32>
    %cst_120 = arith.constant dense<0.000000e+00> : vector<8xf32>
    %373 = vector.multi_reduction <add>, %372, %cst_120 [1] : vector<8x256xf32> to vector<8xf32>
    %374 = vector.shape_cast %373 : vector<8xf32> to vector<8x1xf32>
    %375 = arith.mulf %372, %372 : vector<8x256xf32>
    %cst_121 = arith.constant dense<0.000000e+00> : vector<8xf32>
    %376 = vector.multi_reduction <add>, %375, %cst_121 [1] : vector<8x256xf32> to vector<8xf32>
    %377 = vector.shape_cast %376 : vector<8xf32> to vector<8x1xf32>
    %cst_122 = arith.constant 3.906250e-03 : f32
    %378 = vector.broadcast %cst_122 : f32 to vector<8x1xf32>
    %379 = arith.mulf %374, %378 : vector<8x1xf32>
    %cst_123 = arith.constant 3.906250e-03 : f32
    %380 = vector.broadcast %cst_123 : f32 to vector<8x1xf32>
    %381 = arith.mulf %377, %380 : vector<8x1xf32>
    %382 = arith.mulf %379, %379 : vector<8x1xf32>
    %383 = arith.subf %381, %382 : vector<8x1xf32>
    %cst_124 = arith.constant 0.000000e+00 : f32
    %384 = vector.broadcast %cst_124 : f32 to vector<8x1xf32>
    %385 = arith.maximumf %383, %384 : vector<8x1xf32>
    %386 = vector.broadcast %379 : vector<8x1xf32> to vector<8x256xf32>
    %387 = arith.subf %372, %386 : vector<8x256xf32>
    %cst_125 = arith.constant 9.99999974E-6 : f32
    %388 = vector.broadcast %cst_125 : f32 to vector<8x1xf32>
    %389 = arith.addf %385, %388 : vector<8x1xf32>
    %390 = math.rsqrt %389 : vector<8x1xf32>
    %391 = vector.broadcast %390 : vector<8x1xf32> to vector<8x256xf32>
    %392 = arith.mulf %387, %391 : vector<8x256xf32>
    %393 = vector.extract_strided_slice %371 {offsets = [0, 256], sizes = [8, 256], strides = [1, 1]} : vector<8x512xf32> to vector<8x256xf32>
    %cst_126 = arith.constant dense<0.000000e+00> : vector<8xf32>
    %394 = vector.multi_reduction <add>, %393, %cst_126 [1] : vector<8x256xf32> to vector<8xf32>
    %395 = vector.shape_cast %394 : vector<8xf32> to vector<8x1xf32>
    %396 = arith.mulf %393, %393 : vector<8x256xf32>
    %cst_127 = arith.constant dense<0.000000e+00> : vector<8xf32>
    %397 = vector.multi_reduction <add>, %396, %cst_127 [1] : vector<8x256xf32> to vector<8xf32>
    %398 = vector.shape_cast %397 : vector<8xf32> to vector<8x1xf32>
    %cst_128 = arith.constant 3.906250e-03 : f32
    %399 = vector.broadcast %cst_128 : f32 to vector<8x1xf32>
    %400 = arith.mulf %395, %399 : vector<8x1xf32>
    %cst_129 = arith.constant 3.906250e-03 : f32
    %401 = vector.broadcast %cst_129 : f32 to vector<8x1xf32>
    %402 = arith.mulf %398, %401 : vector<8x1xf32>
    %403 = arith.mulf %400, %400 : vector<8x1xf32>
    %404 = arith.subf %402, %403 : vector<8x1xf32>
    %cst_130 = arith.constant 0.000000e+00 : f32
    %405 = vector.broadcast %cst_130 : f32 to vector<8x1xf32>
    %406 = arith.maximumf %404, %405 : vector<8x1xf32>
    %407 = vector.broadcast %400 : vector<8x1xf32> to vector<8x256xf32>
    %408 = arith.subf %393, %407 : vector<8x256xf32>
    %cst_131 = arith.constant 9.99999974E-6 : f32
    %409 = vector.broadcast %cst_131 : f32 to vector<8x1xf32>
    %410 = arith.addf %406, %409 : vector<8x1xf32>
    %411 = math.rsqrt %410 : vector<8x1xf32>
    %412 = vector.broadcast %411 : vector<8x1xf32> to vector<8x256xf32>
    %413 = arith.mulf %408, %412 : vector<8x256xf32>
    %414 = tpu.concatenate %392, %413 in 1 : vector<8x256xf32>, vector<8x256xf32> -> vector<8x512xf32>
    %415 = vector.extract_strided_slice %368 {offsets = [0, 1], sizes = [8, 1], strides = [1, 1]} : vector<8x3xf32> to vector<8x1xf32>
    %416 = vector.broadcast %415 : vector<8x1xf32> to vector<8x512xf32>
    %417 = arith.mulf %414, %416 : vector<8x512xf32>
    %418 = vector.extract_strided_slice %368 {offsets = [0, 2], sizes = [8, 1], strides = [1, 1]} : vector<8x3xf32> to vector<8x1xf32>
    %419 = vector.broadcast %418 : vector<8x1xf32> to vector<8x512xf32>
    %420 = arith.addf %417, %419 : vector<8x512xf32>
    %cst_132 = arith.constant 0.000000e+00 : f32
    %421 = vector.broadcast %cst_132 : f32 to vector<8x512xf32>
    %422 = arith.maximumf %420, %421 : vector<8x512xf32>
    %c17_i32_133 = arith.constant 17 : i32
    %423 = tpu.dynamic_rotate %422 by %c17_i32_133 dim 1 : vector<8x512xf32>, i32 -> vector<8x512xf32>
    %424 = vector.broadcast %1 : vector<1x512xf32> to vector<8x512xf32>
    %425 = arith.mulf %423, %424 : vector<8x512xf32>
    %c16_i32_134 = arith.constant 16 : i32
    %426 = tpu.dynamic_rotate %422 by %c16_i32_134 dim 1 : vector<8x512xf32>, i32 -> vector<8x512xf32>
    %427 = vector.broadcast %2 : vector<1x512xf32> to vector<8x512xf32>
    %428 = arith.mulf %426, %427 : vector<8x512xf32>
    %c15_i32_135 = arith.constant 15 : i32
    %429 = tpu.dynamic_rotate %422 by %c15_i32_135 dim 1 : vector<8x512xf32>, i32 -> vector<8x512xf32>
    %430 = vector.broadcast %3 : vector<1x512xf32> to vector<8x512xf32>
    %431 = arith.mulf %429, %430 : vector<8x512xf32>
    %c1_i32_136 = arith.constant 1 : i32
    %432 = tpu.dynamic_rotate %422 by %c1_i32_136 dim 1 : vector<8x512xf32>, i32 -> vector<8x512xf32>
    %433 = vector.broadcast %4 : vector<1x512xf32> to vector<8x512xf32>
    %434 = arith.mulf %432, %433 : vector<8x512xf32>
    %c511_i32_137 = arith.constant 511 : i32
    %435 = tpu.dynamic_rotate %422 by %c511_i32_137 dim 1 : vector<8x512xf32>, i32 -> vector<8x512xf32>
    %436 = vector.broadcast %5 : vector<1x512xf32> to vector<8x512xf32>
    %437 = arith.mulf %435, %436 : vector<8x512xf32>
    %c497_i32_138 = arith.constant 497 : i32
    %438 = tpu.dynamic_rotate %422 by %c497_i32_138 dim 1 : vector<8x512xf32>, i32 -> vector<8x512xf32>
    %439 = vector.broadcast %6 : vector<1x512xf32> to vector<8x512xf32>
    %440 = arith.mulf %438, %439 : vector<8x512xf32>
    %c496_i32_139 = arith.constant 496 : i32
    %441 = tpu.dynamic_rotate %422 by %c496_i32_139 dim 1 : vector<8x512xf32>, i32 -> vector<8x512xf32>
    %442 = vector.broadcast %7 : vector<1x512xf32> to vector<8x512xf32>
    %443 = arith.mulf %441, %442 : vector<8x512xf32>
    %c495_i32_140 = arith.constant 495 : i32
    %444 = tpu.dynamic_rotate %422 by %c495_i32_140 dim 1 : vector<8x512xf32>, i32 -> vector<8x512xf32>
    %445 = vector.broadcast %8 : vector<1x512xf32> to vector<8x512xf32>
    %446 = arith.mulf %444, %445 : vector<8x512xf32>
    %447 = tpu.concatenate %425, %428, %431, %434, %422, %437, %440, %443, %446 in 0 : vector<8x512xf32>, vector<8x512xf32>, vector<8x512xf32>, vector<8x512xf32>, vector<8x512xf32>, vector<8x512xf32>, vector<8x512xf32>, vector<8x512xf32>, vector<8x512xf32> -> vector<72x512xf32>
    %c6 = arith.constant 6 : index
    %c0_141 = arith.constant 0 : index
    %c0_142 = arith.constant 0 : index
    %448 = vector.load %arg2[%c6, %c0_141, %c0_142] : memref<10x8x72xbf16, #tpu.memory_space<vmem>>, vector<1x8x72xbf16>
    %449 = vector.shape_cast %448 : vector<1x8x72xbf16> to vector<8x72xbf16>
    %450 = arith.truncf %447 : vector<72x512xf32> to vector<72x512xbf16>
    %cst_143 = arith.constant dense<0.000000e+00> : vector<8x512xf32>
    %451 = tpu.matmul %449, %450, %cst_143 {dimension_numbers = #tpu.dot_dimension_numbers<[1], [0], [0], [1], [0, 0, 1, 1], [], []>} : vector<8x72xbf16>, vector<72x512xbf16>, vector<8x512xf32> -> vector<8x512xf32>
    %c6_144 = arith.constant 6 : index
    %c0_145 = arith.constant 0 : index
    %c0_146 = arith.constant 0 : index
    %452 = vector.load %arg3[%c6_144, %c0_145, %c0_146] : memref<10x8x3xf32, #tpu.memory_space<vmem>>, vector<1x8x3xf32>
    %453 = vector.shape_cast %452 : vector<1x8x3xf32> to vector<8x3xf32>
    %454 = vector.extract_strided_slice %453 {offsets = [0, 0], sizes = [8, 1], strides = [1, 1]} : vector<8x3xf32> to vector<8x1xf32>
    %455 = vector.broadcast %454 : vector<8x1xf32> to vector<8x512xf32>
    %456 = arith.addf %451, %455 : vector<8x512xf32>
    %457 = vector.extract_strided_slice %456 {offsets = [0, 0], sizes = [8, 256], strides = [1, 1]} : vector<8x512xf32> to vector<8x256xf32>
    %cst_147 = arith.constant dense<0.000000e+00> : vector<8xf32>
    %458 = vector.multi_reduction <add>, %457, %cst_147 [1] : vector<8x256xf32> to vector<8xf32>
    %459 = vector.shape_cast %458 : vector<8xf32> to vector<8x1xf32>
    %460 = arith.mulf %457, %457 : vector<8x256xf32>
    %cst_148 = arith.constant dense<0.000000e+00> : vector<8xf32>
    %461 = vector.multi_reduction <add>, %460, %cst_148 [1] : vector<8x256xf32> to vector<8xf32>
    %462 = vector.shape_cast %461 : vector<8xf32> to vector<8x1xf32>
    %cst_149 = arith.constant 3.906250e-03 : f32
    %463 = vector.broadcast %cst_149 : f32 to vector<8x1xf32>
    %464 = arith.mulf %459, %463 : vector<8x1xf32>
    %cst_150 = arith.constant 3.906250e-03 : f32
    %465 = vector.broadcast %cst_150 : f32 to vector<8x1xf32>
    %466 = arith.mulf %462, %465 : vector<8x1xf32>
    %467 = arith.mulf %464, %464 : vector<8x1xf32>
    %468 = arith.subf %466, %467 : vector<8x1xf32>
    %cst_151 = arith.constant 0.000000e+00 : f32
    %469 = vector.broadcast %cst_151 : f32 to vector<8x1xf32>
    %470 = arith.maximumf %468, %469 : vector<8x1xf32>
    %471 = vector.broadcast %464 : vector<8x1xf32> to vector<8x256xf32>
    %472 = arith.subf %457, %471 : vector<8x256xf32>
    %cst_152 = arith.constant 9.99999974E-6 : f32
    %473 = vector.broadcast %cst_152 : f32 to vector<8x1xf32>
    %474 = arith.addf %470, %473 : vector<8x1xf32>
    %475 = math.rsqrt %474 : vector<8x1xf32>
    %476 = vector.broadcast %475 : vector<8x1xf32> to vector<8x256xf32>
    %477 = arith.mulf %472, %476 : vector<8x256xf32>
    %478 = vector.extract_strided_slice %456 {offsets = [0, 256], sizes = [8, 256], strides = [1, 1]} : vector<8x512xf32> to vector<8x256xf32>
    %cst_153 = arith.constant dense<0.000000e+00> : vector<8xf32>
    %479 = vector.multi_reduction <add>, %478, %cst_153 [1] : vector<8x256xf32> to vector<8xf32>
    %480 = vector.shape_cast %479 : vector<8xf32> to vector<8x1xf32>
    %481 = arith.mulf %478, %478 : vector<8x256xf32>
    %cst_154 = arith.constant dense<0.000000e+00> : vector<8xf32>
    %482 = vector.multi_reduction <add>, %481, %cst_154 [1] : vector<8x256xf32> to vector<8xf32>
    %483 = vector.shape_cast %482 : vector<8xf32> to vector<8x1xf32>
    %cst_155 = arith.constant 3.906250e-03 : f32
    %484 = vector.broadcast %cst_155 : f32 to vector<8x1xf32>
    %485 = arith.mulf %480, %484 : vector<8x1xf32>
    %cst_156 = arith.constant 3.906250e-03 : f32
    %486 = vector.broadcast %cst_156 : f32 to vector<8x1xf32>
    %487 = arith.mulf %483, %486 : vector<8x1xf32>
    %488 = arith.mulf %485, %485 : vector<8x1xf32>
    %489 = arith.subf %487, %488 : vector<8x1xf32>
    %cst_157 = arith.constant 0.000000e+00 : f32
    %490 = vector.broadcast %cst_157 : f32 to vector<8x1xf32>
    %491 = arith.maximumf %489, %490 : vector<8x1xf32>
    %492 = vector.broadcast %485 : vector<8x1xf32> to vector<8x256xf32>
    %493 = arith.subf %478, %492 : vector<8x256xf32>
    %cst_158 = arith.constant 9.99999974E-6 : f32
    %494 = vector.broadcast %cst_158 : f32 to vector<8x1xf32>
    %495 = arith.addf %491, %494 : vector<8x1xf32>
    %496 = math.rsqrt %495 : vector<8x1xf32>
    %497 = vector.broadcast %496 : vector<8x1xf32> to vector<8x256xf32>
    %498 = arith.mulf %493, %497 : vector<8x256xf32>
    %499 = tpu.concatenate %477, %498 in 1 : vector<8x256xf32>, vector<8x256xf32> -> vector<8x512xf32>
    %500 = vector.extract_strided_slice %453 {offsets = [0, 1], sizes = [8, 1], strides = [1, 1]} : vector<8x3xf32> to vector<8x1xf32>
    %501 = vector.broadcast %500 : vector<8x1xf32> to vector<8x512xf32>
    %502 = arith.mulf %499, %501 : vector<8x512xf32>
    %503 = vector.extract_strided_slice %453 {offsets = [0, 2], sizes = [8, 1], strides = [1, 1]} : vector<8x3xf32> to vector<8x1xf32>
    %504 = vector.broadcast %503 : vector<8x1xf32> to vector<8x512xf32>
    %505 = arith.addf %502, %504 : vector<8x512xf32>
    %cst_159 = arith.constant 0.000000e+00 : f32
    %506 = vector.broadcast %cst_159 : f32 to vector<8x512xf32>
    %507 = arith.maximumf %505, %506 : vector<8x512xf32>
    %c17_i32_160 = arith.constant 17 : i32
    %508 = tpu.dynamic_rotate %507 by %c17_i32_160 dim 1 : vector<8x512xf32>, i32 -> vector<8x512xf32>
    %509 = vector.broadcast %1 : vector<1x512xf32> to vector<8x512xf32>
    %510 = arith.mulf %508, %509 : vector<8x512xf32>
    %c16_i32_161 = arith.constant 16 : i32
    %511 = tpu.dynamic_rotate %507 by %c16_i32_161 dim 1 : vector<8x512xf32>, i32 -> vector<8x512xf32>
    %512 = vector.broadcast %2 : vector<1x512xf32> to vector<8x512xf32>
    %513 = arith.mulf %511, %512 : vector<8x512xf32>
    %c15_i32_162 = arith.constant 15 : i32
    %514 = tpu.dynamic_rotate %507 by %c15_i32_162 dim 1 : vector<8x512xf32>, i32 -> vector<8x512xf32>
    %515 = vector.broadcast %3 : vector<1x512xf32> to vector<8x512xf32>
    %516 = arith.mulf %514, %515 : vector<8x512xf32>
    %c1_i32_163 = arith.constant 1 : i32
    %517 = tpu.dynamic_rotate %507 by %c1_i32_163 dim 1 : vector<8x512xf32>, i32 -> vector<8x512xf32>
    %518 = vector.broadcast %4 : vector<1x512xf32> to vector<8x512xf32>
    %519 = arith.mulf %517, %518 : vector<8x512xf32>
    %c511_i32_164 = arith.constant 511 : i32
    %520 = tpu.dynamic_rotate %507 by %c511_i32_164 dim 1 : vector<8x512xf32>, i32 -> vector<8x512xf32>
    %521 = vector.broadcast %5 : vector<1x512xf32> to vector<8x512xf32>
    %522 = arith.mulf %520, %521 : vector<8x512xf32>
    %c497_i32_165 = arith.constant 497 : i32
    %523 = tpu.dynamic_rotate %507 by %c497_i32_165 dim 1 : vector<8x512xf32>, i32 -> vector<8x512xf32>
    %524 = vector.broadcast %6 : vector<1x512xf32> to vector<8x512xf32>
    %525 = arith.mulf %523, %524 : vector<8x512xf32>
    %c496_i32_166 = arith.constant 496 : i32
    %526 = tpu.dynamic_rotate %507 by %c496_i32_166 dim 1 : vector<8x512xf32>, i32 -> vector<8x512xf32>
    %527 = vector.broadcast %7 : vector<1x512xf32> to vector<8x512xf32>
    %528 = arith.mulf %526, %527 : vector<8x512xf32>
    %c495_i32_167 = arith.constant 495 : i32
    %529 = tpu.dynamic_rotate %507 by %c495_i32_167 dim 1 : vector<8x512xf32>, i32 -> vector<8x512xf32>
    %530 = vector.broadcast %8 : vector<1x512xf32> to vector<8x512xf32>
    %531 = arith.mulf %529, %530 : vector<8x512xf32>
    %532 = tpu.concatenate %510, %513, %516, %519, %507, %522, %525, %528, %531 in 0 : vector<8x512xf32>, vector<8x512xf32>, vector<8x512xf32>, vector<8x512xf32>, vector<8x512xf32>, vector<8x512xf32>, vector<8x512xf32>, vector<8x512xf32>, vector<8x512xf32> -> vector<72x512xf32>
    %c7 = arith.constant 7 : index
    %c0_168 = arith.constant 0 : index
    %c0_169 = arith.constant 0 : index
    %533 = vector.load %arg2[%c7, %c0_168, %c0_169] : memref<10x8x72xbf16, #tpu.memory_space<vmem>>, vector<1x8x72xbf16>
    %534 = vector.shape_cast %533 : vector<1x8x72xbf16> to vector<8x72xbf16>
    %535 = arith.truncf %532 : vector<72x512xf32> to vector<72x512xbf16>
    %cst_170 = arith.constant dense<0.000000e+00> : vector<8x512xf32>
    %536 = tpu.matmul %534, %535, %cst_170 {dimension_numbers = #tpu.dot_dimension_numbers<[1], [0], [0], [1], [0, 0, 1, 1], [], []>} : vector<8x72xbf16>, vector<72x512xbf16>, vector<8x512xf32> -> vector<8x512xf32>
    %c7_171 = arith.constant 7 : index
    %c0_172 = arith.constant 0 : index
    %c0_173 = arith.constant 0 : index
    %537 = vector.load %arg3[%c7_171, %c0_172, %c0_173] : memref<10x8x3xf32, #tpu.memory_space<vmem>>, vector<1x8x3xf32>
    %538 = vector.shape_cast %537 : vector<1x8x3xf32> to vector<8x3xf32>
    %539 = vector.extract_strided_slice %538 {offsets = [0, 0], sizes = [8, 1], strides = [1, 1]} : vector<8x3xf32> to vector<8x1xf32>
    %540 = vector.broadcast %539 : vector<8x1xf32> to vector<8x512xf32>
    %541 = arith.addf %536, %540 : vector<8x512xf32>
    %542 = vector.extract_strided_slice %541 {offsets = [0, 0], sizes = [8, 256], strides = [1, 1]} : vector<8x512xf32> to vector<8x256xf32>
    %cst_174 = arith.constant dense<0.000000e+00> : vector<8xf32>
    %543 = vector.multi_reduction <add>, %542, %cst_174 [1] : vector<8x256xf32> to vector<8xf32>
    %544 = vector.shape_cast %543 : vector<8xf32> to vector<8x1xf32>
    %545 = arith.mulf %542, %542 : vector<8x256xf32>
    %cst_175 = arith.constant dense<0.000000e+00> : vector<8xf32>
    %546 = vector.multi_reduction <add>, %545, %cst_175 [1] : vector<8x256xf32> to vector<8xf32>
    %547 = vector.shape_cast %546 : vector<8xf32> to vector<8x1xf32>
    %cst_176 = arith.constant 3.906250e-03 : f32
    %548 = vector.broadcast %cst_176 : f32 to vector<8x1xf32>
    %549 = arith.mulf %544, %548 : vector<8x1xf32>
    %cst_177 = arith.constant 3.906250e-03 : f32
    %550 = vector.broadcast %cst_177 : f32 to vector<8x1xf32>
    %551 = arith.mulf %547, %550 : vector<8x1xf32>
    %552 = arith.mulf %549, %549 : vector<8x1xf32>
    %553 = arith.subf %551, %552 : vector<8x1xf32>
    %cst_178 = arith.constant 0.000000e+00 : f32
    %554 = vector.broadcast %cst_178 : f32 to vector<8x1xf32>
    %555 = arith.maximumf %553, %554 : vector<8x1xf32>
    %556 = vector.broadcast %549 : vector<8x1xf32> to vector<8x256xf32>
    %557 = arith.subf %542, %556 : vector<8x256xf32>
    %cst_179 = arith.constant 9.99999974E-6 : f32
    %558 = vector.broadcast %cst_179 : f32 to vector<8x1xf32>
    %559 = arith.addf %555, %558 : vector<8x1xf32>
    %560 = math.rsqrt %559 : vector<8x1xf32>
    %561 = vector.broadcast %560 : vector<8x1xf32> to vector<8x256xf32>
    %562 = arith.mulf %557, %561 : vector<8x256xf32>
    %563 = vector.extract_strided_slice %541 {offsets = [0, 256], sizes = [8, 256], strides = [1, 1]} : vector<8x512xf32> to vector<8x256xf32>
    %cst_180 = arith.constant dense<0.000000e+00> : vector<8xf32>
    %564 = vector.multi_reduction <add>, %563, %cst_180 [1] : vector<8x256xf32> to vector<8xf32>
    %565 = vector.shape_cast %564 : vector<8xf32> to vector<8x1xf32>
    %566 = arith.mulf %563, %563 : vector<8x256xf32>
    %cst_181 = arith.constant dense<0.000000e+00> : vector<8xf32>
    %567 = vector.multi_reduction <add>, %566, %cst_181 [1] : vector<8x256xf32> to vector<8xf32>
    %568 = vector.shape_cast %567 : vector<8xf32> to vector<8x1xf32>
    %cst_182 = arith.constant 3.906250e-03 : f32
    %569 = vector.broadcast %cst_182 : f32 to vector<8x1xf32>
    %570 = arith.mulf %565, %569 : vector<8x1xf32>
    %cst_183 = arith.constant 3.906250e-03 : f32
    %571 = vector.broadcast %cst_183 : f32 to vector<8x1xf32>
    %572 = arith.mulf %568, %571 : vector<8x1xf32>
    %573 = arith.mulf %570, %570 : vector<8x1xf32>
    %574 = arith.subf %572, %573 : vector<8x1xf32>
    %cst_184 = arith.constant 0.000000e+00 : f32
    %575 = vector.broadcast %cst_184 : f32 to vector<8x1xf32>
    %576 = arith.maximumf %574, %575 : vector<8x1xf32>
    %577 = vector.broadcast %570 : vector<8x1xf32> to vector<8x256xf32>
    %578 = arith.subf %563, %577 : vector<8x256xf32>
    %cst_185 = arith.constant 9.99999974E-6 : f32
    %579 = vector.broadcast %cst_185 : f32 to vector<8x1xf32>
    %580 = arith.addf %576, %579 : vector<8x1xf32>
    %581 = math.rsqrt %580 : vector<8x1xf32>
    %582 = vector.broadcast %581 : vector<8x1xf32> to vector<8x256xf32>
    %583 = arith.mulf %578, %582 : vector<8x256xf32>
    %584 = tpu.concatenate %562, %583 in 1 : vector<8x256xf32>, vector<8x256xf32> -> vector<8x512xf32>
    %585 = vector.extract_strided_slice %538 {offsets = [0, 1], sizes = [8, 1], strides = [1, 1]} : vector<8x3xf32> to vector<8x1xf32>
    %586 = vector.broadcast %585 : vector<8x1xf32> to vector<8x512xf32>
    %587 = arith.mulf %584, %586 : vector<8x512xf32>
    %588 = vector.extract_strided_slice %538 {offsets = [0, 2], sizes = [8, 1], strides = [1, 1]} : vector<8x3xf32> to vector<8x1xf32>
    %589 = vector.broadcast %588 : vector<8x1xf32> to vector<8x512xf32>
    %590 = arith.addf %587, %589 : vector<8x512xf32>
    %cst_186 = arith.constant 0.000000e+00 : f32
    %591 = vector.broadcast %cst_186 : f32 to vector<8x512xf32>
    %592 = arith.maximumf %590, %591 : vector<8x512xf32>
    %c17_i32_187 = arith.constant 17 : i32
    %593 = tpu.dynamic_rotate %592 by %c17_i32_187 dim 1 : vector<8x512xf32>, i32 -> vector<8x512xf32>
    %594 = vector.broadcast %1 : vector<1x512xf32> to vector<8x512xf32>
    %595 = arith.mulf %593, %594 : vector<8x512xf32>
    %c16_i32_188 = arith.constant 16 : i32
    %596 = tpu.dynamic_rotate %592 by %c16_i32_188 dim 1 : vector<8x512xf32>, i32 -> vector<8x512xf32>
    %597 = vector.broadcast %2 : vector<1x512xf32> to vector<8x512xf32>
    %598 = arith.mulf %596, %597 : vector<8x512xf32>
    %c15_i32_189 = arith.constant 15 : i32
    %599 = tpu.dynamic_rotate %592 by %c15_i32_189 dim 1 : vector<8x512xf32>, i32 -> vector<8x512xf32>
    %600 = vector.broadcast %3 : vector<1x512xf32> to vector<8x512xf32>
    %601 = arith.mulf %599, %600 : vector<8x512xf32>
    %c1_i32_190 = arith.constant 1 : i32
    %602 = tpu.dynamic_rotate %592 by %c1_i32_190 dim 1 : vector<8x512xf32>, i32 -> vector<8x512xf32>
    %603 = vector.broadcast %4 : vector<1x512xf32> to vector<8x512xf32>
    %604 = arith.mulf %602, %603 : vector<8x512xf32>
    %c511_i32_191 = arith.constant 511 : i32
    %605 = tpu.dynamic_rotate %592 by %c511_i32_191 dim 1 : vector<8x512xf32>, i32 -> vector<8x512xf32>
    %606 = vector.broadcast %5 : vector<1x512xf32> to vector<8x512xf32>
    %607 = arith.mulf %605, %606 : vector<8x512xf32>
    %c497_i32_192 = arith.constant 497 : i32
    %608 = tpu.dynamic_rotate %592 by %c497_i32_192 dim 1 : vector<8x512xf32>, i32 -> vector<8x512xf32>
    %609 = vector.broadcast %6 : vector<1x512xf32> to vector<8x512xf32>
    %610 = arith.mulf %608, %609 : vector<8x512xf32>
    %c496_i32_193 = arith.constant 496 : i32
    %611 = tpu.dynamic_rotate %592 by %c496_i32_193 dim 1 : vector<8x512xf32>, i32 -> vector<8x512xf32>
    %612 = vector.broadcast %7 : vector<1x512xf32> to vector<8x512xf32>
    %613 = arith.mulf %611, %612 : vector<8x512xf32>
    %c495_i32_194 = arith.constant 495 : i32
    %614 = tpu.dynamic_rotate %592 by %c495_i32_194 dim 1 : vector<8x512xf32>, i32 -> vector<8x512xf32>
    %615 = vector.broadcast %8 : vector<1x512xf32> to vector<8x512xf32>
    %616 = arith.mulf %614, %615 : vector<8x512xf32>
    %617 = tpu.concatenate %595, %598, %601, %604, %592, %607, %610, %613, %616 in 0 : vector<8x512xf32>, vector<8x512xf32>, vector<8x512xf32>, vector<8x512xf32>, vector<8x512xf32>, vector<8x512xf32>, vector<8x512xf32>, vector<8x512xf32>, vector<8x512xf32> -> vector<72x512xf32>
    %c8 = arith.constant 8 : index
    %c0_195 = arith.constant 0 : index
    %c0_196 = arith.constant 0 : index
    %618 = vector.load %arg2[%c8, %c0_195, %c0_196] : memref<10x8x72xbf16, #tpu.memory_space<vmem>>, vector<1x8x72xbf16>
    %619 = vector.shape_cast %618 : vector<1x8x72xbf16> to vector<8x72xbf16>
    %620 = arith.truncf %617 : vector<72x512xf32> to vector<72x512xbf16>
    %cst_197 = arith.constant dense<0.000000e+00> : vector<8x512xf32>
    %621 = tpu.matmul %619, %620, %cst_197 {dimension_numbers = #tpu.dot_dimension_numbers<[1], [0], [0], [1], [0, 0, 1, 1], [], []>} : vector<8x72xbf16>, vector<72x512xbf16>, vector<8x512xf32> -> vector<8x512xf32>
    %c8_198 = arith.constant 8 : index
    %c0_199 = arith.constant 0 : index
    %c0_200 = arith.constant 0 : index
    %622 = vector.load %arg3[%c8_198, %c0_199, %c0_200] : memref<10x8x3xf32, #tpu.memory_space<vmem>>, vector<1x8x3xf32>
    %623 = vector.shape_cast %622 : vector<1x8x3xf32> to vector<8x3xf32>
    %624 = vector.extract_strided_slice %623 {offsets = [0, 0], sizes = [8, 1], strides = [1, 1]} : vector<8x3xf32> to vector<8x1xf32>
    %625 = vector.broadcast %624 : vector<8x1xf32> to vector<8x512xf32>
    %626 = arith.addf %621, %625 : vector<8x512xf32>
    %627 = vector.extract_strided_slice %626 {offsets = [0, 0], sizes = [8, 256], strides = [1, 1]} : vector<8x512xf32> to vector<8x256xf32>
    %cst_201 = arith.constant dense<0.000000e+00> : vector<8xf32>
    %628 = vector.multi_reduction <add>, %627, %cst_201 [1] : vector<8x256xf32> to vector<8xf32>
    %629 = vector.shape_cast %628 : vector<8xf32> to vector<8x1xf32>
    %630 = arith.mulf %627, %627 : vector<8x256xf32>
    %cst_202 = arith.constant dense<0.000000e+00> : vector<8xf32>
    %631 = vector.multi_reduction <add>, %630, %cst_202 [1] : vector<8x256xf32> to vector<8xf32>
    %632 = vector.shape_cast %631 : vector<8xf32> to vector<8x1xf32>
    %cst_203 = arith.constant 3.906250e-03 : f32
    %633 = vector.broadcast %cst_203 : f32 to vector<8x1xf32>
    %634 = arith.mulf %629, %633 : vector<8x1xf32>
    %cst_204 = arith.constant 3.906250e-03 : f32
    %635 = vector.broadcast %cst_204 : f32 to vector<8x1xf32>
    %636 = arith.mulf %632, %635 : vector<8x1xf32>
    %637 = arith.mulf %634, %634 : vector<8x1xf32>
    %638 = arith.subf %636, %637 : vector<8x1xf32>
    %cst_205 = arith.constant 0.000000e+00 : f32
    %639 = vector.broadcast %cst_205 : f32 to vector<8x1xf32>
    %640 = arith.maximumf %638, %639 : vector<8x1xf32>
    %641 = vector.broadcast %634 : vector<8x1xf32> to vector<8x256xf32>
    %642 = arith.subf %627, %641 : vector<8x256xf32>
    %cst_206 = arith.constant 9.99999974E-6 : f32
    %643 = vector.broadcast %cst_206 : f32 to vector<8x1xf32>
    %644 = arith.addf %640, %643 : vector<8x1xf32>
    %645 = math.rsqrt %644 : vector<8x1xf32>
    %646 = vector.broadcast %645 : vector<8x1xf32> to vector<8x256xf32>
    %647 = arith.mulf %642, %646 : vector<8x256xf32>
    %648 = vector.extract_strided_slice %626 {offsets = [0, 256], sizes = [8, 256], strides = [1, 1]} : vector<8x512xf32> to vector<8x256xf32>
    %cst_207 = arith.constant dense<0.000000e+00> : vector<8xf32>
    %649 = vector.multi_reduction <add>, %648, %cst_207 [1] : vector<8x256xf32> to vector<8xf32>
    %650 = vector.shape_cast %649 : vector<8xf32> to vector<8x1xf32>
    %651 = arith.mulf %648, %648 : vector<8x256xf32>
    %cst_208 = arith.constant dense<0.000000e+00> : vector<8xf32>
    %652 = vector.multi_reduction <add>, %651, %cst_208 [1] : vector<8x256xf32> to vector<8xf32>
    %653 = vector.shape_cast %652 : vector<8xf32> to vector<8x1xf32>
    %cst_209 = arith.constant 3.906250e-03 : f32
    %654 = vector.broadcast %cst_209 : f32 to vector<8x1xf32>
    %655 = arith.mulf %650, %654 : vector<8x1xf32>
    %cst_210 = arith.constant 3.906250e-03 : f32
    %656 = vector.broadcast %cst_210 : f32 to vector<8x1xf32>
    %657 = arith.mulf %653, %656 : vector<8x1xf32>
    %658 = arith.mulf %655, %655 : vector<8x1xf32>
    %659 = arith.subf %657, %658 : vector<8x1xf32>
    %cst_211 = arith.constant 0.000000e+00 : f32
    %660 = vector.broadcast %cst_211 : f32 to vector<8x1xf32>
    %661 = arith.maximumf %659, %660 : vector<8x1xf32>
    %662 = vector.broadcast %655 : vector<8x1xf32> to vector<8x256xf32>
    %663 = arith.subf %648, %662 : vector<8x256xf32>
    %cst_212 = arith.constant 9.99999974E-6 : f32
    %664 = vector.broadcast %cst_212 : f32 to vector<8x1xf32>
    %665 = arith.addf %661, %664 : vector<8x1xf32>
    %666 = math.rsqrt %665 : vector<8x1xf32>
    %667 = vector.broadcast %666 : vector<8x1xf32> to vector<8x256xf32>
    %668 = arith.mulf %663, %667 : vector<8x256xf32>
    %669 = tpu.concatenate %647, %668 in 1 : vector<8x256xf32>, vector<8x256xf32> -> vector<8x512xf32>
    %670 = vector.extract_strided_slice %623 {offsets = [0, 1], sizes = [8, 1], strides = [1, 1]} : vector<8x3xf32> to vector<8x1xf32>
    %671 = vector.broadcast %670 : vector<8x1xf32> to vector<8x512xf32>
    %672 = arith.mulf %669, %671 : vector<8x512xf32>
    %673 = vector.extract_strided_slice %623 {offsets = [0, 2], sizes = [8, 1], strides = [1, 1]} : vector<8x3xf32> to vector<8x1xf32>
    %674 = vector.broadcast %673 : vector<8x1xf32> to vector<8x512xf32>
    %675 = arith.addf %672, %674 : vector<8x512xf32>
    %cst_213 = arith.constant 0.000000e+00 : f32
    %676 = vector.broadcast %cst_213 : f32 to vector<8x512xf32>
    %677 = arith.maximumf %675, %676 : vector<8x512xf32>
    %c17_i32_214 = arith.constant 17 : i32
    %678 = tpu.dynamic_rotate %677 by %c17_i32_214 dim 1 : vector<8x512xf32>, i32 -> vector<8x512xf32>
    %679 = vector.broadcast %1 : vector<1x512xf32> to vector<8x512xf32>
    %680 = arith.mulf %678, %679 : vector<8x512xf32>
    %c16_i32_215 = arith.constant 16 : i32
    %681 = tpu.dynamic_rotate %677 by %c16_i32_215 dim 1 : vector<8x512xf32>, i32 -> vector<8x512xf32>
    %682 = vector.broadcast %2 : vector<1x512xf32> to vector<8x512xf32>
    %683 = arith.mulf %681, %682 : vector<8x512xf32>
    %c15_i32_216 = arith.constant 15 : i32
    %684 = tpu.dynamic_rotate %677 by %c15_i32_216 dim 1 : vector<8x512xf32>, i32 -> vector<8x512xf32>
    %685 = vector.broadcast %3 : vector<1x512xf32> to vector<8x512xf32>
    %686 = arith.mulf %684, %685 : vector<8x512xf32>
    %c1_i32_217 = arith.constant 1 : i32
    %687 = tpu.dynamic_rotate %677 by %c1_i32_217 dim 1 : vector<8x512xf32>, i32 -> vector<8x512xf32>
    %688 = vector.broadcast %4 : vector<1x512xf32> to vector<8x512xf32>
    %689 = arith.mulf %687, %688 : vector<8x512xf32>
    %c511_i32_218 = arith.constant 511 : i32
    %690 = tpu.dynamic_rotate %677 by %c511_i32_218 dim 1 : vector<8x512xf32>, i32 -> vector<8x512xf32>
    %691 = vector.broadcast %5 : vector<1x512xf32> to vector<8x512xf32>
    %692 = arith.mulf %690, %691 : vector<8x512xf32>
    %c497_i32_219 = arith.constant 497 : i32
    %693 = tpu.dynamic_rotate %677 by %c497_i32_219 dim 1 : vector<8x512xf32>, i32 -> vector<8x512xf32>
    %694 = vector.broadcast %6 : vector<1x512xf32> to vector<8x512xf32>
    %695 = arith.mulf %693, %694 : vector<8x512xf32>
    %c496_i32_220 = arith.constant 496 : i32
    %696 = tpu.dynamic_rotate %677 by %c496_i32_220 dim 1 : vector<8x512xf32>, i32 -> vector<8x512xf32>
    %697 = vector.broadcast %7 : vector<1x512xf32> to vector<8x512xf32>
    %698 = arith.mulf %696, %697 : vector<8x512xf32>
    %c495_i32_221 = arith.constant 495 : i32
    %699 = tpu.dynamic_rotate %677 by %c495_i32_221 dim 1 : vector<8x512xf32>, i32 -> vector<8x512xf32>
    %700 = vector.broadcast %8 : vector<1x512xf32> to vector<8x512xf32>
    %701 = arith.mulf %699, %700 : vector<8x512xf32>
    %702 = tpu.concatenate %680, %683, %686, %689, %677, %692, %695, %698, %701 in 0 : vector<8x512xf32>, vector<8x512xf32>, vector<8x512xf32>, vector<8x512xf32>, vector<8x512xf32>, vector<8x512xf32>, vector<8x512xf32>, vector<8x512xf32>, vector<8x512xf32> -> vector<72x512xf32>
    %c9 = arith.constant 9 : index
    %c0_222 = arith.constant 0 : index
    %c0_223 = arith.constant 0 : index
    %703 = vector.load %arg2[%c9, %c0_222, %c0_223] : memref<10x8x72xbf16, #tpu.memory_space<vmem>>, vector<1x8x72xbf16>
    %704 = vector.shape_cast %703 : vector<1x8x72xbf16> to vector<8x72xbf16>
    %705 = vector.extract_strided_slice %704 {offsets = [0, 0], sizes = [4, 72], strides = [1, 1]} : vector<8x72xbf16> to vector<4x72xbf16>
    %706 = arith.truncf %702 : vector<72x512xf32> to vector<72x512xbf16>
    %cst_224 = arith.constant dense<0.000000e+00> : vector<4x512xf32>
    %707 = tpu.matmul %705, %706, %cst_224 {dimension_numbers = #tpu.dot_dimension_numbers<[1], [0], [0], [1], [0, 0, 1, 1], [], []>} : vector<4x72xbf16>, vector<72x512xbf16>, vector<4x512xf32> -> vector<4x512xf32>
    %c9_225 = arith.constant 9 : index
    %c0_226 = arith.constant 0 : index
    %c0_227 = arith.constant 0 : index
    %708 = vector.load %arg3[%c9_225, %c0_226, %c0_227] : memref<10x8x3xf32, #tpu.memory_space<vmem>>, vector<1x8x3xf32>
    %709 = vector.shape_cast %708 : vector<1x8x3xf32> to vector<8x3xf32>
    %710 = vector.extract_strided_slice %709 {offsets = [0, 0], sizes = [4, 1], strides = [1, 1]} : vector<8x3xf32> to vector<4x1xf32>
    %711 = vector.broadcast %710 : vector<4x1xf32> to vector<4x512xf32>
    %712 = arith.addf %707, %711 : vector<4x512xf32>
    %cst_228 = arith.constant 0.000000e+00 : f32
    %713 = vector.broadcast %cst_228 : f32 to vector<4x512xf32>
    %714 = arith.cmpf ogt, %712, %713 : vector<4x512xf32>
    %cst_229 = arith.constant 1.000000e+00 : f32
    %cst_230 = arith.constant 0.000000e+00 : f32
    %715 = vector.broadcast %cst_229 : f32 to vector<4x512xf32>
    %716 = vector.broadcast %cst_230 : f32 to vector<4x512xf32>
    %717 = arith.select %714, %715, %716 : vector<4x512xi1>, vector<4x512xf32>
    %c0_231 = arith.constant 0 : index
    %c0_232 = arith.constant 0 : index
    %718 = vector.load %arg5[%c0_231, %c0_232] : memref<4x512xf32, #tpu.memory_space<vmem>>, vector<4x512xf32>
    tpu.vector_store %arg5[%c0_231, %c0_232], %717 {strides = array<i32>} : memref<4x512xf32, #tpu.memory_space<vmem>>, vector<4x512xf32>,
    return
  }
  func.func @transform_0(%arg0: i32) -> (i32, i32) {
    %c0_i32 = arith.constant 0 : i32
    %c0_i32_0 = arith.constant 0 : i32
    return %c0_i32, %arg0 : i32, i32
  }
  func.func @transform_1(%arg0: i32) -> (i32, i32, i32) {
    %c0_i32 = arith.constant 0 : i32
    %c0_i32_0 = arith.constant 0 : i32
    %c0_i32_1 = arith.constant 0 : i32
    %c0_i32_2 = arith.constant 0 : i32
    return %c0_i32, %c0_i32_0, %c0_i32_1 : i32, i32, i32
  }
  func.func @transform_2(%arg0: i32) -> (i32, i32, i32) {
    %c0_i32 = arith.constant 0 : i32
    %c0_i32_0 = arith.constant 0 : i32
    %c0_i32_1 = arith.constant 0 : i32
    %c0_i32_2 = arith.constant 0 : i32
    return %c0_i32, %c0_i32_0, %c0_i32_1 : i32, i32, i32
  }
  func.func @transform_3(%arg0: i32) -> (i32, i32) {
    %c0_i32 = arith.constant 0 : i32
    %c0_i32_0 = arith.constant 0 : i32
    %c0_i32_1 = arith.constant 0 : i32
    return %c0_i32, %c0_i32_0 : i32, i32
  }
  func.func @transform_4(%arg0: i32) -> (i32, i32) {
    %c0_i32 = arith.constant 0 : i32
    %c0_i32_0 = arith.constant 0 : i32
    return %c0_i32, %arg0 : i32, i32
  }
}

</mosaic_0001>

<bundles_post_ra>
// kernel: generator_forward.1
= control target key start
LH: loop header
LB: loop body
LE: loop exit
PB: predicated region body
PF: predicated region fallthrough
CT: control target
= control target key end

     0   :  { %s3321_s19 = smov 111   ;;  %s3323_s20 = smov 112   ;;  %v3328_v4 = vmov 0   ;;  %v38_v6 = vlaneseq  ;;  %vm384_vm1 = vcmask 1041408   ;;  %vm344_vm5 = vcmask 1043456   ;;  %s5434_s0 = inlined_call_operand.vmem [shape: f32[4,512], index: 0, kind: input, shape index: {}]   ;;  %s5435_s2 = inlined_call_operand.vmem [shape: f32[10,8,3], index: 2, kind: input, shape index: {}]   ;;  %s5436_s3 = inlined_call_operand.vmem [shape: f32[8,512], index: 3, kind: input, shape index: {}]   ;;  %s5437_s1 = inlined_call_operand.vmem [shape: bf16[10,8,72], index: 1, kind: input, shape index: {}]   ;;  %s5438_s4 = inlined_call_operand.vmem [shape: f32[4,512], index: 4, kind: output, shape index: {}]  }
   0x1   :  { %v3361_v0 = vld [vmem:[%s5434_s0 + $0x8] sm:$0xff]  ;;  %v3366_v1 = vld [vmem:[%s5434_s0] sm:$0xff]  ;;  %s3322_s0 = smov 127   ;;  %s3324_s21 = smov 113   ;;  %429 = vmatprep.mubr.bf16.mxu0 %v3328_v4  ;;  %470 = vmatprep.mubr.bf16.mxu1 %v3328_v4  ;;  %v3464_v12 = vld [vmem:[%s5436_s3 + $0x18] sm:$0xff]  ;;  %vm380_vm10 = vcmask 293888  }
   0x2   :  { %267 = vrot.lane.b32.xlu1 %v3361_v0, %s3321_s19  ;;  %263 = vrot.lane.b32.xlu0 %v3366_v1, %s3321_s19  ;;  %v3374_v2 = vcombine.high %v3361_v0, %v3361_v0  ;;  %v3378_v3 = vcombine.high %v3366_v1, %v3366_v1  ;;  %s3325_s22 = smov 16   ;;  %s3326_s23 = smov 1   ;;  %v374_v5 = vld [vmem:[%s5435_s2] sm:$0xff]  ;;  %v3446_v7 = vshrl.u32 %v38_v6, 7  ;;  %v3448_v8 = vand.u32 127, %v38_v6  ;;  %v3459_v11 = vld [vmem:[%s5436_s3 + $0x8] sm:$0xff] }
   0x3   :  { %s3327_s24 = smov 17   ;;  %s3329_s25 = smov 15   ;;  %3272 = vset.pattern.permute.xlu0 %v3328_v4  ;;  %v3453_v9 = vld [vmem:[%s5436_s3] sm:$0xff]  ;;  %v3469_v13 = vld [vmem:[%s5436_s3 + $0x10] sm:$0xff]  ;;  %vm640_vm11 = vcmask 588800  }
   0x4   :  { %v278_v10 = vsub.s32 7, %v3446_v7  ;;  %vm271_vm0 = vcmp.lt.s32.totalorder %v3448_v8, 111  ;;  %v179_v40 = vsub.s32 4, %v3446_v7  ;;  %v245_v41 = vsub.s32 6, %v3446_v7 }
   0x5   :  { %vm172_vm2 = vcmp.lt.s32.totalorder %v3448_v8, 127  ;;  %vm238_vm3 = vcmp.lt.s32.totalorder %v3448_v8, 112  ;;  %v212_v49 = vsub.s32 5, %v3446_v7  ;;  %vm205_vm4 = vcmp.lt.s32.totalorder %v3448_v8, 113 }
   0x6   :  { %269 = vrot.lane.b32.xlu1 %v3374_v2, %s3321_s19  ;;  %265 = vrot.lane.b32.xlu0 %v3378_v3, %s3321_s19  ;;  %v3473_v16 = vrot.slane %v3459_v11, %v278_v10  ;;  %v3476_v17 = vrot.slane %v3464_v12, %v278_v10  ;;  %v3479_v18 = vrot.slane %v3453_v9, %v278_v10  ;;  %vm40_vm6 = vcmp.lt.s32.totalorder %v3448_v8, 17 }
   0x7   :  { %v3482_v19 = vrot.slane %v3469_v13, %v278_v10  ;;  %v3500_v44 = vrot.slane %v3453_v9, %v179_v40  ;;  %v3504_v45 = vrot.slane %v3464_v12, %v179_v40  ;;  %v3507_v46 = vrot.slane %v3459_v11, %v179_v40 }
   0x8   :  { %v3510_v47 = vrot.slane %v3469_v13, %v179_v40  ;;  %v3513_v48 = vrot.slane %v3453_v9, %v245_v41  ;;  %v3521_v52 = vrot.slane %v3464_v12, %v245_v41  ;;  %v3524_v54 = vrot.slane %v3459_v11, %v245_v41 }
   0x9   :  { %v3536_v60 = vrot.slane %v3469_v13, %v245_v41  ;;  %v3545_v6 = vrot.slane %v3453_v9, %v212_v49  ;;  %vm73_vm7 = vcmp.lt.s32.totalorder %v3448_v8, 16  ;;  %vm106_vm8 = vcmp.lt.s32.totalorder %v3448_v8, 15 }
   0xa   :  { %166 = vrot.lane.b32.xlu1 %v3378_v3, %s3322_s0  ;;  %164 = vrot.lane.b32.xlu0 %v3366_v1, %s3322_s0  ;;  %vm139_vm9 = vcmp.lt.s32.totalorder %v3448_v8, 1  ;;  %v3254_v8 = vld [vmem:[%s5437_s1 + $0x24] sm:$0xf] }
   0xe   :  { %170 = vrot.lane.b32.xlu1 %v3374_v2, %s3322_s0  ;;  %168 = vrot.lane.b32.xlu0 %v3361_v0, %s3322_s0 }
  0x12   :  { %232 = vrot.lane.b32.xlu1 %v3378_v3, %s3323_s20  ;;  %230 = vrot.lane.b32.xlu0 %v3366_v1, %s3323_s20 }
  0x16   :  { %236 = vrot.lane.b32.xlu1 %v3374_v2, %s3323_s20  ;;  %234 = vrot.lane.b32.xlu0 %v3361_v0, %s3323_s20 }
  0x1a   :  { %199 = vrot.lane.b32.xlu1 %v3378_v3, %s3324_s21  ;;  %197 = vrot.lane.b32.xlu0 %v3366_v1, %s3324_s21 }
  0x1e   :  { %203 = vrot.lane.b32.xlu1 %v3374_v2, %s3324_s21  ;;  %201 = vrot.lane.b32.xlu0 %v3361_v0, %s3324_s21 }
  0x22   :  { %67 = vrot.lane.b32.xlu1 %v3378_v3, %s3325_s22  ;;  %65 = vrot.lane.b32.xlu0 %v3366_v1, %s3325_s22 }
  0x26   :  { %71 = vrot.lane.b32.xlu1 %v3374_v2, %s3325_s22  ;;  %69 = vrot.lane.b32.xlu0 %v3361_v0, %s3325_s22 }
  0x2a   :  { %133 = vrot.lane.b32.xlu1 %v3378_v3, %s3326_s23  ;;  %131 = vrot.lane.b32.xlu0 %v3366_v1, %s3326_s23 }
  0x2e   :  { %137 = vrot.lane.b32.xlu1 %v3374_v2, %s3326_s23  ;;  %135 = vrot.lane.b32.xlu0 %v3361_v0, %s3326_s23 }
  0x32   :  { %32 = vrot.lane.b32.xlu1 %v3378_v3, %s3327_s24  ;;  %30 = vrot.lane.b32.xlu0 %v3366_v1, %s3327_s24 }
  0x36   :  { %36 = vrot.lane.b32.xlu1 %v3374_v2, %s3327_s24  ;;  %34 = vrot.lane.b32.xlu0 %v3361_v0, %s3327_s24 }
  0x3a   :  { %100 = vrot.lane.b32.xlu1 %v3378_v3, %s3329_s25  ;;  %98 = vrot.lane.b32.xlu0 %v3366_v1, %s3329_s25 }
  0x3e   :  { %104 = vrot.lane.b32.xlu1 %v3374_v2, %s3329_s25  ;;  %102 = vrot.lane.b32.xlu0 %v3361_v0, %s3329_s25 }
  0x42   :  { %377 = vperm.xlu0 %3272, %v374_v5  }
  0x74   :  { %v268_v14 = vpop.permute.xlu1 %267  ;;  %v264_v15 = vpop.permute.xlu0 %263 }
  0x78   :  { %v270_v20 = vpop.permute.xlu1 %269  ;;  %v266_v21 = vpop.permute.xlu0 %265 }
  0x79   :  { %v272_v22 = vsel %vm271_vm0, %v268_v14, %v270_v20  ;;  %v274_v23 = vsel %vm271_vm0, %v264_v15, %v266_v21  ;;  %v273_v24 = vsel %vm271_vm0, %v266_v21, %v268_v14  ;;  %v275_v25 = vsel %vm271_vm0, %v270_v20, %v264_v15 }
  0x7a   :  { %v293_v26 = vmul.f32 %v3473_v16, %v273_v24  ;;  %v295_v27 = vmul.f32 %v3476_v17, %v275_v25  ;;  %v292_v28 = vmul.f32 %v3479_v18, %v274_v23  ;;  %v294_v29 = vmul.f32 %v3482_v19, %v272_v22 }
  0x7c   :  { %v167_v30 = vpop.permute.xlu1 %166  ;;  %v165_v31 = vpop.permute.xlu0 %164  ;;  %v371_v32 = vpack.c.bf16 %v293_v26, %v293_v26  ;;  %v373_v33 = vpack.c.bf16 %v295_v27, %v295_v27  ;;  %v370_v34 = vpack.c.bf16 %v292_v28, %v292_v28  ;;  %v372_v35 = vpack.c.bf16 %v294_v29, %v294_v29 }
  0x7d   :  { %v175_v56 = vsel %vm172_vm2, %v165_v31, %v167_v30  ;;  %v3556_v26 = vrot.slane %v3464_v12, %v212_v49  ;;  %v3559_v27 = vrot.slane %v3459_v11, %v212_v49  ;;  %v3562_v28 = vrot.slane %v3469_v13, %v212_v49 }
  0x7e   :  { %3202 = vmatprep.subr.msk.bf16.mxu0 %vm384_vm1, %v371_v32  ;;  %3204 = vmatprep.subr.msk.bf16.mxu1 %vm384_vm1, %v373_v33  ;;  %v386_v36 = vsel %vm384_vm1, %v370_v34, 0  ;;  %v392_v37 = vsel %vm384_vm1, %v372_v35, 0  ;;  %v193_v10 = vmul.f32 %v3500_v44, %v175_v56 }
  0x7f   :  { %408 = vmatpush1.bf16.msra.mxu0 %v386_v36  ;;  %449 = vmatpush1.bf16.msra.mxu1 %v392_v37 }
  0x80   :  { %v171_v38 = vpop.permute.xlu1 %170  ;;  %v169_v39 = vpop.permute.xlu0 %168  ;;  %v324_v32 = vrot.slane %v193_v10, 4 }
  0x81   :  { %v176_v50 = vsel %vm172_vm2, %v171_v38, %v165_v31  ;;  %v174_v51 = vsel %vm172_vm2, %v167_v30, %v169_v39  ;;  %v173_v57 = vsel %vm172_vm2, %v169_v39, %v171_v38 }
  0x82   :  { %v196_v62 = vmul.f32 %v3504_v45, %v176_v50  ;;  %v194_v63 = vmul.f32 %v3507_v46, %v174_v51  ;;  %v195_v14 = vmul.f32 %v3510_v47, %v173_v57 }
  0x84   :  { %v233_v42 = vpop.permute.xlu1 %232  ;;  %v231_v43 = vpop.permute.xlu0 %230  ;;  %v327_v29 = vrot.slane %v196_v62, 4  ;;  %v325_v30 = vrot.slane %v194_v63, 4  ;;  %v326_v33 = vrot.slane %v195_v14, 4 }
  0x85   :  { %v241_v58 = vsel %vm238_vm3, %v231_v43, %v233_v42 }
  0x86   :  { %v259_v15 = vmul.f32 %v3513_v48, %v241_v58  ;;  %v354_v51 = vsel %vm344_vm5, %v3378_v3, %v325_v30  ;;  %v353_v3 = vsel %vm344_vm5, %v3366_v1, %v324_v32 }
  0x88   :  { %v237_v53 = vpop.permute.xlu1 %236  ;;  %v235_v55 = vpop.permute.xlu0 %234  ;;  %v336_v34 = vrot.slane %v259_v15, 4 }
  0x89   :  { %v242_v59 = vsel %vm238_vm3, %v237_v53, %v231_v43  ;;  %v240_v61 = vsel %vm238_vm3, %v233_v42, %v235_v55  ;;  %v239_v5 = vsel %vm238_vm3, %v235_v55, %v237_v53  ;;  %v356_v53 = vsel %vm344_vm5, %v3374_v2, %v327_v29 }
  0x8a   :  { %v262_v20 = vmul.f32 %v3521_v52, %v242_v59  ;;  %v260_v23 = vmul.f32 %v3524_v54, %v240_v61  ;;  %v261_v25 = vmul.f32 %v3536_v60, %v239_v5  ;;  %v355_v61 = vsel %vm344_vm5, %v3361_v0, %v326_v33 }
  0x8b   :  { %v113_v33 = vsub.s32 2, %v3446_v7 }
  0x8c   :  { %v200_v21 = vpop.permute.xlu1 %199  ;;  %v198_v22 = vpop.permute.xlu0 %197  ;;  %v339_v35 = vrot.slane %v262_v20, 4  ;;  %v337_v38 = vrot.slane %v260_v23, 4  ;;  %v338_v42 = vrot.slane %v261_v25, 4  ;;  %v47_v25 = vsub.s32 0, %v3446_v7 }
  0x8d   :  { %v208_v24 = vsel %vm205_vm4, %v198_v22, %v200_v21 }
  0x8e   :  { %v226_v31 = vmul.f32 %v3545_v6, %v208_v24  ;;  %v146_v24 = vsub.s32 3, %v3446_v7 }
  0x90   :  { %v204_v36 = vpop.permute.xlu1 %203  ;;  %v202_v37 = vpop.permute.xlu0 %201  ;;  %v357_v55 = vsel %vm344_vm5, %v226_v31, %v336_v34 }
  0x91   :  { %v209_v39 = vsel %vm205_vm4, %v204_v36, %v198_v22  ;;  %v206_v40 = vsel %vm205_vm4, %v202_v37, %v204_v36  ;;  %v207_v41 = vsel %vm205_vm4, %v200_v21, %v202_v37  ;;  %v366_v2 = vpack.c.bf16 %v357_v55, %v353_v3 }
  0x92   :  { %v229_v43 = vmul.f32 %v3556_v26, %v209_v39  ;;  %v227_v49 = vmul.f32 %v3559_v27, %v207_v41  ;;  %v228_v50 = vmul.f32 %v3562_v28, %v206_v40  ;;  %v80_v22 = vsub.s32 1, %v3446_v7 }
  0x93   :  { %v3610_v36 = vrot.slane %v3453_v9, %v146_v24  ;;  %v3613_v37 = vrot.slane %v3469_v13, %v146_v24  ;;  %v3620_v7 = vrot.slane %v3464_v12, %v146_v24  ;;  %v3623_v40 = vrot.slane %v3459_v11, %v47_v25 }
  0x94   :  { %v68_v56 = vpop.permute.xlu1 %67  ;;  %v66_v57 = vpop.permute.xlu0 %65  ;;  %v358_v58 = vsel %vm344_vm5, %v227_v49, %v337_v38  ;;  %v360_v59 = vsel %vm344_vm5, %v229_v43, %v339_v35  ;;  %v359_v62 = vsel %vm344_vm5, %v228_v50, %v338_v42  ;;  %v3594_v1 = vrot.slane %v3459_v11, %v80_v22 }
  0x95   :  { %v367_v63 = vpack.c.bf16 %v358_v58, %v354_v51  ;;  %v369_v5 = vpack.c.bf16 %v360_v59, %v356_v53  ;;  %v368_v10 = vpack.c.bf16 %v359_v62, %v355_v61  ;;  %v3597_v29 = vrot.slane %v3453_v9, %v80_v22 }
  0x96   :  { %v3600_v30 = vrot.slane %v3469_v13, %v80_v22  ;;  %v3604_v34 = vrot.slane %v3464_v12, %v80_v22  ;;  %v3607_v35 = vrot.slane %v3459_v11, %v146_v24  ;;  %v76_v38 = vsel %vm73_vm7, %v66_v57, %v68_v56 }
  0x97   :  { %409 = vmatprep.subr.bf16.mxu0 %v367_v63  ;;  %450 = vmatprep.subr.bf16.mxu1 %v369_v5  ;;  %v3630_v43 = vrot.slane %v3453_v9, %v47_v25  ;;  %v3633_v49 = vrot.slane %v3469_v13, %v47_v25  ;;  %v3640_v55 = vrot.slane %v3464_v12, %v47_v25 }
  0x98   :  { %v72_v14 = vpop.permute.xlu1 %71  ;;  %410 = vmatpush1.bf16.msra.mxu0 %v366_v2  ;;  %451 = vmatpush1.bf16.msra.mxu1 %v368_v10  ;;  %v70_v15 = vpop.permute.xlu0 %69  ;;  %v95_v58 = vmul.f32 %v3594_v1, %v76_v38  ;;  %v3654_v3 = vrot.slane %v3453_v9, %v113_v33 }
  0x99   :  { %v77_v39 = vsel %vm73_vm7, %v72_v14, %v66_v57  ;;  %v75_v41 = vsel %vm73_vm7, %v68_v56, %v70_v15  ;;  %v74_v50 = vsel %vm73_vm7, %v70_v15, %v72_v14  ;;  %v3643_v57 = vrot.slane %v3459_v11, %v113_v33 }
  0x9a   :  { %v94_v59 = vmul.f32 %v3597_v29, %v77_v39  ;;  %v96_v63 = vmul.f32 %v3600_v30, %v75_v41  ;;  %v3657_v11 = vrot.slane %v3469_v13, %v113_v33  ;;  %v97_v10 = vmul.f32 %v3604_v34, %v74_v50 }
  0x9b   :  { %v3664_v15 = vrot.slane %v3464_v12, %v113_v33  ;;  %v301_v25 = vrot.slane %v95_v58, 4 }
  0x9c   :  { %v134_v20 = vpop.permute.xlu1 %133  ;;  %v132_v21 = vpop.permute.xlu0 %131  ;;  %v300_v38 = vrot.slane %v94_v59, 4 }
  0x9d   :  { %v142_v42 = vsel %vm139_vm9, %v132_v21, %v134_v20 }
  0x9e   :  { %v161_v5 = vmul.f32 %v3607_v35, %v142_v42 }
  0xa0   :  { %v138_v0 = vpop.permute.xlu1 %137  ;;  %v136_v23 = vpop.permute.xlu0 %135  ;;  %v313_v33 = vrot.slane %v161_v5, 4 }
  0xa1   :  { %v143_v51 = vsel %vm139_vm9, %v138_v0, %v132_v21  ;;  %v141_v61 = vsel %vm139_vm9, %v134_v20, %v136_v23  ;;  %v140_v14 = vsel %vm139_vm9, %v136_v23, %v138_v0  ;;  %v302_v23 = vrot.slane %v96_v63, 4 }
  0xa2   :  { %v160_v2 = vmul.f32 %v3610_v36, %v143_v51  ;;  %v162_v20 = vmul.f32 %v3613_v37, %v141_v61  ;;  %v163_v39 = vmul.f32 %v3620_v7, %v140_v14 }
  0xa4   :  { %v33_v31 = vpop.permute.xlu1 %32  ;;  %v31_v32 = vpop.permute.xlu0 %30  ;;  %v312_v42 = vrot.slane %v160_v2, 4  ;;  %v315_v2 = vrot.slane %v163_v39, 4 }
  0xa5   :  { %v43_v62 = vsel %vm40_vm6, %v31_v32, %v33_v31 }
  0xa6   :  { %v62_v21 = vmul.f32 %v3623_v40, %v43_v62 }
  0xa8   :  { %v37_v53 = vpop.permute.xlu1 %36  ;;  %v35_v56 = vpop.permute.xlu0 %34 }
  0xa9   :  { %v44_v9 = vsel %vm40_vm6, %v37_v53, %v31_v32  ;;  %v41_v13 = vsel %vm40_vm6, %v35_v56, %v37_v53  ;;  %v42_v0 = vsel %vm40_vm6, %v33_v31, %v35_v56  ;;  %v303_v32 = vrot.slane %v97_v10, 4 }
  0xaa   :  { %v61_v50 = vmul.f32 %v3630_v43, %v44_v9  ;;  %v64_v51 = vmul.f32 %v3640_v55, %v41_v13  ;;  %v314_v53 = vrot.slane %v162_v20, 4  ;;  %v63_v58 = vmul.f32 %v3633_v49, %v42_v0 }
  0xab   :  { %v346_v56 = vsel %vm344_vm5, %v62_v21, %v301_v25 }
  0xac   :  { %v101_v22 = vpop.permute.xlu1 %100  ;;  %v99_v24 = vpop.permute.xlu0 %98  ;;  %v345_v21 = vsel %vm344_vm5, %v61_v50, %v300_v38  ;;  %v348_v13 = vsel %vm344_vm5, %v64_v51, %v303_v32  ;;  %v347_v0 = vsel %vm344_vm5, %v63_v58, %v302_v23 }
  0xad   :  { %v109_v12 = vsel %vm106_vm8, %v99_v24, %v101_v22 }
  0xae   :  { %v128_v41 = vmul.f32 %v3643_v57, %v109_v12 }
  0xb0   :  { %v105_v59 = vpop.permute.xlu1 %104  ;;  %v103_v31 = vpop.permute.xlu0 %102  ;;  %v350_v61 = vsel %vm344_vm5, %v128_v41, %v313_v33  ;;  %v361_v41 = vld [vmem:[%s5437_s1] sm:$0xf] }
  0xb1   :  { %v110_v62 = vsel %vm106_vm8, %v105_v59, %v99_v24  ;;  %v107_v63 = vsel %vm106_vm8, %v103_v31, %v105_v59  ;;  %v108_v5 = vsel %vm106_vm8, %v101_v22, %v103_v31  ;;  %v363_v10 = vpack.c.bf16 %v350_v61, %v346_v56 }
  0xb2   :  { %v127_v14 = vmul.f32 %v3654_v3, %v110_v62  ;;  %v129_v20 = vmul.f32 %v3657_v11, %v108_v5  ;;  %v130_v9 = vmul.f32 %v3664_v15, %v107_v63 }
  0xb3   :  { %411 = vmatprep.subr.bf16.mxu0 %v363_v10 }
  0xb4   :  { %v349_v24 = vsel %vm344_vm5, %v127_v14, %v312_v42  ;;  %v352_v25 = vsel %vm344_vm5, %v130_v9, %v315_v2  ;;  %v351_v22 = vsel %vm344_vm5, %v129_v20, %v314_v53  ;;  %v3774_v14 = vld [vmem:[%s5435_s2 + $0x8] sm:$0xff] }
  0xb5   :  { %v362_v12 = vpack.c.bf16 %v349_v24, %v345_v21  ;;  %v365_v33 = vpack.c.bf16 %v352_v25, %v348_v13  ;;  %v364_v39 = vpack.c.bf16 %v351_v22, %v347_v0 }
  0xb7   :  { %412 = vmatpush1.bf16.msra.mxu0 %v362_v12  ;;  %452 = vmatprep.subr.bf16.mxu1 %v365_v33 }
  0xb8   :  { %453 = vmatpush1.bf16.msra.mxu1 %v364_v39 }
  0xba   :  { %3203 = vmatmul.mubr.msk.bf16.vlgmr.msra.gmra.mxu0 %vm380_vm10, %v361_v41 }
  0xbb   :  { %3205 = vmatmul.mubr.msk.bf16.vlgmr.msra.gmra.mxu1 %vm380_vm10, %v361_v41  ;;  %688 = vmatprep.mubr.bf16.mxu0 %v3328_v4 }
  0xbc   :  { %729 = vmatprep.mubr.bf16.mxu1 %v3328_v4 }
  0xbd   :  { %v378_v38 = vpop.permute.xlu0 %377 }
 0x17a   :  { %v431_v23 = vpop.f32.mrf.mxu0 }
 0x17b   :  { %v432_v32 = vadd.f32 %v431_v23, %v378_v38  ;;  %v472_v42 = vpop.f32.mrf.mxu1 }
 0x17c   :  { %v473_v50 = vadd.f32 %v472_v42, %v378_v38  ;;  %v433_v51 = vpop.f32.mrf.mxu0 }
 0x17d   :  { %v3703_v53 = vmax.f32 %v432_v32, 0.0  ;;  %v434_v58 = vadd.f32 %v433_v51, %v378_v38  ;;  %v474_v59 = vpop.f32.mrf.mxu1 }
 0x17e   :  { %v3705_v31 = vmax.f32 %v473_v50, 0.0  ;;  %v435_v56 = vpop.f32.mrf.mxu0  ;;  %v475_v5 = vadd.f32 %v474_v59, %v378_v38 }
 0x17f   :  { %v476_v61 = vpop.f32.mrf.mxu1  ;;  %595 = vrot.lane.b32.xlu1 %v3703_v53, %s3321_s19  ;;  %v3711_v63 = vmax.f32 %v434_v58, 0.0 }
 0x180   :  { %v436_v62 = vpop.f32.mrf.mxu0  ;;  %599 = vrot.lane.b32.xlu0 %v3705_v31, %s3321_s19  ;;  %v3717_v2 = vmax.f32 %v475_v5, 0.0 }
 0x181   :  { %v477_v10 = vpop.f32.mrf.mxu1 }
 0x183   :  { %597 = vrot.lane.b32.xlu1 %v3711_v63, %s3321_s19 }
 0x184   :  { %563 = vrot.lane.b32.xlu0 %v3703_v53, %s3324_s21 }
 0x187   :  { %601 = vrot.lane.b32.xlu1 %v3717_v2, %s3321_s19 }
 0x188   :  { %567 = vrot.lane.b32.xlu0 %v3705_v31, %s3324_s21 }
 0x18b   :  { %565 = vrot.lane.b32.xlu1 %v3711_v63, %s3324_s21 }
 0x18c   :  { %579 = vrot.lane.b32.xlu0 %v3703_v53, %s3323_s20 }
 0x18f   :  { %569 = vrot.lane.b32.xlu1 %v3717_v2, %s3324_s21 }
 0x190   :  { %583 = vrot.lane.b32.xlu0 %v3705_v31, %s3323_s20 }
 0x193   :  { %581 = vrot.lane.b32.xlu1 %v3711_v63, %s3323_s20 }
 0x194   :  { %547 = vrot.lane.b32.xlu0 %v3703_v53, %s3322_s0 }
 0x197   :  { %585 = vrot.lane.b32.xlu1 %v3717_v2, %s3323_s20 }
 0x198   :  { %551 = vrot.lane.b32.xlu0 %v3705_v31, %s3322_s0 }
 0x19b   :  { %549 = vrot.lane.b32.xlu1 %v3711_v63, %s3322_s0 }
 0x19c   :  { %515 = vrot.lane.b32.xlu0 %v3703_v53, %s3329_s25 }
 0x19f   :  { %553 = vrot.lane.b32.xlu1 %v3717_v2, %s3322_s0 }
 0x1a0   :  { %519 = vrot.lane.b32.xlu0 %v3705_v31, %s3329_s25 }
 0x1a3   :  { %517 = vrot.lane.b32.xlu1 %v3711_v63, %s3329_s25 }
 0x1a4   :  { %531 = vrot.lane.b32.xlu0 %v3703_v53, %s3326_s23 }
 0x1a7   :  { %521 = vrot.lane.b32.xlu1 %v3717_v2, %s3329_s25 }
 0x1a8   :  { %535 = vrot.lane.b32.xlu0 %v3705_v31, %s3326_s23 }
 0x1ab   :  { %533 = vrot.lane.b32.xlu1 %v3711_v63, %s3326_s23 }
 0x1ac   :  { %483 = vrot.lane.b32.xlu0 %v3703_v53, %s3327_s24 }
 0x1af   :  { %537 = vrot.lane.b32.xlu1 %v3717_v2, %s3326_s23 }
 0x1b0   :  { %487 = vrot.lane.b32.xlu0 %v3705_v31, %s3327_s24 }
 0x1b3   :  { %485 = vrot.lane.b32.xlu1 %v3711_v63, %s3327_s24 }
 0x1b4   :  { %499 = vrot.lane.b32.xlu0 %v3703_v53, %s3325_s22 }
 0x1b7   :  { %489 = vrot.lane.b32.xlu1 %v3717_v2, %s3327_s24 }
 0x1b8   :  { %503 = vrot.lane.b32.xlu0 %v3705_v31, %s3325_s22 }
 0x1bb   :  { %501 = vrot.lane.b32.xlu1 %v3711_v63, %s3325_s22 }
 0x1bc   :  { %637 = vperm.xlu0 %3272, %v3774_v14  }
 0x1bf   :  { %505 = vrot.lane.b32.xlu1 %v3717_v2, %s3325_s22 }
 0x1f1   :  { %v596_v20 = vpop.permute.xlu1 %595 }
 0x1f2   :  { %v600_v9 = vpop.permute.xlu0 %599 }
 0x1f5   :  { %v598_v21 = vpop.permute.xlu1 %597 }
 0x1f6   :  { %v604_v13 = vsel %vm271_vm0, %v598_v21, %v600_v9  ;;  %v605_v24 = vsel %vm271_vm0, %v596_v20, %v598_v21  ;;  %v564_v25 = vpop.permute.xlu0 %563 }
 0x1f7   :  { %v607_v0 = vmul.f32 %v605_v24, %v3479_v18  ;;  %v608_v22 = vmul.f32 %v604_v13, %v3473_v16 }
 0x1f9   :  { %v629_v12 = vpack.c.bf16 %v607_v0, %v607_v0  ;;  %v630_v33 = vpack.c.bf16 %v608_v22, %v608_v22  ;;  %v602_v39 = vpop.permute.xlu1 %601 }
 0x1fa   :  { %v603_v41 = vsel %vm271_vm0, %v600_v9, %v602_v39  ;;  %v606_v38 = vsel %vm271_vm0, %v602_v39, %v596_v20  ;;  %v568_v23 = vpop.permute.xlu0 %567 }
 0x1fb   :  { %v609_v32 = vmul.f32 %v603_v41, %v3482_v19  ;;  %v610_v42 = vmul.f32 %v606_v38, %v3476_v17  ;;  %3208 = vmatprep.subr.msk.bf16.mxu0 %vm344_vm5, %v630_v33  ;;  %v645_v50 = vsel %vm344_vm5, %v629_v12, 0 }
 0x1fc   :  { %663 = vmatpush1.bf16.msra.mxu0 %v645_v50 }
 0x1fd   :  { %v631_v51 = vpack.c.bf16 %v609_v32, %v609_v32  ;;  %v632_v58 = vpack.c.bf16 %v610_v42, %v610_v42  ;;  %v566_v59 = vpop.permute.xlu1 %565 }
 0x1fe   :  { %v580_v56 = vpop.permute.xlu0 %579  ;;  %v572_v10 = vsel %vm205_vm4, %v566_v59, %v568_v23  ;;  %v573_v20 = vsel %vm205_vm4, %v564_v25, %v566_v59 }
 0x1ff   :  { %3210 = vmatprep.subr.msk.bf16.mxu1 %vm344_vm5, %v632_v58  ;;  %v651_v61 = vsel %vm344_vm5, %v631_v51, 0  ;;  %v575_v0 = vmul.f32 %v573_v20, %v3545_v6  ;;  %v576_v22 = vmul.f32 %v572_v10, %v3559_v27 }
 0x200   :  { %704 = vmatpush1.bf16.msra.mxu1 %v651_v61 }
 0x201   :  { %v570_v62 = vpop.permute.xlu1 %569 }
 0x202   :  { %v584_v5 = vpop.permute.xlu0 %583  ;;  %v571_v39 = vsel %vm205_vm4, %v568_v23, %v570_v62  ;;  %v574_v41 = vsel %vm205_vm4, %v570_v62, %v564_v25 }
 0x203   :  { %v577_v59 = vmul.f32 %v571_v39, %v3562_v28  ;;  %v578_v61 = vmul.f32 %v574_v41, %v3556_v26 }
 0x205   :  { %v582_v9 = vpop.permute.xlu1 %581 }
 0x206   :  { %v588_v21 = vsel %vm238_vm3, %v582_v9, %v584_v5  ;;  %v589_v13 = vsel %vm238_vm3, %v580_v56, %v582_v9  ;;  %v548_v24 = vpop.permute.xlu0 %547 }
 0x207   :  { %v591_v12 = vmul.f32 %v589_v13, %v3513_v48  ;;  %v592_v33 = vmul.f32 %v588_v21, %v3524_v54 }
 0x209   :  { %v625_v38 = vpack.c.bf16 %v591_v12, %v575_v0  ;;  %v586_v32 = vpop.permute.xlu1 %585  ;;  %v626_v42 = vpack.c.bf16 %v592_v33, %v576_v22 }
 0x20a   :  { %v587_v50 = vsel %vm238_vm3, %v584_v5, %v586_v32  ;;  %v590_v51 = vsel %vm238_vm3, %v586_v32, %v580_v56  ;;  %v552_v58 = vpop.permute.xlu0 %551 }
 0x20b   :  { %v593_v10 = vmul.f32 %v587_v50, %v3536_v60  ;;  %v594_v23 = vmul.f32 %v590_v51, %v3521_v52  ;;  %664 = vmatprep.subr.bf16.mxu0 %v626_v42 }
 0x20c   :  { %665 = vmatpush1.bf16.msra.mxu0 %v625_v38 }
 0x20d   :  { %v627_v25 = vpack.c.bf16 %v593_v10, %v577_v59  ;;  %v550_v62 = vpop.permute.xlu1 %549  ;;  %v628_v20 = vpack.c.bf16 %v594_v23, %v578_v61 }
 0x20e   :  { %v556_v5 = vsel %vm172_vm2, %v550_v62, %v552_v58  ;;  %v557_v56 = vsel %vm172_vm2, %v548_v24, %v550_v62  ;;  %v516_v9 = vpop.permute.xlu0 %515 }
 0x20f   :  { %v559_v21 = vmul.f32 %v557_v56, %v3500_v44  ;;  %v560_v13 = vmul.f32 %v556_v5, %v3507_v46  ;;  %705 = vmatprep.subr.bf16.mxu1 %v628_v20 }
 0x210   :  { %706 = vmatpush1.bf16.msra.mxu1 %v627_v25 }
 0x211   :  { %v621_v0 = vpack.c.bf16 %v559_v21, %v3703_v53  ;;  %v554_v22 = vpop.permute.xlu1 %553  ;;  %v622_v12 = vpack.c.bf16 %v560_v13, %v3711_v63 }
 0x212   :  { %v555_v33 = vsel %vm172_vm2, %v552_v58, %v554_v22  ;;  %v558_v39 = vsel %vm172_vm2, %v554_v22, %v548_v24  ;;  %v520_v41 = vpop.permute.xlu0 %519 }
 0x213   :  { %v561_v38 = vmul.f32 %v555_v33, %v3510_v47  ;;  %v562_v32 = vmul.f32 %v558_v39, %v3504_v45  ;;  %666 = vmatprep.subr.bf16.mxu0 %v622_v12 }
 0x214   :  { %667 = vmatpush1.bf16.msra.mxu0 %v621_v0 }
 0x215   :  { %v623_v42 = vpack.c.bf16 %v561_v38, %v3705_v31  ;;  %v518_v50 = vpop.permute.xlu1 %517  ;;  %v624_v53 = vpack.c.bf16 %v562_v32, %v3717_v2 }
 0x216   :  { %v532_v51 = vpop.permute.xlu0 %531  ;;  %v525_v24 = vsel %vm106_vm8, %v516_v9, %v518_v50  ;;  %v524_v20 = vsel %vm106_vm8, %v518_v50, %v520_v41 }
 0x217   :  { %707 = vmatprep.subr.bf16.mxu1 %v624_v53  ;;  %v528_v23 = vmul.f32 %v525_v24, %v3643_v57 }
 0x218   :  { %708 = vmatpush1.bf16.msra.mxu1 %v623_v42 }
 0x219   :  { %v522_v63 = vpop.permute.xlu1 %521 }
 0x21a   :  { %v536_v58 = vpop.permute.xlu0 %535  ;;  %v523_v25 = vsel %vm106_vm8, %v520_v41, %v522_v63  ;;  %v526_v62 = vsel %vm106_vm8, %v522_v63, %v516_v9  ;;  %v529_v41 = vmul.f32 %v524_v20, %v3657_v11 }
 0x21b   :  { %v527_v12 = vmul.f32 %v526_v62, %v3654_v3  ;;  %v530_v33 = vmul.f32 %v523_v25, %v3664_v15 }
 0x21d   :  { %v534_v59 = vpop.permute.xlu1 %533 }
 0x21e   :  { %v541_v61 = vsel %vm139_vm9, %v532_v51, %v534_v59  ;;  %v484_v10 = vpop.permute.xlu0 %483  ;;  %v540_v31 = vsel %vm139_vm9, %v534_v59, %v536_v58 }
 0x21f   :  { %v544_v2 = vmul.f32 %v541_v61, %v3607_v35  ;;  %v545_v21 = vmul.f32 %v540_v31, %v3613_v37 }
 0x221   :  { %v538_v5 = vpop.permute.xlu1 %537  ;;  %v618_v56 = vpack.c.bf16 %v544_v2, %v528_v23  ;;  %v619_v50 = vpack.c.bf16 %v545_v21, %v529_v41 }
 0x222   :  { %v539_v13 = vsel %vm139_vm9, %v536_v58, %v538_v5  ;;  %v542_v0 = vsel %vm139_vm9, %v538_v5, %v532_v51  ;;  %v488_v22 = vpop.permute.xlu0 %487 }
 0x223   :  { %v543_v9 = vmul.f32 %v542_v0, %v3610_v36  ;;  %v546_v39 = vmul.f32 %v539_v13, %v3620_v7  ;;  %668 = vmatprep.subr.bf16.mxu0 %v618_v56 }
 0x225   :  { %v617_v38 = vpack.c.bf16 %v543_v9, %v527_v12  ;;  %v486_v32 = vpop.permute.xlu1 %485  ;;  %v620_v42 = vpack.c.bf16 %v546_v39, %v530_v33 }
 0x226   :  { %v500_v53 = vpop.permute.xlu0 %499  ;;  %v493_v63 = vsel %vm40_vm6, %v484_v10, %v486_v32  ;;  %v492_v62 = vsel %vm40_vm6, %v486_v32, %v488_v22  ;;  %v5441_v32 = vmov 1  }
 0x227   :  { %669 = vmatpush1.bf16.msra.mxu0 %v617_v38  ;;  %709 = vmatprep.subr.bf16.mxu1 %v620_v42  ;;  %v496_v61 = vmul.f32 %v493_v63, %v3623_v40  ;;  %v3206_v38 = vld [vmem:[%s5437_s1 + $0x4] sm:$0xf]  ;;  %v5439_v42 = vmov 2  }
 0x228   :  { %710 = vmatpush1.bf16.msra.mxu1 %v619_v50  ;;  %3273 = vset.pattern.permute.xlu0 %v5441_v32 }
 0x229   :  { %v490_v51 = vpop.permute.xlu1 %489  ;;  %3274 = vset.pattern.permute.xlu1 %v5439_v42 }
 0x22a   :  { %v504_v24 = vpop.permute.xlu0 %503  ;;  %v491_v2 = vsel %vm40_vm6, %v488_v22, %v490_v51  ;;  %v494_v25 = vsel %vm40_vm6, %v490_v51, %v484_v10  ;;  %v497_v22 = vmul.f32 %v492_v62, %v3633_v49 }
 0x22b   :  { %v495_v0 = vmul.f32 %v494_v25, %v3630_v43  ;;  %v498_v12 = vmul.f32 %v491_v2, %v3640_v55 }
 0x22d   :  { %v502_v58 = vpop.permute.xlu1 %501 }
 0x22e   :  { %v509_v59 = vsel %vm73_vm7, %v500_v53, %v502_v58  ;;  %v508_v23 = vsel %vm73_vm7, %v502_v58, %v504_v24 }
 0x22f   :  { %v512_v31 = vmul.f32 %v509_v59, %v3594_v1  ;;  %v513_v56 = vmul.f32 %v508_v23, %v3600_v30 }
 0x231   :  { %v506_v20 = vpop.permute.xlu1 %505  ;;  %v614_v5 = vpack.c.bf16 %v512_v31, %v496_v61  ;;  %v615_v41 = vpack.c.bf16 %v513_v56, %v497_v22 }
 0x232   :  { %v507_v21 = vsel %vm73_vm7, %v504_v24, %v506_v20  ;;  %v510_v13 = vsel %vm73_vm7, %v506_v20, %v500_v53 }
 0x233   :  { %v511_v33 = vmul.f32 %v510_v13, %v3597_v29  ;;  %v514_v10 = vmul.f32 %v507_v21, %v3604_v34  ;;  %670 = vmatprep.subr.bf16.mxu0 %v614_v5 }
 0x235   :  { %v613_v9 = vpack.c.bf16 %v511_v33, %v495_v0  ;;  %v616_v39 = vpack.c.bf16 %v514_v10, %v498_v12 }
 0x237   :  { %671 = vmatpush1.bf16.msra.mxu0 %v613_v9  ;;  %711 = vmatprep.subr.bf16.mxu1 %v616_v39  ;;  %v638_v53 = vpop.permute.xlu0 %637 }
 0x238   :  { %712 = vmatpush1.bf16.msra.mxu1 %v615_v41 }
 0x23a   :  { %3209 = vmatmul.mubr.msk.bf16.vlgmr.msra.gmra.mxu0 %vm640_vm11, %v3206_v38 }
 0x23b   :  { %3211 = vmatmul.mubr.msk.bf16.vlgmr.msra.gmra.mxu1 %vm640_vm11, %v3206_v38  ;;  %1000 = vmatprep.mubr.bf16.mxu0 %v3328_v4 }
 0x23c   :  { %1041 = vmatprep.mubr.bf16.mxu1 %v3328_v4 }
 0x2fa   :  { %v690_v50 = vpop.f32.mrf.mxu0 }
 0x2fb   :  { %v731_v51 = vpop.f32.mrf.mxu1  ;;  %v691_v24 = vadd.f32 %v690_v50, %v638_v53 }
 0x2fc   :  { %v732_v63 = vadd.f32 %v731_v51, %v638_v53  ;;  %v692_v58 = vpop.f32.mrf.mxu0 }
 0x2fd   :  { %v693_v59 = vadd.f32 %v692_v58, %v638_v53  ;;  %v733_v61 = vpop.f32.mrf.mxu1  ;;  %v741_v12 = vmul.f32 %v691_v24, %v691_v24 }
 0x2fe   :  { %v734_v23 = vadd.f32 %v733_v61, %v638_v53  ;;  %v694_v31 = vpop.f32.mrf.mxu0  ;;  %v760_v5 = vmul.f32 %v732_v63, %v732_v63 }
 0x2ff   :  { %v735_v2 = vpop.f32.mrf.mxu1  ;;  %v738_v25 = vadd.f32 %v693_v59, %v691_v24  ;;  %v742_v21 = vmul.f32 %v693_v59, %v693_v59 }
 0x300   :  { %v695_v62 = vpop.f32.mrf.mxu0  ;;  %v757_v20 = vadd.f32 %v734_v23, %v732_v63  ;;  %v761_v56 = vmul.f32 %v734_v23, %v734_v23 }
 0x301   :  { %739 = vadd.xlane.f32.xlu1 %v738_v25  ;;  %v736_v13 = vpop.f32.mrf.mxu1  ;;  %v743_v33 = vadd.f32 %v742_v21, %v741_v12 }
 0x302   :  { %758 = vadd.xlane.f32.xlu0 %v757_v20  ;;  %v762_v0 = vadd.f32 %v761_v56, %v760_v5 }
 0x305   :  { %763 = vadd.xlane.f32.xlu1 %v762_v0 }
 0x306   :  { %744 = vadd.xlane.f32.xlu0 %v743_v33 }
 0x316   :  { %785 = vperm.xlu1 %3274, %v3774_v14  }
 0x31a   :  { %3275 = vset.pattern.permute.xlu1 %v3328_v4 }
 0x31c   :  { %777 = vperm.xlu0 %3273, %v3774_v14  }
 0x320   :  { %3277 = vset.pattern.permute.xlu0 %v5439_v42 }
 0x38a   :  { %v740_v10 = vpop.xlane.xlu1 %739 }
 0x38b   :  { %v759_v22 = vpop.xlane.xlu0 %758  ;;  %v746_v9 = vmul.f32 0.00390625, %v740_v10 }
 0x38c   :  { %v765_v39 = vmul.f32 0.00390625, %v759_v22 }
 0x38d   :  { %v748_v51 = vmul.f32 %v746_v9, %v746_v9  ;;  %v751_v56 = vsub.f32 %v691_v24, %v746_v9  ;;  %v752_v21 = vsub.f32 %v693_v59, %v746_v9  ;;  %v3973_v9 = vld [vmem:[%s5435_s2 + $0x10] sm:$0xff] }
 0x38e   :  { %v764_v41 = vpop.xlane.xlu1 %763  ;;  %v767_v38 = vmul.f32 %v765_v39, %v765_v39  ;;  %v771_v14 = vsub.f32 %v734_v23, %v765_v39  ;;  %v770_v33 = vsub.f32 %v732_v63, %v765_v39 }
 0x38f   :  { %v766_v50 = vmul.f32 0.00390625, %v764_v41  ;;  %v745_v53 = vpop.xlane.xlu0 %744 }
 0x390   :  { %v747_v58 = vmul.f32 0.00390625, %v745_v53 }
 0x391   :  { %v768_v61 = vsub.f32 %v766_v50, %v767_v38 }
 0x392   :  { %v749_v31 = vsub.f32 %v747_v58, %v748_v51  ;;  %v786_v41 = vpop.permute.xlu1 %785 }
 0x393   :  { %v769_v2 = vmax.f32 %v768_v61, 0.0 }
 0x394   :  { %v750_v25 = vmax.f32 %v749_v31, 0.0 }
 0x395   :  { %v772_v62 = vadd.f32 1e-05, %v769_v2 }
 0x396   :  { %v753_v20 = vadd.f32 1e-05, %v750_v25 }
 0x397   :  { %3293 = vrsqrt.f32 %v772_v62  ;;  %v778_v13 = vpop.permute.xlu0 %777 }
 0x398   :  { %3295 = vrsqrt.f32 %v753_v20 }
 0x3a4   :  { %v3294_v5 = vpop.eup %3293 }
 0x3a5   :  { %v3296_v0 = vpop.eup %3295  ;;  %v775_v12 = vmul.f32 %v3294_v5, %v771_v14  ;;  %v774_v38 = vmul.f32 %v3294_v5, %v770_v33 }
 0x3a6   :  { %v755_v10 = vmul.f32 %v3296_v0, %v751_v56  ;;  %v756_v22 = vmul.f32 %v3296_v0, %v752_v21 }
 0x3a7   :  { %v783_v53 = vmul.f32 %v778_v13, %v775_v12  ;;  %v782_v23 = vmul.f32 %v778_v13, %v774_v38 }
 0x3a8   :  { %v780_v50 = vmul.f32 %v778_v13, %v755_v10  ;;  %v781_v51 = vmul.f32 %v778_v13, %v756_v22 }
 0x3a9   :  { %v791_v58 = vadd.f32 %v786_v41, %v783_v53  ;;  %v790_v24 = vadd.f32 %v786_v41, %v782_v23 }
 0x3aa   :  { %v788_v61 = vadd.f32 %v786_v41, %v780_v50  ;;  %v789_v31 = vadd.f32 %v786_v41, %v781_v51 }
 0x3ab   :  { %v3898_v2 = vmax.f32 %v791_v58, 0.0  ;;  %v3912_v59 = vmax.f32 %v790_v24, 0.0 }
 0x3ac   :  { %v3900_v25 = vmax.f32 %v788_v61, 0.0  ;;  %v3906_v63 = vmax.f32 %v789_v31, 0.0 }
 0x3ad   :  { %882 = vrot.lane.b32.xlu0 %v3898_v2, %s3324_s21 }
 0x3ae   :  { %908 = vrot.lane.b32.xlu1 %v3900_v25, %s3321_s19 }
 0x3b1   :  { %894 = vrot.lane.b32.xlu0 %v3906_v63, %s3323_s20 }
 0x3b2   :  { %910 = vrot.lane.b32.xlu1 %v3906_v63, %s3321_s19 }
 0x3b5   :  { %898 = vrot.lane.b32.xlu0 %v3898_v2, %s3323_s20 }
 0x3b6   :  { %912 = vrot.lane.b32.xlu1 %v3912_v59, %s3321_s19 }
 0x3b9   :  { %862 = vrot.lane.b32.xlu0 %v3906_v63, %s3322_s0 }
 0x3ba   :  { %914 = vrot.lane.b32.xlu1 %v3898_v2, %s3321_s19 }
 0x3bd   :  { %866 = vrot.lane.b32.xlu0 %v3898_v2, %s3322_s0 }
 0x3be   :  { %876 = vrot.lane.b32.xlu1 %v3900_v25, %s3324_s21 }
 0x3c1   :  { %830 = vrot.lane.b32.xlu0 %v3906_v63, %s3329_s25 }
 0x3c2   :  { %878 = vrot.lane.b32.xlu1 %v3906_v63, %s3324_s21 }
 0x3c5   :  { %834 = vrot.lane.b32.xlu0 %v3898_v2, %s3329_s25 }
 0x3c6   :  { %880 = vrot.lane.b32.xlu1 %v3912_v59, %s3324_s21 }
 0x3c9   :  { %846 = vrot.lane.b32.xlu0 %v3906_v63, %s3326_s23 }
 0x3ca   :  { %892 = vrot.lane.b32.xlu1 %v3900_v25, %s3323_s20 }
 0x3cd   :  { %850 = vrot.lane.b32.xlu0 %v3898_v2, %s3326_s23 }
 0x3ce   :  { %896 = vrot.lane.b32.xlu1 %v3912_v59, %s3323_s20 }
 0x3d1   :  { %798 = vrot.lane.b32.xlu0 %v3906_v63, %s3327_s24 }
 0x3d2   :  { %860 = vrot.lane.b32.xlu1 %v3900_v25, %s3322_s0 }
 0x3d5   :  { %802 = vrot.lane.b32.xlu0 %v3898_v2, %s3327_s24 }
 0x3d6   :  { %864 = vrot.lane.b32.xlu1 %v3912_v59, %s3322_s0 }
 0x3d9   :  { %814 = vrot.lane.b32.xlu0 %v3906_v63, %s3325_s22 }
 0x3da   :  { %828 = vrot.lane.b32.xlu1 %v3900_v25, %s3329_s25 }
 0x3dd   :  { %818 = vrot.lane.b32.xlu0 %v3898_v2, %s3325_s22 }
 0x3de   :  { %832 = vrot.lane.b32.xlu1 %v3912_v59, %s3329_s25 }
 0x3e2   :  { %844 = vrot.lane.b32.xlu1 %v3900_v25, %s3326_s23 }
 0x3e6   :  { %848 = vrot.lane.b32.xlu1 %v3912_v59, %s3326_s23 }
 0x3ea   :  { %796 = vrot.lane.b32.xlu1 %v3900_v25, %s3327_s24 }
 0x3ee   :  { %800 = vrot.lane.b32.xlu1 %v3912_v59, %s3327_s24 }
 0x3f2   :  { %812 = vrot.lane.b32.xlu1 %v3900_v25, %s3325_s22 }
 0x3f6   :  { %816 = vrot.lane.b32.xlu1 %v3912_v59, %s3325_s22 }
 0x3fa   :  { %950 = vperm.xlu1 %3275, %v3973_v9  }
 0x3fe   :  { %3276 = vset.pattern.permute.xlu1 %v5441_v32 }
 0x41f   :  { %v883_v39 = vpop.permute.xlu0 %882 }
 0x420   :  { %v909_v62 = vpop.permute.xlu1 %908 }
 0x423   :  { %v895_v20 = vpop.permute.xlu0 %894 }
 0x424   :  { %v911_v14 = vpop.permute.xlu1 %910 }
 0x425   :  { %v918_v5 = vsel %vm271_vm0, %v909_v62, %v911_v14 }
 0x426   :  { %v920_v56 = vmul.f32 %v918_v5, %v3479_v18 }
 0x427   :  { %v899_v21 = vpop.permute.xlu0 %898 }
 0x428   :  { %v913_v13 = vpop.permute.xlu1 %912  ;;  %v942_v12 = vpack.c.bf16 %v920_v56, %v920_v56 }
 0x429   :  { %v917_v0 = vsel %vm271_vm0, %v911_v14, %v913_v13 }
 0x42a   :  { %v921_v33 = vmul.f32 %v917_v0, %v3473_v16  ;;  %v957_v58 = vsel %vm344_vm5, %v942_v12, 0 }
 0x42b   :  { %v863_v38 = vpop.permute.xlu0 %862 }
 0x42c   :  { %v943_v10 = vpack.c.bf16 %v921_v33, %v921_v33  ;;  %v915_v22 = vpop.permute.xlu1 %914 }
 0x42d   :  { %v916_v41 = vsel %vm271_vm0, %v913_v13, %v915_v22  ;;  %v919_v53 = vsel %vm271_vm0, %v915_v22, %v909_v62 }
 0x42e   :  { %v922_v50 = vmul.f32 %v916_v41, %v3482_v19  ;;  %v923_v51 = vmul.f32 %v919_v53, %v3476_v17  ;;  %3214 = vmatprep.subr.msk.bf16.mxu0 %vm344_vm5, %v943_v10 }
 0x42f   :  { %975 = vmatpush1.bf16.msra.mxu0 %v957_v58  ;;  %v867_v14 = vpop.permute.xlu0 %866 }
 0x430   :  { %v944_v61 = vpack.c.bf16 %v922_v50, %v922_v50  ;;  %v945_v31 = vpack.c.bf16 %v923_v51, %v923_v51  ;;  %v877_v23 = vpop.permute.xlu1 %876 }
 0x431   :  { %v887_v13 = vsel %vm205_vm4, %v883_v39, %v877_v23 }
 0x432   :  { %3216 = vmatprep.subr.msk.bf16.mxu1 %vm344_vm5, %v945_v31  ;;  %v963_v24 = vsel %vm344_vm5, %v944_v61, 0  ;;  %v891_v33 = vmul.f32 %v887_v13, %v3556_v26 }
 0x433   :  { %1016 = vmatpush1.bf16.msra.mxu1 %v963_v24  ;;  %v831_v56 = vpop.permute.xlu0 %830 }
 0x434   :  { %v879_v62 = vpop.permute.xlu1 %878 }
 0x435   :  { %v886_v50 = vsel %vm205_vm4, %v877_v23, %v879_v62 }
 0x436   :  { %v888_v23 = vmul.f32 %v886_v50, %v3545_v6 }
 0x437   :  { %v835_v51 = vpop.permute.xlu0 %834 }
 0x438   :  { %v881_v5 = vpop.permute.xlu1 %880 }
 0x439   :  { %v884_v41 = vsel %vm205_vm4, %v881_v5, %v883_v39  ;;  %v885_v53 = vsel %vm205_vm4, %v879_v62, %v881_v5 }
 0x43a   :  { %v890_v39 = vmul.f32 %v884_v41, %v3562_v28 }
 0x43b   :  { %v847_v42 = vpop.permute.xlu0 %846 }
 0x43c   :  { %v893_v0 = vpop.permute.xlu1 %892 }
 0x43d   :  { %v903_v12 = vsel %vm238_vm3, %v899_v21, %v893_v0  ;;  %v902_v10 = vsel %vm238_vm3, %v893_v0, %v895_v20  ;;  %v889_v0 = vmul.f32 %v885_v53, %v3559_v27 }
 0x43e   :  { %v907_v22 = vmul.f32 %v903_v12, %v3521_v52  ;;  %v904_v31 = vmul.f32 %v902_v10, %v3513_v48 }
 0x440   :  { %v897_v58 = vpop.permute.xlu1 %896  ;;  %v941_v61 = vpack.c.bf16 %v907_v22, %v891_v33  ;;  %v938_v22 = vpack.c.bf16 %v904_v31, %v888_v23 }
 0x441   :  { %v900_v24 = vsel %vm238_vm3, %v897_v58, %v899_v21  ;;  %v901_v13 = vsel %vm238_vm3, %v895_v20, %v897_v58 }
 0x442   :  { %v905_v5 = vmul.f32 %v901_v13, %v3524_v54  ;;  %v906_v12 = vmul.f32 %v900_v24, %v3536_v60  ;;  %1017 = vmatprep.subr.bf16.mxu1 %v941_v61 }
 0x444   :  { %v940_v62 = vpack.c.bf16 %v906_v12, %v890_v39  ;;  %v861_v33 = vpop.permute.xlu1 %860  ;;  %v939_v10 = vpack.c.bf16 %v905_v5, %v889_v0  ;;  %v851_v0 = vpop.permute.xlu0 %850 }
 0x445   :  { %v871_v21 = vsel %vm172_vm2, %v867_v14, %v861_v33  ;;  %v870_v20 = vsel %vm172_vm2, %v861_v33, %v863_v38 }
 0x446   :  { %v875_v41 = vmul.f32 %v871_v21, %v3504_v45  ;;  %976 = vmatprep.subr.bf16.mxu0 %v939_v10  ;;  %1018 = vmatpush1.bf16.msra.mxu1 %v940_v62  ;;  %v872_v50 = vmul.f32 %v870_v20, %v3500_v44 }
 0x447   :  { %977 = vmatpush1.bf16.msra.mxu0 %v938_v22 }
 0x448   :  { %v865_v53 = vpop.permute.xlu1 %864  ;;  %v937_v58 = vpack.c.bf16 %v875_v41, %v3898_v2  ;;  %v934_v2 = vpack.c.bf16 %v872_v50, %v3900_v25  ;;  %v799_v23 = vpop.permute.xlu0 %798 }
 0x449   :  { %v868_v61 = vsel %vm172_vm2, %v865_v53, %v867_v14  ;;  %v869_v31 = vsel %vm172_vm2, %v863_v38, %v865_v53 }
 0x44a   :  { %v873_v24 = vmul.f32 %v869_v31, %v3507_v46  ;;  %v874_v13 = vmul.f32 %v868_v61, %v3510_v47  ;;  %1019 = vmatprep.subr.bf16.mxu1 %v937_v58 }
 0x44c   :  { %v936_v39 = vpack.c.bf16 %v874_v13, %v3912_v59  ;;  %v829_v5 = vpop.permute.xlu1 %828  ;;  %v935_v12 = vpack.c.bf16 %v873_v24, %v3906_v63  ;;  %v803_v53 = vpop.permute.xlu0 %802 }
 0x44d   :  { %v838_v38 = vsel %vm106_vm8, %v829_v5, %v831_v56  ;;  %v839_v62 = vsel %vm106_vm8, %v835_v51, %v829_v5 }
 0x44e   :  { %978 = vmatprep.subr.bf16.mxu0 %v935_v12  ;;  %1020 = vmatpush1.bf16.msra.mxu1 %v936_v39  ;;  %v840_v25 = vmul.f32 %v839_v62, %v3654_v3  ;;  %v841_v10 = vmul.f32 %v838_v38, %v3643_v57 }
 0x44f   :  { %979 = vmatpush1.bf16.msra.mxu0 %v934_v2 }
 0x450   :  { %v833_v14 = vpop.permute.xlu1 %832 }
 0x451   :  { %v836_v20 = vsel %vm106_vm8, %v833_v14, %v835_v51  ;;  %v837_v41 = vsel %vm106_vm8, %v831_v56, %v833_v14  ;;  %v815_v14 = vpop.permute.xlu0 %814 }
 0x452   :  { %v842_v13 = vmul.f32 %v837_v41, %v3657_v11  ;;  %v843_v39 = vmul.f32 %v836_v20, %v3664_v15 }
 0x454   :  { %v845_v33 = vpop.permute.xlu1 %844 }
 0x455   :  { %v854_v59 = vsel %vm139_vm9, %v845_v33, %v847_v42  ;;  %v855_v63 = vsel %vm139_vm9, %v851_v0, %v845_v33  ;;  %v819_v62 = vpop.permute.xlu0 %818 }
 0x456   :  { %v856_v22 = vmul.f32 %v855_v63, %v3610_v36  ;;  %v857_v21 = vmul.f32 %v854_v59, %v3607_v35 }
 0x458   :  { %v930_v58 = vpack.c.bf16 %v856_v22, %v840_v25  ;;  %v849_v50 = vpop.permute.xlu1 %848  ;;  %v931_v61 = vpack.c.bf16 %v857_v21, %v841_v10 }
 0x459   :  { %v852_v31 = vsel %vm139_vm9, %v849_v50, %v851_v0  ;;  %v853_v24 = vsel %vm139_vm9, %v847_v42, %v849_v50 }
 0x45a   :  { %v858_v5 = vmul.f32 %v853_v24, %v3613_v37  ;;  %v859_v51 = vmul.f32 %v852_v31, %v3620_v7  ;;  %980 = vmatprep.subr.bf16.mxu0 %v931_v61 }
 0x45b   :  { %981 = vmatpush1.bf16.msra.mxu0 %v930_v58 }
 0x45c   :  { %v932_v56 = vpack.c.bf16 %v858_v5, %v842_v13  ;;  %v797_v12 = vpop.permute.xlu1 %796  ;;  %v933_v2 = vpack.c.bf16 %v859_v51, %v843_v39 }
 0x45d   :  { %v806_v42 = vsel %vm40_vm6, %v797_v12, %v799_v23  ;;  %v807_v38 = vsel %vm40_vm6, %v803_v53, %v797_v12 }
 0x45e   :  { %1021 = vmatprep.subr.bf16.mxu1 %v933_v2  ;;  %v808_v25 = vmul.f32 %v807_v38, %v3630_v43  ;;  %v809_v10 = vmul.f32 %v806_v42, %v3623_v40 }
 0x45f   :  { %1022 = vmatpush1.bf16.msra.mxu1 %v932_v56 }
 0x460   :  { %v801_v0 = vpop.permute.xlu1 %800 }
 0x461   :  { %v804_v20 = vsel %vm40_vm6, %v801_v0, %v803_v53  ;;  %v805_v41 = vsel %vm40_vm6, %v799_v23, %v801_v0  ;;  %v3212_v23 = vld [vmem:[%s5437_s1 + $0x8] sm:$0xf] }
 0x462   :  { %v810_v13 = vmul.f32 %v805_v41, %v3633_v49  ;;  %v811_v39 = vmul.f32 %v804_v20, %v3640_v55 }
 0x464   :  { %v813_v33 = vpop.permute.xlu1 %812 }
 0x465   :  { %v822_v59 = vsel %vm73_vm7, %v813_v33, %v815_v14  ;;  %v823_v63 = vsel %vm73_vm7, %v819_v62, %v813_v33 }
 0x466   :  { %v824_v22 = vmul.f32 %v823_v63, %v3597_v29  ;;  %v825_v21 = vmul.f32 %v822_v59, %v3594_v1 }
 0x468   :  { %v926_v58 = vpack.c.bf16 %v824_v22, %v808_v25  ;;  %v817_v50 = vpop.permute.xlu1 %816  ;;  %v927_v61 = vpack.c.bf16 %v825_v21, %v809_v10 }
 0x469   :  { %v820_v31 = vsel %vm73_vm7, %v817_v50, %v819_v62  ;;  %v821_v24 = vsel %vm73_vm7, %v815_v14, %v817_v50 }
 0x46a   :  { %v826_v5 = vmul.f32 %v821_v24, %v3600_v30  ;;  %v827_v53 = vmul.f32 %v820_v31, %v3604_v34  ;;  %982 = vmatprep.subr.bf16.mxu0 %v927_v61 }
 0x46b   :  { %983 = vmatpush1.bf16.msra.mxu0 %v926_v58 }
 0x46c   :  { %v928_v51 = vpack.c.bf16 %v826_v5, %v810_v13  ;;  %v929_v56 = vpack.c.bf16 %v827_v53, %v811_v39 }
 0x46e   :  { %3215 = vmatmul.mubr.msk.bf16.vlgmr.msra.gmra.mxu0 %vm640_vm11, %v3212_v23  ;;  %1023 = vmatprep.subr.bf16.mxu1 %v929_v56 }
 0x46f   :  { %1024 = vmatpush1.bf16.msra.mxu1 %v928_v51  ;;  %1312 = vmatprep.mubr.bf16.mxu0 %v3328_v4 }
 0x472   :  { %3217 = vmatmul.mubr.msk.bf16.vlgmr.msra.gmra.mxu1 %vm640_vm11, %v3212_v23 }
 0x473   :  { %1353 = vmatprep.mubr.bf16.mxu1 %v3328_v4 }
 0x475   :  { %v951_v2 = vpop.permute.xlu1 %950 }
 0x52e   :  { %v1002_v12 = vpop.f32.mrf.mxu0 }
 0x52f   :  { %v1003_v42 = vadd.f32 %v1002_v12, %v951_v2 }
 0x530   :  { %v1004_v14 = vpop.f32.mrf.mxu0 }
 0x531   :  { %v1005_v0 = vadd.f32 %v1004_v14, %v951_v2  ;;  %v1053_v21 = vmul.f32 %v1003_v42, %v1003_v42 }
 0x532   :  { %v1006_v38 = vpop.f32.mrf.mxu0  ;;  %v1043_v62 = vpop.f32.mrf.mxu1 }
 0x533   :  { %v1054_v33 = vmul.f32 %v1005_v0, %v1005_v0  ;;  %v1050_v59 = vadd.f32 %v1005_v0, %v1003_v42  ;;  %v1044_v10 = vadd.f32 %v1043_v62, %v951_v2 }
 0x534   :  { %v1007_v63 = vpop.f32.mrf.mxu0  ;;  %v1045_v25 = vpop.f32.mrf.mxu1 }
 0x535   :  { %v1046_v22 = vadd.f32 %v1045_v25, %v951_v2  ;;  %1051 = vadd.xlane.f32.xlu0 %v1050_v59  ;;  %v1055_v50 = vadd.f32 %v1054_v33, %v1053_v21  ;;  %v1072_v31 = vmul.f32 %v1044_v10, %v1044_v10 }
 0x536   :  { %v1047_v20 = vpop.f32.mrf.mxu1 }
 0x537   :  { %v1073_v41 = vmul.f32 %v1046_v22, %v1046_v22  ;;  %v1069_v58 = vadd.f32 %v1046_v22, %v1044_v10 }
 0x538   :  { %v1048_v61 = vpop.f32.mrf.mxu1 }
 0x539   :  { %1070 = vadd.xlane.f32.xlu1 %v1069_v58  ;;  %1056 = vadd.xlane.f32.xlu0 %v1055_v50  ;;  %v1074_v24 = vadd.f32 %v1073_v41, %v1072_v31 }
 0x53d   :  { %1075 = vadd.xlane.f32.xlu0 %v1074_v24 }
 0x54a   :  { %1089 = vperm.xlu1 %3276, %v3973_v9  }
 0x54e   :  { %3278 = vset.pattern.permute.xlu1 %v3328_v4 }
 0x553   :  { %1097 = vperm.xlu0 %3277, %v3973_v9  }
 0x5be   :  { %v1052_v13 = vpop.xlane.xlu0 %1051 }
 0x5bf   :  { %v1058_v39 = vmul.f32 0.00390625, %v1052_v13 }
 0x5c1   :  { %v1060_v51 = vmul.f32 %v1058_v39, %v1058_v39  ;;  %v1063_v21 = vsub.f32 %v1003_v42, %v1058_v39  ;;  %v1064_v9 = vsub.f32 %v1005_v0, %v1058_v39 }
 0x5c2   :  { %v1071_v5 = vpop.xlane.xlu1 %1070  ;;  %v1057_v53 = vpop.xlane.xlu0 %1056 }
 0x5c3   :  { %v1077_v23 = vmul.f32 0.00390625, %v1071_v5  ;;  %v1059_v56 = vmul.f32 0.00390625, %v1057_v53 }
 0x5c5   :  { %v1061_v12 = vsub.f32 %v1059_v56, %v1060_v51  ;;  %v1079_v38 = vmul.f32 %v1077_v23, %v1077_v23  ;;  %v1082_v31 = vsub.f32 %v1044_v10, %v1077_v23  ;;  %v1083_v24 = vsub.f32 %v1046_v22, %v1077_v23  ;;  %v4166_v23 = vld [vmem:[%s5435_s2 + $0x18] sm:$0xff] }
 0x5c6   :  { %v1076_v2 = vpop.xlane.xlu0 %1075  ;;  %v1090_v41 = vpop.permute.xlu1 %1089 }
 0x5c7   :  { %v1062_v14 = vmax.f32 %v1061_v12, 0.0  ;;  %v1078_v62 = vmul.f32 0.00390625, %v1076_v2 }
 0x5c9   :  { %v1065_v33 = vadd.f32 1e-05, %v1062_v14  ;;  %v1080_v59 = vsub.f32 %v1078_v62, %v1079_v38 }
 0x5cb   :  { %3297 = vrsqrt.f32 %v1065_v33  ;;  %v1081_v63 = vmax.f32 %v1080_v59, 0.0 }
 0x5cd   :  { %v1084_v25 = vadd.f32 1e-05, %v1081_v63 }
 0x5ce   :  { %v1098_v61 = vpop.permute.xlu0 %1097 }
 0x5cf   :  { %3299 = vrsqrt.f32 %v1084_v25 }
 0x5d8   :  { %v3298_v20 = vpop.eup %3297 }
 0x5d9   :  { %v1067_v58 = vmul.f32 %v3298_v20, %v1063_v21  ;;  %v1068_v50 = vmul.f32 %v3298_v20, %v1064_v9 }
 0x5db   :  { %v1092_v13 = vmul.f32 %v1090_v41, %v1067_v58  ;;  %v1093_v5 = vmul.f32 %v1090_v41, %v1068_v50 }
 0x5dc   :  { %v3300_v53 = vpop.eup %3299 }
 0x5dd   :  { %v1086_v51 = vmul.f32 %v3300_v53, %v1082_v31  ;;  %v1087_v56 = vmul.f32 %v3300_v53, %v1083_v24  ;;  %v1100_v12 = vadd.f32 %v1098_v61, %v1092_v13  ;;  %v1101_v38 = vadd.f32 %v1098_v61, %v1093_v5 }
 0x5df   :  { %v1094_v2 = vmul.f32 %v1090_v41, %v1086_v51  ;;  %v1095_v14 = vmul.f32 %v1090_v41, %v1087_v56  ;;  %v4091_v62 = vmax.f32 %v1100_v12, 0.0  ;;  %v4095_v39 = vmax.f32 %v1101_v38, 0.0 }
 0x5e1   :  { %v1103_v42 = vadd.f32 %v1098_v61, %v1095_v14  ;;  %1220 = vrot.lane.b32.xlu1 %v4091_v62, %s3321_s19  ;;  %v1102_v0 = vadd.f32 %v1098_v61, %v1094_v2 }
 0x5e3   :  { %v4097_v10 = vmax.f32 %v1103_v42, 0.0  ;;  %v4103_v22 = vmax.f32 %v1102_v0, 0.0 }
 0x5e5   :  { %1194 = vrot.lane.b32.xlu0 %v4097_v10, %s3324_s21  ;;  %1222 = vrot.lane.b32.xlu1 %v4095_v39, %s3321_s19 }
 0x5e9   :  { %1206 = vrot.lane.b32.xlu0 %v4095_v39, %s3323_s20  ;;  %1224 = vrot.lane.b32.xlu1 %v4103_v22, %s3321_s19 }
 0x5ed   :  { %1210 = vrot.lane.b32.xlu0 %v4097_v10, %s3323_s20  ;;  %1226 = vrot.lane.b32.xlu1 %v4097_v10, %s3321_s19 }
 0x5f1   :  { %1174 = vrot.lane.b32.xlu0 %v4095_v39, %s3322_s0  ;;  %1188 = vrot.lane.b32.xlu1 %v4091_v62, %s3324_s21 }
 0x5f5   :  { %1178 = vrot.lane.b32.xlu0 %v4097_v10, %s3322_s0  ;;  %1190 = vrot.lane.b32.xlu1 %v4095_v39, %s3324_s21 }
 0x5f9   :  { %1142 = vrot.lane.b32.xlu0 %v4095_v39, %s3329_s25  ;;  %1192 = vrot.lane.b32.xlu1 %v4103_v22, %s3324_s21 }
 0x5fd   :  { %1146 = vrot.lane.b32.xlu0 %v4097_v10, %s3329_s25  ;;  %1204 = vrot.lane.b32.xlu1 %v4091_v62, %s3323_s20 }
 0x601   :  { %1158 = vrot.lane.b32.xlu0 %v4095_v39, %s3326_s23  ;;  %1208 = vrot.lane.b32.xlu1 %v4103_v22, %s3323_s20 }
 0x605   :  { %1162 = vrot.lane.b32.xlu0 %v4097_v10, %s3326_s23  ;;  %1172 = vrot.lane.b32.xlu1 %v4091_v62, %s3322_s0 }
 0x609   :  { %1110 = vrot.lane.b32.xlu0 %v4095_v39, %s3327_s24  ;;  %1176 = vrot.lane.b32.xlu1 %v4103_v22, %s3322_s0 }
 0x60d   :  { %1114 = vrot.lane.b32.xlu0 %v4097_v10, %s3327_s24  ;;  %1140 = vrot.lane.b32.xlu1 %v4091_v62, %s3329_s25 }
 0x611   :  { %1126 = vrot.lane.b32.xlu0 %v4095_v39, %s3325_s22  ;;  %1144 = vrot.lane.b32.xlu1 %v4103_v22, %s3329_s25 }
 0x615   :  { %1130 = vrot.lane.b32.xlu0 %v4097_v10, %s3325_s22  ;;  %1156 = vrot.lane.b32.xlu1 %v4091_v62, %s3326_s23 }
 0x619   :  { %1160 = vrot.lane.b32.xlu1 %v4103_v22, %s3326_s23 }
 0x61d   :  { %1108 = vrot.lane.b32.xlu1 %v4091_v62, %s3327_s24 }
 0x621   :  { %1112 = vrot.lane.b32.xlu1 %v4103_v22, %s3327_s24 }
 0x625   :  { %1124 = vrot.lane.b32.xlu1 %v4091_v62, %s3325_s22 }
 0x629   :  { %1128 = vrot.lane.b32.xlu1 %v4103_v22, %s3325_s22 }
 0x62d   :  { %1262 = vperm.xlu1 %3278, %v4166_v23  }
 0x631   :  { %3279 = vset.pattern.permute.xlu1 %v5441_v32 }
 0x653   :  { %v1221_v33 = vpop.permute.xlu1 %1220 }
 0x657   :  { %v1195_v59 = vpop.permute.xlu0 %1194  ;;  %v1223_v63 = vpop.permute.xlu1 %1222 }
 0x658   :  { %v1230_v25 = vsel %vm271_vm0, %v1221_v33, %v1223_v63 }
 0x659   :  { %v1232_v21 = vmul.f32 %v1230_v25, %v3479_v18 }
 0x65b   :  { %v1207_v9 = vpop.permute.xlu0 %1206  ;;  %v1225_v20 = vpop.permute.xlu1 %1224  ;;  %v1254_v58 = vpack.c.bf16 %v1232_v21, %v1232_v21 }
 0x65c   :  { %v1229_v41 = vsel %vm271_vm0, %v1223_v63, %v1225_v20 }
 0x65d   :  { %v1233_v50 = vmul.f32 %v1229_v41, %v3473_v16  ;;  %v1269_v56 = vsel %vm344_vm5, %v1254_v58, 0 }
 0x65f   :  { %v1255_v61 = vpack.c.bf16 %v1233_v50, %v1233_v50  ;;  %v1211_v31 = vpop.permute.xlu0 %1210  ;;  %v1227_v24 = vpop.permute.xlu1 %1226 }
 0x660   :  { %v1228_v13 = vsel %vm271_vm0, %v1225_v20, %v1227_v24  ;;  %v1231_v5 = vsel %vm271_vm0, %v1227_v24, %v1221_v33 }
 0x661   :  { %v1234_v53 = vmul.f32 %v1228_v13, %v3482_v19  ;;  %v1235_v51 = vmul.f32 %v1231_v5, %v3476_v17  ;;  %3220 = vmatprep.subr.msk.bf16.mxu0 %vm344_vm5, %v1255_v61 }
 0x662   :  { %1287 = vmatpush1.bf16.msra.mxu0 %v1269_v56 }
 0x663   :  { %v1256_v12 = vpack.c.bf16 %v1234_v53, %v1234_v53  ;;  %v1257_v2 = vpack.c.bf16 %v1235_v51, %v1235_v51  ;;  %v1175_v14 = vpop.permute.xlu0 %1174  ;;  %v1189_v38 = vpop.permute.xlu1 %1188 }
 0x664   :  { %v1199_v21 = vsel %vm205_vm4, %v1195_v59, %v1189_v38 }
 0x665   :  { %3222 = vmatprep.subr.msk.bf16.mxu1 %vm344_vm5, %v1257_v2  ;;  %v1275_v42 = vsel %vm344_vm5, %v1256_v12, 0  ;;  %v1203_v58 = vmul.f32 %v1199_v21, %v3556_v26 }
 0x666   :  { %1328 = vmatpush1.bf16.msra.mxu1 %v1275_v42 }
 0x667   :  { %v1179_v0 = vpop.permute.xlu0 %1178  ;;  %v1191_v33 = vpop.permute.xlu1 %1190 }
 0x668   :  { %v1198_v5 = vsel %vm205_vm4, %v1189_v38, %v1191_v33 }
 0x669   :  { %v1200_v38 = vmul.f32 %v1198_v5, %v3545_v6 }
 0x66b   :  { %v1193_v63 = vpop.permute.xlu1 %1192  ;;  %v1143_v25 = vpop.permute.xlu0 %1142 }
 0x66c   :  { %v1196_v24 = vsel %vm205_vm4, %v1193_v63, %v1195_v59  ;;  %v1197_v13 = vsel %vm205_vm4, %v1191_v33, %v1193_v63 }
 0x66d   :  { %v1201_v21 = vmul.f32 %v1197_v13, %v3559_v27  ;;  %v1202_v59 = vmul.f32 %v1196_v24, %v3562_v28 }
 0x66f   :  { %v1205_v20 = vpop.permute.xlu1 %1204  ;;  %v1147_v53 = vpop.permute.xlu0 %1146 }
 0x670   :  { %v1215_v41 = vsel %vm238_vm3, %v1211_v31, %v1205_v20  ;;  %v1214_v50 = vsel %vm238_vm3, %v1205_v20, %v1207_v9 }
 0x671   :  { %v1219_v61 = vmul.f32 %v1215_v41, %v3521_v52  ;;  %v1216_v12 = vmul.f32 %v1214_v50, %v3513_v48 }
 0x673   :  { %v1209_v51 = vpop.permute.xlu1 %1208  ;;  %v1253_v56 = vpack.c.bf16 %v1219_v61, %v1203_v58  ;;  %v1250_v50 = vpack.c.bf16 %v1216_v12, %v1200_v38  ;;  %v1159_v61 = vpop.permute.xlu0 %1158 }
 0x674   :  { %v1212_v2 = vsel %vm238_vm3, %v1209_v51, %v1211_v31  ;;  %v1213_v42 = vsel %vm238_vm3, %v1207_v9, %v1209_v51 }
 0x675   :  { %v1217_v63 = vmul.f32 %v1213_v42, %v3524_v54  ;;  %v1218_v20 = vmul.f32 %v1212_v2, %v3536_v60  ;;  %1329 = vmatprep.subr.bf16.mxu1 %v1253_v56 }
 0x677   :  { %v1252_v33 = vpack.c.bf16 %v1218_v20, %v1202_v59  ;;  %v1173_v41 = vpop.permute.xlu1 %1172  ;;  %v1251_v58 = vpack.c.bf16 %v1217_v63, %v1201_v21  ;;  %v1163_v21 = vpop.permute.xlu0 %1162 }
 0x678   :  { %v1183_v31 = vsel %vm172_vm2, %v1179_v0, %v1173_v41  ;;  %v1182_v9 = vsel %vm172_vm2, %v1173_v41, %v1175_v14 }
 0x679   :  { %v1187_v24 = vmul.f32 %v1183_v31, %v3504_v45  ;;  %1288 = vmatprep.subr.bf16.mxu0 %v1251_v58  ;;  %1330 = vmatpush1.bf16.msra.mxu1 %v1252_v33  ;;  %v1184_v5 = vmul.f32 %v1182_v9, %v3500_v44 }
 0x67a   :  { %1289 = vmatpush1.bf16.msra.mxu0 %v1250_v50 }
 0x67b   :  { %v1177_v13 = vpop.permute.xlu1 %1176  ;;  %v1249_v51 = vpack.c.bf16 %v1187_v24, %v4097_v10  ;;  %v1246_v10 = vpack.c.bf16 %v1184_v5, %v4091_v62  ;;  %v1111_v38 = vpop.permute.xlu0 %1110 }
 0x67c   :  { %v1180_v56 = vsel %vm172_vm2, %v1177_v13, %v1179_v0  ;;  %v1181_v12 = vsel %vm172_vm2, %v1175_v14, %v1177_v13 }
 0x67d   :  { %v1185_v2 = vmul.f32 %v1181_v12, %v3507_v46  ;;  %v1186_v42 = vmul.f32 %v1180_v56, %v3510_v47  ;;  %1331 = vmatprep.subr.bf16.mxu1 %v1249_v51 }
 0x67f   :  { %v1248_v59 = vpack.c.bf16 %v1186_v42, %v4103_v22  ;;  %v1141_v63 = vpop.permute.xlu1 %1140  ;;  %v1247_v20 = vpack.c.bf16 %v1185_v2, %v4095_v39  ;;  %v1115_v13 = vpop.permute.xlu0 %1114 }
 0x680   :  { %v1150_v14 = vsel %vm106_vm8, %v1141_v63, %v1143_v25  ;;  %v1151_v33 = vsel %vm106_vm8, %v1147_v53, %v1141_v63 }
 0x681   :  { %1290 = vmatprep.subr.bf16.mxu0 %v1247_v20  ;;  %1332 = vmatpush1.bf16.msra.mxu1 %v1248_v59  ;;  %v1152_v62 = vmul.f32 %v1151_v33, %v3654_v3  ;;  %v1153_v58 = vmul.f32 %v1150_v14, %v3643_v57 }
 0x682   :  { %1291 = vmatpush1.bf16.msra.mxu0 %v1246_v10 }
 0x683   :  { %v1145_v0 = vpop.permute.xlu1 %1144 }
 0x684   :  { %v1148_v9 = vsel %vm106_vm8, %v1145_v0, %v1147_v53  ;;  %v1149_v24 = vsel %vm106_vm8, %v1143_v25, %v1145_v0  ;;  %v1127_v0 = vpop.permute.xlu0 %1126 }
 0x685   :  { %v1154_v42 = vmul.f32 %v1149_v24, %v3657_v11  ;;  %v1155_v59 = vmul.f32 %v1148_v9, %v3664_v15 }
 0x687   :  { %v1157_v41 = vpop.permute.xlu1 %1156 }
 0x688   :  { %v1166_v22 = vsel %vm139_vm9, %v1157_v41, %v1159_v61  ;;  %v1167_v39 = vsel %vm139_vm9, %v1163_v21, %v1157_v41  ;;  %v1131_v33 = vpop.permute.xlu0 %1130 }
 0x689   :  { %v1168_v50 = vmul.f32 %v1167_v39, %v3610_v36  ;;  %v1169_v31 = vmul.f32 %v1166_v22, %v3607_v35 }
 0x68b   :  { %v1242_v51 = vpack.c.bf16 %v1168_v50, %v1152_v62  ;;  %v1161_v5 = vpop.permute.xlu1 %1160  ;;  %v1243_v56 = vpack.c.bf16 %v1169_v31, %v1153_v58 }
 0x68c   :  { %v1164_v12 = vsel %vm139_vm9, %v1161_v5, %v1163_v21  ;;  %v1165_v2 = vsel %vm139_vm9, %v1159_v61, %v1161_v5 }
 0x68d   :  { %v1170_v63 = vmul.f32 %v1165_v2, %v3613_v37  ;;  %v1171_v53 = vmul.f32 %v1164_v12, %v3620_v7  ;;  %1292 = vmatprep.subr.bf16.mxu0 %v1243_v56 }
 0x68e   :  { %1293 = vmatpush1.bf16.msra.mxu0 %v1242_v51 }
 0x68f   :  { %v1244_v25 = vpack.c.bf16 %v1170_v63, %v1154_v42  ;;  %v1109_v20 = vpop.permute.xlu1 %1108  ;;  %v1245_v10 = vpack.c.bf16 %v1171_v53, %v1155_v59 }
 0x690   :  { %v1118_v61 = vsel %vm40_vm6, %v1109_v20, %v1111_v38  ;;  %v1119_v14 = vsel %vm40_vm6, %v1115_v13, %v1109_v20 }
 0x691   :  { %1333 = vmatprep.subr.bf16.mxu1 %v1245_v10  ;;  %v1120_v62 = vmul.f32 %v1119_v14, %v3630_v43  ;;  %v1121_v58 = vmul.f32 %v1118_v61, %v3623_v40 }
 0x692   :  { %1334 = vmatpush1.bf16.msra.mxu1 %v1244_v25 }
 0x693   :  { %v1113_v21 = vpop.permute.xlu1 %1112 }
 0x694   :  { %v1116_v9 = vsel %vm40_vm6, %v1113_v21, %v1115_v13  ;;  %v1117_v24 = vsel %vm40_vm6, %v1111_v38, %v1113_v21  ;;  %v3218_v38 = vld [vmem:[%s5437_s1 + $0xc] sm:$0xf] }
 0x695   :  { %v1122_v42 = vmul.f32 %v1117_v24, %v3633_v49  ;;  %v1123_v59 = vmul.f32 %v1116_v9, %v3640_v55 }
 0x697   :  { %v1125_v41 = vpop.permute.xlu1 %1124 }
 0x698   :  { %v1134_v22 = vsel %vm73_vm7, %v1125_v41, %v1127_v0  ;;  %v1135_v39 = vsel %vm73_vm7, %v1131_v33, %v1125_v41 }
 0x699   :  { %v1136_v50 = vmul.f32 %v1135_v39, %v3597_v29  ;;  %v1137_v31 = vmul.f32 %v1134_v22, %v3594_v1 }
 0x69b   :  { %v1238_v51 = vpack.c.bf16 %v1136_v50, %v1120_v62  ;;  %v1129_v5 = vpop.permute.xlu1 %1128  ;;  %v1239_v56 = vpack.c.bf16 %v1137_v31, %v1121_v58 }
 0x69c   :  { %v1132_v12 = vsel %vm73_vm7, %v1129_v5, %v1131_v33  ;;  %v1133_v2 = vsel %vm73_vm7, %v1127_v0, %v1129_v5 }
 0x69d   :  { %v1138_v63 = vmul.f32 %v1133_v2, %v3600_v30  ;;  %v1139_v13 = vmul.f32 %v1132_v12, %v3604_v34  ;;  %1294 = vmatprep.subr.bf16.mxu0 %v1239_v56 }
 0x69e   :  { %1295 = vmatpush1.bf16.msra.mxu0 %v1238_v51 }
 0x69f   :  { %v1240_v53 = vpack.c.bf16 %v1138_v63, %v1122_v42  ;;  %v1241_v25 = vpack.c.bf16 %v1139_v13, %v1123_v59  ;;  %v5442_v42 = vmov 2  }
 0x6a1   :  { %3221 = vmatmul.mubr.msk.bf16.vlgmr.msra.gmra.mxu0 %vm640_vm11, %v3218_v38  ;;  %1335 = vmatprep.subr.bf16.mxu1 %v1241_v25 }
 0x6a2   :  { %1336 = vmatpush1.bf16.msra.mxu1 %v1240_v53  ;;  %1624 = vmatprep.mubr.bf16.mxu0 %v3328_v4 }
 0x6a5   :  { %3223 = vmatmul.mubr.msk.bf16.vlgmr.msra.gmra.mxu1 %vm640_vm11, %v3218_v38 }
 0x6a6   :  { %1665 = vmatprep.mubr.bf16.mxu1 %v3328_v4 }
 0x6a8   :  { %v1263_v10 = vpop.permute.xlu1 %1262 }
 0x761   :  { %v1314_v20 = vpop.f32.mrf.mxu0 }
 0x762   :  { %v1315_v61 = vadd.f32 %v1314_v20, %v1263_v10 }
 0x763   :  { %v1316_v0 = vpop.f32.mrf.mxu0 }
 0x764   :  { %v1317_v21 = vadd.f32 %v1316_v0, %v1263_v10  ;;  %v1365_v31 = vmul.f32 %v1315_v61, %v1315_v61 }
 0x765   :  { %v1318_v14 = vpop.f32.mrf.mxu0  ;;  %v1355_v33 = vpop.f32.mrf.mxu1 }
 0x766   :  { %v1366_v41 = vmul.f32 %v1317_v21, %v1317_v21  ;;  %v1362_v22 = vadd.f32 %v1317_v21, %v1315_v61  ;;  %v1356_v58 = vadd.f32 %v1355_v33, %v1263_v10 }
 0x767   :  { %v1319_v39 = vpop.f32.mrf.mxu0  ;;  %v1357_v62 = vpop.f32.mrf.mxu1 }
 0x768   :  { %v1358_v50 = vadd.f32 %v1357_v62, %v1263_v10  ;;  %1363 = vadd.xlane.f32.xlu0 %v1362_v22  ;;  %v1367_v5 = vadd.f32 %v1366_v41, %v1365_v31  ;;  %v1384_v12 = vmul.f32 %v1356_v58, %v1356_v58 }
 0x769   :  { %v1359_v9 = vpop.f32.mrf.mxu1 }
 0x76a   :  { %v1385_v24 = vmul.f32 %v1358_v50, %v1358_v50  ;;  %v1381_v51 = vadd.f32 %v1358_v50, %v1356_v58 }
 0x76b   :  { %v1360_v56 = vpop.f32.mrf.mxu1 }
 0x76c   :  { %1382 = vadd.xlane.f32.xlu1 %v1381_v51  ;;  %1368 = vadd.xlane.f32.xlu0 %v1367_v5  ;;  %v1386_v2 = vadd.f32 %v1385_v24, %v1384_v12 }
 0x770   :  { %1387 = vadd.xlane.f32.xlu0 %v1386_v2 }
 0x77d   :  { %1401 = vperm.xlu1 %3279, %v4166_v23  }
 0x781   :  { %3282 = vset.pattern.permute.xlu1 %v5442_v42 }
 0x786   :  { %1409 = vperm.xlu0 %3277, %v4166_v23  }
 0x78a   :  { %3280 = vset.pattern.permute.xlu0 %v3328_v4 }
 0x7f1   :  { %v1364_v59 = vpop.xlane.xlu0 %1363 }
 0x7f2   :  { %v1370_v63 = vmul.f32 0.00390625, %v1364_v59 }
 0x7f4   :  { %v1372_v25 = vmul.f32 %v1370_v63, %v1370_v63  ;;  %v1375_v23 = vsub.f32 %v1315_v61, %v1370_v63  ;;  %v1376_v9 = vsub.f32 %v1317_v21, %v1370_v63 }
 0x7f5   :  { %v1383_v13 = vpop.xlane.xlu1 %1382  ;;  %v1369_v38 = vpop.xlane.xlu0 %1368 }
 0x7f6   :  { %v1389_v53 = vmul.f32 0.00390625, %v1383_v13  ;;  %v1371_v20 = vmul.f32 0.00390625, %v1369_v38 }
 0x7f8   :  { %v1373_v10 = vsub.f32 %v1371_v20, %v1372_v25  ;;  %v1391_v33 = vmul.f32 %v1389_v53, %v1389_v53  ;;  %v1394_v12 = vsub.f32 %v1356_v58, %v1389_v53  ;;  %v1395_v2 = vsub.f32 %v1358_v50, %v1389_v53  ;;  %v3225_v53 = vld [vmem:[%s5435_s2 + $0x20] sm:$0xff] }
 0x7f9   :  { %v1388_v0 = vpop.xlane.xlu0 %1387  ;;  %v1402_v51 = vpop.permute.xlu1 %1401 }
 0x7fa   :  { %v1374_v14 = vmax.f32 %v1373_v10, 0.0  ;;  %v1390_v41 = vmul.f32 0.00390625, %v1388_v0 }
 0x7fc   :  { %v1377_v22 = vadd.f32 1e-05, %v1374_v14  ;;  %v1392_v39 = vsub.f32 %v1390_v41, %v1391_v33 }
 0x7fe   :  { %3301 = vrsqrt.f32 %v1377_v22  ;;  %v1393_v62 = vmax.f32 %v1392_v39, 0.0 }
 0x800   :  { %v1396_v31 = vadd.f32 1e-05, %v1393_v62 }
 0x801   :  { %v1410_v25 = vpop.permute.xlu0 %1409 }
 0x802   :  { %3303 = vrsqrt.f32 %v1396_v31 }
 0x80b   :  { %v3302_v24 = vpop.eup %3301 }
 0x80c   :  { %v1379_v5 = vmul.f32 %v3302_v24, %v1375_v23  ;;  %v1380_v56 = vmul.f32 %v3302_v24, %v1376_v9 }
 0x80e   :  { %v1404_v59 = vmul.f32 %v1402_v51, %v1379_v5  ;;  %v1405_v13 = vmul.f32 %v1402_v51, %v1380_v56 }
 0x80f   :  { %v3304_v38 = vpop.eup %3303 }
 0x810   :  { %v1398_v20 = vmul.f32 %v3304_v38, %v1394_v12  ;;  %v1399_v10 = vmul.f32 %v3304_v38, %v1395_v2  ;;  %v1412_v0 = vadd.f32 %v1410_v25, %v1404_v59  ;;  %v1413_v41 = vadd.f32 %v1410_v25, %v1405_v13 }
 0x812   :  { %v1406_v14 = vmul.f32 %v1402_v51, %v1398_v20  ;;  %v1407_v33 = vmul.f32 %v1402_v51, %v1399_v10  ;;  %v4285_v22 = vmax.f32 %v1412_v0, 0.0  ;;  %v4289_v63 = vmax.f32 %v1413_v41, 0.0 }
 0x814   :  { %v1414_v61 = vadd.f32 %v1410_v25, %v1406_v14  ;;  %1532 = vrot.lane.b32.xlu1 %v4285_v22, %s3321_s19  ;;  %v1415_v21 = vadd.f32 %v1410_v25, %v1407_v33 }
 0x816   :  { %v4291_v58 = vmax.f32 %v1414_v61, 0.0  ;;  %v4297_v50 = vmax.f32 %v1415_v21, 0.0 }
 0x818   :  { %1536 = vrot.lane.b32.xlu0 %v4291_v58, %s3321_s19  ;;  %1534 = vrot.lane.b32.xlu1 %v4289_v63, %s3321_s19 }
 0x81c   :  { %1500 = vrot.lane.b32.xlu0 %v4285_v22, %s3324_s21  ;;  %1538 = vrot.lane.b32.xlu1 %v4297_v50, %s3321_s19 }
 0x820   :  { %1504 = vrot.lane.b32.xlu0 %v4291_v58, %s3324_s21  ;;  %1502 = vrot.lane.b32.xlu1 %v4289_v63, %s3324_s21 }
 0x824   :  { %1516 = vrot.lane.b32.xlu0 %v4285_v22, %s3323_s20  ;;  %1506 = vrot.lane.b32.xlu1 %v4297_v50, %s3324_s21 }
 0x828   :  { %1520 = vrot.lane.b32.xlu0 %v4291_v58, %s3323_s20  ;;  %1518 = vrot.lane.b32.xlu1 %v4289_v63, %s3323_s20 }
 0x82c   :  { %1484 = vrot.lane.b32.xlu0 %v4285_v22, %s3322_s0  ;;  %1522 = vrot.lane.b32.xlu1 %v4297_v50, %s3323_s20 }
 0x830   :  { %1488 = vrot.lane.b32.xlu0 %v4291_v58, %s3322_s0  ;;  %1486 = vrot.lane.b32.xlu1 %v4289_v63, %s3322_s0 }
 0x834   :  { %1452 = vrot.lane.b32.xlu0 %v4285_v22, %s3329_s25  ;;  %1490 = vrot.lane.b32.xlu1 %v4297_v50, %s3322_s0 }
 0x838   :  { %1456 = vrot.lane.b32.xlu0 %v4291_v58, %s3329_s25  ;;  %1454 = vrot.lane.b32.xlu1 %v4289_v63, %s3329_s25 }
 0x83c   :  { %1468 = vrot.lane.b32.xlu0 %v4285_v22, %s3326_s23  ;;  %1458 = vrot.lane.b32.xlu1 %v4297_v50, %s3329_s25 }
 0x840   :  { %1472 = vrot.lane.b32.xlu0 %v4291_v58, %s3326_s23  ;;  %1470 = vrot.lane.b32.xlu1 %v4289_v63, %s3326_s23 }
 0x844   :  { %1420 = vrot.lane.b32.xlu0 %v4285_v22, %s3327_s24  ;;  %1474 = vrot.lane.b32.xlu1 %v4297_v50, %s3326_s23 }
 0x848   :  { %1424 = vrot.lane.b32.xlu0 %v4291_v58, %s3327_s24  ;;  %1422 = vrot.lane.b32.xlu1 %v4289_v63, %s3327_s24 }
 0x84c   :  { %1436 = vrot.lane.b32.xlu0 %v4285_v22, %s3325_s22  ;;  %1426 = vrot.lane.b32.xlu1 %v4297_v50, %s3327_s24 }
 0x850   :  { %1440 = vrot.lane.b32.xlu0 %v4291_v58, %s3325_s22  ;;  %1438 = vrot.lane.b32.xlu1 %v4289_v63, %s3325_s22 }
 0x854   :  { %1442 = vrot.lane.b32.xlu1 %v4297_v50, %s3325_s22  ;;  %1574 = vperm.xlu0 %3280, %v3225_v53  }
 0x886   :  { %v1533_v39 = vpop.permute.xlu1 %1532 }
 0x88a   :  { %v1537_v62 = vpop.permute.xlu0 %1536  ;;  %v1535_v31 = vpop.permute.xlu1 %1534 }
 0x88b   :  { %v1541_v23 = vsel %vm271_vm0, %v1535_v31, %v1537_v62  ;;  %v1542_v9 = vsel %vm271_vm0, %v1533_v39, %v1535_v31 }
 0x88c   :  { %v1544_v24 = vmul.f32 %v1542_v9, %v3479_v18  ;;  %v1545_v51 = vmul.f32 %v1541_v23, %v3473_v16 }
 0x88e   :  { %v1566_v5 = vpack.c.bf16 %v1544_v24, %v1544_v24  ;;  %v1567_v56 = vpack.c.bf16 %v1545_v51, %v1545_v51  ;;  %v1501_v12 = vpop.permute.xlu0 %1500  ;;  %v1539_v2 = vpop.permute.xlu1 %1538 }
 0x88f   :  { %v1540_v59 = vsel %vm271_vm0, %v1537_v62, %v1539_v2  ;;  %v1543_v13 = vsel %vm271_vm0, %v1539_v2, %v1533_v39 }
 0x890   :  { %v1546_v38 = vmul.f32 %v1540_v59, %v3482_v19  ;;  %v1547_v25 = vmul.f32 %v1543_v13, %v3476_v17  ;;  %3226 = vmatprep.subr.msk.bf16.mxu0 %vm344_vm5, %v1567_v56  ;;  %v1581_v20 = vsel %vm344_vm5, %v1566_v5, 0 }
 0x891   :  { %1599 = vmatpush1.bf16.msra.mxu0 %v1581_v20 }
 0x892   :  { %v1568_v10 = vpack.c.bf16 %v1546_v38, %v1546_v38  ;;  %v1569_v0 = vpack.c.bf16 %v1547_v25, %v1547_v25  ;;  %v1505_v14 = vpop.permute.xlu0 %1504  ;;  %v1503_v33 = vpop.permute.xlu1 %1502 }
 0x893   :  { %v1509_v53 = vsel %vm205_vm4, %v1503_v33, %v1505_v14  ;;  %v1510_v39 = vsel %vm205_vm4, %v1501_v12, %v1503_v33 }
 0x894   :  { %3228 = vmatprep.subr.msk.bf16.mxu1 %vm344_vm5, %v1569_v0  ;;  %v1587_v41 = vsel %vm344_vm5, %v1568_v10, 0  ;;  %v1512_v24 = vmul.f32 %v1510_v39, %v3545_v6  ;;  %v1513_v51 = vmul.f32 %v1509_v53, %v3559_v27 }
 0x895   :  { %1640 = vmatpush1.bf16.msra.mxu1 %v1587_v41 }
 0x896   :  { %v1517_v61 = vpop.permute.xlu0 %1516  ;;  %v1507_v21 = vpop.permute.xlu1 %1506 }
 0x897   :  { %v1508_v2 = vsel %vm205_vm4, %v1505_v14, %v1507_v21  ;;  %v1511_v59 = vsel %vm205_vm4, %v1507_v21, %v1501_v12 }
 0x898   :  { %v1514_v33 = vmul.f32 %v1508_v2, %v3562_v28  ;;  %v1515_v41 = vmul.f32 %v1511_v59, %v3556_v26 }
 0x89a   :  { %v1521_v62 = vpop.permute.xlu0 %1520  ;;  %v1519_v31 = vpop.permute.xlu1 %1518 }
 0x89b   :  { %v1525_v23 = vsel %vm238_vm3, %v1519_v31, %v1521_v62  ;;  %v1526_v9 = vsel %vm238_vm3, %v1517_v61, %v1519_v31 }
 0x89c   :  { %v1528_v5 = vmul.f32 %v1526_v9, %v3513_v48  ;;  %v1529_v56 = vmul.f32 %v1525_v23, %v3524_v54 }
 0x89e   :  { %v1562_v13 = vpack.c.bf16 %v1528_v5, %v1512_v24  ;;  %v1485_v38 = vpop.permute.xlu0 %1484  ;;  %v1523_v25 = vpop.permute.xlu1 %1522  ;;  %v1563_v20 = vpack.c.bf16 %v1529_v56, %v1513_v51 }
 0x89f   :  { %v1524_v10 = vsel %vm238_vm3, %v1521_v62, %v1523_v25  ;;  %v1527_v0 = vsel %vm238_vm3, %v1523_v25, %v1517_v61 }
 0x8a0   :  { %v1530_v53 = vmul.f32 %v1524_v10, %v3536_v60  ;;  %v1531_v14 = vmul.f32 %v1527_v0, %v3521_v52  ;;  %1600 = vmatprep.subr.bf16.mxu0 %v1563_v20 }
 0x8a1   :  { %1601 = vmatpush1.bf16.msra.mxu0 %v1562_v13 }
 0x8a2   :  { %v1564_v12 = vpack.c.bf16 %v1530_v53, %v1514_v33  ;;  %v1489_v21 = vpop.permute.xlu0 %1488  ;;  %v1487_v39 = vpop.permute.xlu1 %1486  ;;  %v1565_v31 = vpack.c.bf16 %v1531_v14, %v1515_v41 }
 0x8a3   :  { %v1493_v62 = vsel %vm172_vm2, %v1487_v39, %v1489_v21  ;;  %v1494_v61 = vsel %vm172_vm2, %v1485_v38, %v1487_v39 }
 0x8a4   :  { %v1496_v23 = vmul.f32 %v1494_v61, %v3500_v44  ;;  %v1497_v9 = vmul.f32 %v1493_v62, %v3507_v46  ;;  %1641 = vmatprep.subr.bf16.mxu1 %v1565_v31 }
 0x8a5   :  { %1642 = vmatpush1.bf16.msra.mxu1 %v1564_v12 }
 0x8a6   :  { %v1558_v24 = vpack.c.bf16 %v1496_v23, %v4285_v22  ;;  %v1453_v51 = vpop.permute.xlu0 %1452  ;;  %v1491_v5 = vpop.permute.xlu1 %1490  ;;  %v1559_v56 = vpack.c.bf16 %v1497_v9, %v4289_v63 }
 0x8a7   :  { %v1492_v2 = vsel %vm172_vm2, %v1489_v21, %v1491_v5  ;;  %v1495_v59 = vsel %vm172_vm2, %v1491_v5, %v1485_v38 }
 0x8a8   :  { %v1498_v13 = vmul.f32 %v1492_v2, %v3510_v47  ;;  %v1499_v25 = vmul.f32 %v1495_v59, %v3504_v45  ;;  %1602 = vmatprep.subr.bf16.mxu0 %v1559_v56 }
 0x8a9   :  { %1603 = vmatpush1.bf16.msra.mxu0 %v1558_v24 }
 0x8aa   :  { %v1560_v20 = vpack.c.bf16 %v1498_v13, %v4291_v58  ;;  %v1457_v10 = vpop.permute.xlu0 %1456  ;;  %v1455_v22 = vpop.permute.xlu1 %1454  ;;  %v1561_v0 = vpack.c.bf16 %v1499_v25, %v4297_v50 }
 0x8ab   :  { %v1462_v41 = vsel %vm106_vm8, %v1453_v51, %v1455_v22  ;;  %v1461_v31 = vsel %vm106_vm8, %v1455_v22, %v1457_v10 }
 0x8ac   :  { %1643 = vmatprep.subr.bf16.mxu1 %v1561_v0  ;;  %v1465_v12 = vmul.f32 %v1462_v41, %v3643_v57  ;;  %v1466_v13 = vmul.f32 %v1461_v31, %v3657_v11 }
 0x8ad   :  { %1644 = vmatpush1.bf16.msra.mxu1 %v1560_v20 }
 0x8ae   :  { %v1469_v63 = vpop.permute.xlu0 %1468  ;;  %v1459_v33 = vpop.permute.xlu1 %1458 }
 0x8af   :  { %v1460_v50 = vsel %vm106_vm8, %v1457_v10, %v1459_v33  ;;  %v1463_v39 = vsel %vm106_vm8, %v1459_v33, %v1453_v51 }
 0x8b0   :  { %v1464_v56 = vmul.f32 %v1463_v39, %v3654_v3  ;;  %v1467_v2 = vmul.f32 %v1460_v50, %v3664_v15 }
 0x8b2   :  { %v1473_v38 = vpop.permute.xlu0 %1472  ;;  %v1471_v53 = vpop.permute.xlu1 %1470 }
 0x8b3   :  { %v1478_v14 = vsel %vm139_vm9, %v1469_v63, %v1471_v53  ;;  %v1477_v58 = vsel %vm139_vm9, %v1471_v53, %v1473_v38 }
 0x8b4   :  { %v1481_v21 = vmul.f32 %v1478_v14, %v3607_v35  ;;  %v1482_v9 = vmul.f32 %v1477_v58, %v3613_v37 }
 0x8b6   :  { %v1421_v62 = vpop.permute.xlu0 %1420  ;;  %v1475_v61 = vpop.permute.xlu1 %1474  ;;  %v1555_v23 = vpack.c.bf16 %v1481_v21, %v1465_v12  ;;  %v1556_v0 = vpack.c.bf16 %v1482_v9, %v1466_v13 }
 0x8b7   :  { %v1476_v24 = vsel %vm139_vm9, %v1473_v38, %v1475_v61  ;;  %v1479_v5 = vsel %vm139_vm9, %v1475_v61, %v1469_v63 }
 0x8b8   :  { %v1480_v51 = vmul.f32 %v1479_v5, %v3610_v36  ;;  %v1483_v59 = vmul.f32 %v1476_v24, %v3620_v7  ;;  %1604 = vmatprep.subr.bf16.mxu0 %v1555_v23 }
 0x8ba   :  { %v1554_v25 = vpack.c.bf16 %v1480_v51, %v1464_v56  ;;  %v1425_v20 = vpop.permute.xlu0 %1424  ;;  %v1423_v10 = vpop.permute.xlu1 %1422  ;;  %v1557_v22 = vpack.c.bf16 %v1483_v59, %v1467_v2 }
 0x8bb   :  { %v1430_v41 = vsel %vm40_vm6, %v1421_v62, %v1423_v10  ;;  %v1429_v31 = vsel %vm40_vm6, %v1423_v10, %v1425_v20  ;;  %v3224_v10 = vld [vmem:[%s5437_s1 + $0x10] sm:$0xf] }
 0x8bc   :  { %1605 = vmatpush1.bf16.msra.mxu0 %v1554_v25  ;;  %1645 = vmatprep.subr.bf16.mxu1 %v1557_v22  ;;  %v1433_v12 = vmul.f32 %v1430_v41, %v3623_v40  ;;  %v1434_v59 = vmul.f32 %v1429_v31, %v3633_v49 }
 0x8bd   :  { %1646 = vmatpush1.bf16.msra.mxu1 %v1556_v0 }
 0x8be   :  { %v1437_v63 = vpop.permute.xlu0 %1436  ;;  %v1427_v33 = vpop.permute.xlu1 %1426 }
 0x8bf   :  { %v1428_v50 = vsel %vm40_vm6, %v1425_v20, %v1427_v33  ;;  %v1431_v39 = vsel %vm40_vm6, %v1427_v33, %v1421_v62 }
 0x8c0   :  { %v1432_v56 = vmul.f32 %v1431_v39, %v3630_v43  ;;  %v1435_v2 = vmul.f32 %v1428_v50, %v3640_v55 }
 0x8c2   :  { %v1441_v38 = vpop.permute.xlu0 %1440  ;;  %v1439_v53 = vpop.permute.xlu1 %1438 }
 0x8c3   :  { %v1446_v14 = vsel %vm73_vm7, %v1437_v63, %v1439_v53  ;;  %v1445_v58 = vsel %vm73_vm7, %v1439_v53, %v1441_v38 }
 0x8c4   :  { %v1449_v21 = vmul.f32 %v1446_v14, %v3594_v1  ;;  %v1450_v9 = vmul.f32 %v1445_v58, %v3600_v30 }
 0x8c6   :  { %v1443_v61 = vpop.permute.xlu1 %1442  ;;  %v1551_v23 = vpack.c.bf16 %v1449_v21, %v1433_v12  ;;  %v1552_v20 = vpack.c.bf16 %v1450_v9, %v1434_v59 }
 0x8c7   :  { %v1444_v24 = vsel %vm73_vm7, %v1441_v38, %v1443_v61  ;;  %v1447_v5 = vsel %vm73_vm7, %v1443_v61, %v1437_v63 }
 0x8c8   :  { %v1448_v51 = vmul.f32 %v1447_v5, %v3597_v29  ;;  %v1451_v62 = vmul.f32 %v1444_v24, %v3604_v34  ;;  %1606 = vmatprep.subr.bf16.mxu0 %v1551_v23  ;;  %v4542_v24 = vld [vmem:[%s5435_s2 + $0x28] sm:$0xff] }
 0x8ca   :  { %v1550_v13 = vpack.c.bf16 %v1448_v51, %v1432_v56  ;;  %v1553_v25 = vpack.c.bf16 %v1451_v62, %v1435_v2 }
 0x8cc   :  { %1607 = vmatpush1.bf16.msra.mxu0 %v1550_v13  ;;  %1647 = vmatprep.subr.bf16.mxu1 %v1553_v25 }
 0x8cd   :  { %1648 = vmatpush1.bf16.msra.mxu1 %v1552_v20 }
 0x8cf   :  { %3227 = vmatmul.mubr.msk.bf16.vlgmr.msra.gmra.mxu0 %vm640_vm11, %v3224_v10  ;;  %v1575_v22 = vpop.permute.xlu0 %1574 }
 0x8d0   :  { %3229 = vmatmul.mubr.msk.bf16.vlgmr.msra.gmra.mxu1 %vm640_vm11, %v3224_v10  ;;  %1882 = vmatprep.mubr.bf16.mxu0 %v3328_v4 }
 0x8d1   :  { %1923 = vmatprep.mubr.bf16.mxu1 %v3328_v4 }
 0x98f   :  { %v1626_v0 = vpop.f32.mrf.mxu0 }
 0x990   :  { %v1627_v63 = vadd.f32 %v1626_v0, %v1575_v22  ;;  %v1667_v33 = vpop.f32.mrf.mxu1 }
 0x991   :  { %v1668_v41 = vadd.f32 %v1667_v33, %v1575_v22  ;;  %v1628_v38 = vpop.f32.mrf.mxu0 }
 0x992   :  { %v4471_v53 = vmax.f32 %v1627_v63, 0.0  ;;  %v1629_v14 = vadd.f32 %v1628_v38, %v1575_v22  ;;  %v1669_v12 = vpop.f32.mrf.mxu1 }
 0x993   :  { %v4473_v58 = vmax.f32 %v1668_v41, 0.0  ;;  %v1630_v21 = vpop.f32.mrf.mxu0  ;;  %v1670_v61 = vadd.f32 %v1669_v12, %v1575_v22 }
 0x994   :  { %1790 = vrot.lane.b32.xlu1 %v4471_v53, %s3321_s19  ;;  %v1671_v50 = vpop.f32.mrf.mxu1  ;;  %v4479_v31 = vmax.f32 %v1629_v14, 0.0 }
 0x995   :  { %v1631_v39 = vpop.f32.mrf.mxu0  ;;  %1794 = vrot.lane.b32.xlu0 %v4473_v58, %s3321_s19  ;;  %v4485_v9 = vmax.f32 %v1670_v61, 0.0 }
 0x996   :  { %v1672_v23 = vpop.f32.mrf.mxu1 }
 0x998   :  { %1792 = vrot.lane.b32.xlu1 %v4479_v31, %s3321_s19 }
 0x999   :  { %1758 = vrot.lane.b32.xlu0 %v4471_v53, %s3324_s21 }
 0x99c   :  { %1796 = vrot.lane.b32.xlu1 %v4485_v9, %s3321_s19 }
 0x99d   :  { %1762 = vrot.lane.b32.xlu0 %v4473_v58, %s3324_s21 }
 0x9a0   :  { %1760 = vrot.lane.b32.xlu1 %v4479_v31, %s3324_s21 }
 0x9a1   :  { %1774 = vrot.lane.b32.xlu0 %v4471_v53, %s3323_s20 }
 0x9a4   :  { %1764 = vrot.lane.b32.xlu1 %v4485_v9, %s3324_s21 }
 0x9a5   :  { %1778 = vrot.lane.b32.xlu0 %v4473_v58, %s3323_s20 }
 0x9a8   :  { %1776 = vrot.lane.b32.xlu1 %v4479_v31, %s3323_s20 }
 0x9a9   :  { %1742 = vrot.lane.b32.xlu0 %v4471_v53, %s3322_s0 }
 0x9ac   :  { %1780 = vrot.lane.b32.xlu1 %v4485_v9, %s3323_s20 }
 0x9ad   :  { %1746 = vrot.lane.b32.xlu0 %v4473_v58, %s3322_s0 }
 0x9b0   :  { %1744 = vrot.lane.b32.xlu1 %v4479_v31, %s3322_s0 }
 0x9b1   :  { %1710 = vrot.lane.b32.xlu0 %v4471_v53, %s3329_s25 }
 0x9b4   :  { %1748 = vrot.lane.b32.xlu1 %v4485_v9, %s3322_s0 }
 0x9b5   :  { %1714 = vrot.lane.b32.xlu0 %v4473_v58, %s3329_s25 }
 0x9b8   :  { %1712 = vrot.lane.b32.xlu1 %v4479_v31, %s3329_s25 }
 0x9b9   :  { %1726 = vrot.lane.b32.xlu0 %v4471_v53, %s3326_s23 }
 0x9bc   :  { %1716 = vrot.lane.b32.xlu1 %v4485_v9, %s3329_s25 }
 0x9bd   :  { %1730 = vrot.lane.b32.xlu0 %v4473_v58, %s3326_s23 }
 0x9c0   :  { %1728 = vrot.lane.b32.xlu1 %v4479_v31, %s3326_s23 }
 0x9c1   :  { %1678 = vrot.lane.b32.xlu0 %v4471_v53, %s3327_s24 }
 0x9c4   :  { %1732 = vrot.lane.b32.xlu1 %v4485_v9, %s3326_s23 }
 0x9c5   :  { %1682 = vrot.lane.b32.xlu0 %v4473_v58, %s3327_s24 }
 0x9c8   :  { %1680 = vrot.lane.b32.xlu1 %v4479_v31, %s3327_s24 }
 0x9c9   :  { %1694 = vrot.lane.b32.xlu0 %v4471_v53, %s3325_s22 }
 0x9cc   :  { %1684 = vrot.lane.b32.xlu1 %v4485_v9, %s3327_s24 }
 0x9cd   :  { %1698 = vrot.lane.b32.xlu0 %v4473_v58, %s3325_s22 }
 0x9d0   :  { %1696 = vrot.lane.b32.xlu1 %v4479_v31, %s3325_s22 }
 0x9d1   :  { %1832 = vperm.xlu0 %3280, %v4542_v24  }
 0x9d4   :  { %1700 = vrot.lane.b32.xlu1 %v4485_v9, %s3325_s22 }
 0x9d5   :  { %3281 = vset.pattern.permute.xlu0 %v5441_v32 }
 0xa06   :  { %v1791_v5 = vpop.permute.xlu1 %1790 }
 0xa07   :  { %v1795_v56 = vpop.permute.xlu0 %1794 }
 0xa0a   :  { %v1793_v2 = vpop.permute.xlu1 %1792 }
 0xa0b   :  { %v1799_v51 = vsel %vm271_vm0, %v1793_v2, %v1795_v56  ;;  %v1800_v62 = vsel %vm271_vm0, %v1791_v5, %v1793_v2  ;;  %v1759_v59 = vpop.permute.xlu0 %1758 }
 0xa0c   :  { %v1802_v13 = vmul.f32 %v1800_v62, %v3479_v18  ;;  %v1803_v25 = vmul.f32 %v1799_v51, %v3473_v16 }
 0xa0e   :  { %v1824_v20 = vpack.c.bf16 %v1802_v13, %v1802_v13  ;;  %v1825_v10 = vpack.c.bf16 %v1803_v25, %v1803_v25  ;;  %v1797_v22 = vpop.permute.xlu1 %1796 }
 0xa0f   :  { %v1798_v0 = vsel %vm271_vm0, %v1795_v56, %v1797_v22  ;;  %v1801_v63 = vsel %vm271_vm0, %v1797_v22, %v1791_v5  ;;  %v1763_v33 = vpop.permute.xlu0 %1762 }
 0xa10   :  { %v1804_v41 = vmul.f32 %v1798_v0, %v3482_v19  ;;  %v1805_v38 = vmul.f32 %v1801_v63, %v3476_v17  ;;  %3232 = vmatprep.subr.msk.bf16.mxu0 %vm344_vm5, %v1825_v10  ;;  %v1839_v14 = vsel %vm344_vm5, %v1824_v20, 0 }
 0xa11   :  { %1857 = vmatpush1.bf16.msra.mxu0 %v1839_v14 }
 0xa12   :  { %v1826_v12 = vpack.c.bf16 %v1804_v41, %v1804_v41  ;;  %v1827_v21 = vpack.c.bf16 %v1805_v38, %v1805_v38  ;;  %v1761_v50 = vpop.permute.xlu1 %1760 }
 0xa13   :  { %v1775_v39 = vpop.permute.xlu0 %1774  ;;  %v1767_v56 = vsel %vm205_vm4, %v1761_v50, %v1763_v33  ;;  %v1768_v2 = vsel %vm205_vm4, %v1759_v59, %v1761_v50 }
 0xa14   :  { %3234 = vmatprep.subr.msk.bf16.mxu1 %vm344_vm5, %v1827_v21  ;;  %v1845_v61 = vsel %vm344_vm5, %v1826_v12, 0  ;;  %v1770_v20 = vmul.f32 %v1768_v2, %v3545_v6  ;;  %v1771_v10 = vmul.f32 %v1767_v56, %v3559_v27 }
 0xa15   :  { %1898 = vmatpush1.bf16.msra.mxu1 %v1845_v61 }
 0xa16   :  { %v1765_v23 = vpop.permute.xlu1 %1764 }
 0xa17   :  { %v1779_v5 = vpop.permute.xlu0 %1778  ;;  %v1766_v63 = vsel %vm205_vm4, %v1763_v33, %v1765_v23  ;;  %v1769_v41 = vsel %vm205_vm4, %v1765_v23, %v1759_v59 }
 0xa18   :  { %v1772_v56 = vmul.f32 %v1766_v63, %v3562_v28  ;;  %v1773_v2 = vmul.f32 %v1769_v41, %v3556_v26 }
 0xa1a   :  { %v1777_v51 = vpop.permute.xlu1 %1776 }
 0xa1b   :  { %v1783_v62 = vsel %vm238_vm3, %v1777_v51, %v1779_v5  ;;  %v1784_v13 = vsel %vm238_vm3, %v1775_v39, %v1777_v51  ;;  %v1743_v25 = vpop.permute.xlu0 %1742 }
 0xa1c   :  { %v1786_v22 = vmul.f32 %v1784_v13, %v3513_v48  ;;  %v1787_v0 = vmul.f32 %v1783_v62, %v3524_v54 }
 0xa1e   :  { %v1820_v38 = vpack.c.bf16 %v1786_v22, %v1770_v20  ;;  %v1781_v14 = vpop.permute.xlu1 %1780  ;;  %v1821_v12 = vpack.c.bf16 %v1787_v0, %v1771_v10 }
 0xa1f   :  { %v1782_v21 = vsel %vm238_vm3, %v1779_v5, %v1781_v14  ;;  %v1785_v50 = vsel %vm238_vm3, %v1781_v14, %v1775_v39  ;;  %v1747_v61 = vpop.permute.xlu0 %1746 }
 0xa20   :  { %v1788_v51 = vmul.f32 %v1782_v21, %v3536_v60  ;;  %v1789_v33 = vmul.f32 %v1785_v50, %v3521_v52  ;;  %1858 = vmatprep.subr.bf16.mxu0 %v1821_v12 }
 0xa21   :  { %1859 = vmatpush1.bf16.msra.mxu0 %v1820_v38 }
 0xa22   :  { %v1822_v59 = vpack.c.bf16 %v1788_v51, %v1772_v56  ;;  %v1745_v23 = vpop.permute.xlu1 %1744  ;;  %v1823_v62 = vpack.c.bf16 %v1789_v33, %v1773_v2 }
 0xa23   :  { %v1751_v5 = vsel %vm172_vm2, %v1745_v23, %v1747_v61  ;;  %v1752_v39 = vsel %vm172_vm2, %v1743_v25, %v1745_v23  ;;  %v1711_v13 = vpop.permute.xlu0 %1710 }
 0xa24   :  { %v1754_v20 = vmul.f32 %v1752_v39, %v3500_v44  ;;  %v1755_v10 = vmul.f32 %v1751_v5, %v3507_v46  ;;  %1899 = vmatprep.subr.bf16.mxu1 %v1823_v62 }
 0xa25   :  { %1900 = vmatpush1.bf16.msra.mxu1 %v1822_v59 }
 0xa26   :  { %v1816_v22 = vpack.c.bf16 %v1754_v20, %v4471_v53  ;;  %v1749_v0 = vpop.permute.xlu1 %1748  ;;  %v1817_v63 = vpack.c.bf16 %v1755_v10, %v4479_v31 }
 0xa27   :  { %v1750_v41 = vsel %vm172_vm2, %v1747_v61, %v1749_v0  ;;  %v1753_v38 = vsel %vm172_vm2, %v1749_v0, %v1743_v25  ;;  %v1715_v14 = vpop.permute.xlu0 %1714 }
 0xa28   :  { %v1756_v12 = vmul.f32 %v1750_v41, %v3510_v47  ;;  %v1757_v21 = vmul.f32 %v1753_v38, %v3504_v45  ;;  %1860 = vmatprep.subr.bf16.mxu0 %v1817_v63 }
 0xa29   :  { %1861 = vmatpush1.bf16.msra.mxu0 %v1816_v22 }
 0xa2a   :  { %v1818_v50 = vpack.c.bf16 %v1756_v12, %v4473_v58  ;;  %v1713_v56 = vpop.permute.xlu1 %1712  ;;  %v1819_v53 = vpack.c.bf16 %v1757_v21, %v4485_v9 }
 0xa2b   :  { %v1727_v2 = vpop.permute.xlu0 %1726  ;;  %v1720_v25 = vsel %vm106_vm8, %v1711_v13, %v1713_v56  ;;  %v1719_v39 = vsel %vm106_vm8, %v1713_v56, %v1715_v14 }
 0xa2c   :  { %1901 = vmatprep.subr.bf16.mxu1 %v1819_v53  ;;  %v1723_v23 = vmul.f32 %v1720_v25, %v3643_v57 }
 0xa2d   :  { %1902 = vmatpush1.bf16.msra.mxu1 %v1818_v50 }
 0xa2e   :  { %v1717_v31 = vpop.permute.xlu1 %1716 }
 0xa2f   :  { %v1731_v61 = vpop.permute.xlu0 %1730  ;;  %v1718_v62 = vsel %vm106_vm8, %v1715_v14, %v1717_v31  ;;  %v1721_v5 = vsel %vm106_vm8, %v1717_v31, %v1711_v13  ;;  %v1724_v14 = vmul.f32 %v1719_v39, %v3657_v11 }
 0xa30   :  { %v1722_v38 = vmul.f32 %v1721_v5, %v3654_v3  ;;  %v1725_v12 = vmul.f32 %v1718_v62, %v3664_v15 }
 0xa32   :  { %v1729_v51 = vpop.permute.xlu1 %1728 }
 0xa33   :  { %v1736_v33 = vsel %vm139_vm9, %v1727_v2, %v1729_v51  ;;  %v1679_v59 = vpop.permute.xlu0 %1678  ;;  %v1735_v58 = vsel %vm139_vm9, %v1729_v51, %v1731_v61 }
 0xa34   :  { %v1739_v9 = vmul.f32 %v1736_v33, %v3607_v35  ;;  %v1740_v22 = vmul.f32 %v1735_v58, %v3613_v37 }
 0xa36   :  { %v1733_v20 = vpop.permute.xlu1 %1732  ;;  %v1813_v10 = vpack.c.bf16 %v1739_v9, %v1723_v23  ;;  %v1814_v31 = vpack.c.bf16 %v1740_v22, %v1724_v14 }
 0xa37   :  { %v1734_v0 = vsel %vm139_vm9, %v1731_v61, %v1733_v20  ;;  %v1737_v63 = vsel %vm139_vm9, %v1733_v20, %v1727_v2  ;;  %v1683_v41 = vpop.permute.xlu0 %1682 }
 0xa38   :  { %v1738_v13 = vmul.f32 %v1737_v63, %v3610_v36  ;;  %v1741_v21 = vmul.f32 %v1734_v0, %v3620_v7  ;;  %1862 = vmatprep.subr.bf16.mxu0 %v1813_v10 }
 0xa3a   :  { %v1812_v50 = vpack.c.bf16 %v1738_v13, %v1722_v38  ;;  %v1681_v56 = vpop.permute.xlu1 %1680  ;;  %v1815_v53 = vpack.c.bf16 %v1741_v21, %v1725_v12 }
 0xa3b   :  { %v1695_v61 = vpop.permute.xlu0 %1694  ;;  %v1688_v25 = vsel %vm40_vm6, %v1679_v59, %v1681_v56  ;;  %v1687_v20 = vsel %vm40_vm6, %v1681_v56, %v1683_v41 }
 0xa3c   :  { %1863 = vmatpush1.bf16.msra.mxu0 %v1812_v50  ;;  %1903 = vmatprep.subr.bf16.mxu1 %v1815_v53  ;;  %v1691_v58 = vmul.f32 %v1688_v25, %v3623_v40  ;;  %v3230_v53 = vld [vmem:[%s5437_s1 + $0x14] sm:$0xf] }
 0xa3d   :  { %1904 = vmatpush1.bf16.msra.mxu1 %v1814_v31 }
 0xa3e   :  { %v1685_v2 = vpop.permute.xlu1 %1684 }
 0xa3f   :  { %v1699_v33 = vpop.permute.xlu0 %1698  ;;  %v1686_v5 = vsel %vm40_vm6, %v1683_v41, %v1685_v2  ;;  %v1689_v39 = vsel %vm40_vm6, %v1685_v2, %v1679_v59  ;;  %v1692_v41 = vmul.f32 %v1687_v20, %v3633_v49 }
 0xa40   :  { %v1690_v12 = vmul.f32 %v1689_v39, %v3630_v43  ;;  %v1693_v13 = vmul.f32 %v1686_v5, %v3640_v55 }
 0xa42   :  { %v1697_v51 = vpop.permute.xlu1 %1696 }
 0xa43   :  { %v1704_v23 = vsel %vm73_vm7, %v1695_v61, %v1697_v51  ;;  %v1703_v9 = vsel %vm73_vm7, %v1697_v51, %v1699_v33 }
 0xa44   :  { %v1707_v62 = vmul.f32 %v1704_v23, %v3594_v1  ;;  %v1708_v0 = vmul.f32 %v1703_v9, %v3600_v30 }
 0xa46   :  { %v1701_v10 = vpop.permute.xlu1 %1700  ;;  %v1809_v22 = vpack.c.bf16 %v1707_v62, %v1691_v58  ;;  %v1810_v56 = vpack.c.bf16 %v1708_v0, %v1692_v41 }
 0xa47   :  { %v1702_v63 = vsel %vm73_vm7, %v1699_v33, %v1701_v10  ;;  %v1705_v38 = vsel %vm73_vm7, %v1701_v10, %v1695_v61 }
 0xa48   :  { %v1706_v21 = vmul.f32 %v1705_v38, %v3597_v29  ;;  %v1709_v59 = vmul.f32 %v1702_v63, %v3604_v34  ;;  %1864 = vmatprep.subr.bf16.mxu0 %v1809_v22 }
 0xa4a   :  { %v1808_v14 = vpack.c.bf16 %v1706_v21, %v1690_v12  ;;  %v1811_v50 = vpack.c.bf16 %v1709_v59, %v1693_v13 }
 0xa4c   :  { %1865 = vmatpush1.bf16.msra.mxu0 %v1808_v14  ;;  %1905 = vmatprep.subr.bf16.mxu1 %v1811_v50  ;;  %v1833_v61 = vpop.permute.xlu0 %1832 }
 0xa4d   :  { %1906 = vmatpush1.bf16.msra.mxu1 %v1810_v56 }
 0xa4f   :  { %3233 = vmatmul.mubr.msk.bf16.vlgmr.msra.gmra.mxu0 %vm640_vm11, %v3230_v53 }
 0xa50   :  { %3235 = vmatmul.mubr.msk.bf16.vlgmr.msra.gmra.mxu1 %vm640_vm11, %v3230_v53  ;;  %2194 = vmatprep.mubr.bf16.mxu0 %v3328_v4 }
 0xa51   :  { %2235 = vmatprep.mubr.bf16.mxu1 %v3328_v4 }
 0xb0f   :  { %v1884_v31 = vpop.f32.mrf.mxu0 }
 0xb10   :  { %v1925_v2 = vpop.f32.mrf.mxu1  ;;  %v1885_v33 = vadd.f32 %v1884_v31, %v1833_v61 }
 0xb11   :  { %v1926_v25 = vadd.f32 %v1925_v2, %v1833_v61  ;;  %v1886_v51 = vpop.f32.mrf.mxu0 }
 0xb12   :  { %v1887_v23 = vadd.f32 %v1886_v51, %v1833_v61  ;;  %v1927_v58 = vpop.f32.mrf.mxu1  ;;  %v1935_v12 = vmul.f32 %v1885_v33, %v1885_v33 }
 0xb13   :  { %v1928_v9 = vadd.f32 %v1927_v58, %v1833_v61  ;;  %v1888_v62 = vpop.f32.mrf.mxu0  ;;  %v1954_v20 = vmul.f32 %v1926_v25, %v1926_v25 }
 0xb14   :  { %v1929_v5 = vpop.f32.mrf.mxu1  ;;  %v1932_v39 = vadd.f32 %v1887_v23, %v1885_v33  ;;  %v1936_v10 = vmul.f32 %v1887_v23, %v1887_v23 }
 0xb15   :  { %v1955_v22 = vmul.f32 %v1928_v9, %v1928_v9  ;;  %v1889_v0 = vpop.f32.mrf.mxu0  ;;  %v1951_v63 = vadd.f32 %v1928_v9, %v1926_v25 }
 0xb16   :  { %v1930_v38 = vpop.f32.mrf.mxu1  ;;  %1933 = vadd.xlane.f32.xlu1 %v1932_v39  ;;  %v1937_v21 = vadd.f32 %v1936_v10, %v1935_v12 }
 0xb17   :  { %1952 = vadd.xlane.f32.xlu0 %v1951_v63  ;;  %v1956_v13 = vadd.f32 %v1955_v22, %v1954_v20 }
 0xb1a   :  { %1957 = vadd.xlane.f32.xlu1 %v1956_v13 }
 0xb1b   :  { %1938 = vadd.xlane.f32.xlu0 %v1937_v21 }
 0xb2b   :  { %1979 = vperm.xlu1 %3282, %v4542_v24  }
 0xb2f   :  { %3283 = vset.pattern.permute.xlu1 %v3328_v4 }
 0xb31   :  { %1971 = vperm.xlu0 %3281, %v4542_v24  }
 0xb35   :  { %3285 = vset.pattern.permute.xlu0 %v5442_v42 }
 0xb9f   :  { %v1934_v59 = vpop.xlane.xlu1 %1933 }
 0xba0   :  { %v1953_v41 = vpop.xlane.xlu0 %1952  ;;  %v1940_v14 = vmul.f32 0.00390625, %v1934_v59 }
 0xba1   :  { %v1959_v50 = vmul.f32 0.00390625, %v1953_v41 }
 0xba2   :  { %v1942_v51 = vmul.f32 %v1940_v14, %v1940_v14  ;;  %v1945_v0 = vsub.f32 %v1885_v33, %v1940_v14  ;;  %v1946_v63 = vsub.f32 %v1887_v23, %v1940_v14  ;;  %v4740_v14 = vld [vmem:[%s5435_s2 + $0x30] sm:$0xff] }
 0xba3   :  { %v1961_v56 = vmul.f32 %v1959_v50, %v1959_v50  ;;  %v1958_v53 = vpop.xlane.xlu1 %1957  ;;  %v1965_v24 = vsub.f32 %v1928_v9, %v1959_v50  ;;  %v1964_v21 = vsub.f32 %v1926_v25, %v1959_v50 }
 0xba4   :  { %v1960_v31 = vmul.f32 0.00390625, %v1958_v53  ;;  %v1939_v61 = vpop.xlane.xlu0 %1938 }
 0xba5   :  { %v1941_v2 = vmul.f32 0.00390625, %v1939_v61 }
 0xba6   :  { %v1962_v58 = vsub.f32 %v1960_v31, %v1961_v56 }
 0xba7   :  { %v1943_v62 = vsub.f32 %v1941_v2, %v1942_v51  ;;  %v1980_v53 = vpop.permute.xlu1 %1979 }
 0xba8   :  { %v1963_v5 = vmax.f32 %v1962_v58, 0.0 }
 0xba9   :  { %v1944_v39 = vmax.f32 %v1943_v62, 0.0 }
 0xbaa   :  { %v1966_v20 = vadd.f32 1e-05, %v1963_v5 }
 0xbab   :  { %v1947_v10 = vadd.f32 1e-05, %v1944_v39 }
 0xbac   :  { %3305 = vrsqrt.f32 %v1966_v20  ;;  %v1972_v38 = vpop.permute.xlu0 %1971 }
 0xbad   :  { %3307 = vrsqrt.f32 %v1947_v10 }
 0xbb9   :  { %v3306_v22 = vpop.eup %3305 }
 0xbba   :  { %v3308_v12 = vpop.eup %3307  ;;  %v1969_v13 = vmul.f32 %v3306_v22, %v1965_v24  ;;  %v1968_v56 = vmul.f32 %v3306_v22, %v1964_v21 }
 0xbbb   :  { %v1949_v59 = vmul.f32 %v3308_v12, %v1945_v0  ;;  %v1950_v41 = vmul.f32 %v3308_v12, %v1946_v63 }
 0xbbc   :  { %v1977_v61 = vmul.f32 %v1972_v38, %v1969_v13  ;;  %v1976_v9 = vmul.f32 %v1972_v38, %v1968_v56 }
 0xbbd   :  { %v1974_v31 = vmul.f32 %v1972_v38, %v1949_v59  ;;  %v1975_v2 = vmul.f32 %v1972_v38, %v1950_v41 }
 0xbbe   :  { %v1985_v51 = vadd.f32 %v1980_v53, %v1977_v61  ;;  %v1984_v33 = vadd.f32 %v1980_v53, %v1976_v9 }
 0xbbf   :  { %v1982_v58 = vadd.f32 %v1980_v53, %v1974_v31  ;;  %v1983_v62 = vadd.f32 %v1980_v53, %v1975_v2 }
 0xbc0   :  { %v4665_v5 = vmax.f32 %v1985_v51, 0.0  ;;  %v4679_v23 = vmax.f32 %v1984_v33, 0.0 }
 0xbc1   :  { %v4667_v39 = vmax.f32 %v1982_v58, 0.0  ;;  %v4673_v25 = vmax.f32 %v1983_v62, 0.0 }
 0xbc2   :  { %2076 = vrot.lane.b32.xlu0 %v4665_v5, %s3324_s21 }
 0xbc3   :  { %2102 = vrot.lane.b32.xlu1 %v4667_v39, %s3321_s19 }
 0xbc6   :  { %2088 = vrot.lane.b32.xlu0 %v4673_v25, %s3323_s20 }
 0xbc7   :  { %2104 = vrot.lane.b32.xlu1 %v4673_v25, %s3321_s19 }
 0xbca   :  { %2092 = vrot.lane.b32.xlu0 %v4665_v5, %s3323_s20 }
 0xbcb   :  { %2106 = vrot.lane.b32.xlu1 %v4679_v23, %s3321_s19 }
 0xbce   :  { %2056 = vrot.lane.b32.xlu0 %v4673_v25, %s3322_s0 }
 0xbcf   :  { %2108 = vrot.lane.b32.xlu1 %v4665_v5, %s3321_s19 }
 0xbd2   :  { %2060 = vrot.lane.b32.xlu0 %v4665_v5, %s3322_s0 }
 0xbd3   :  { %2070 = vrot.lane.b32.xlu1 %v4667_v39, %s3324_s21 }
 0xbd6   :  { %2024 = vrot.lane.b32.xlu0 %v4673_v25, %s3329_s25 }
 0xbd7   :  { %2072 = vrot.lane.b32.xlu1 %v4673_v25, %s3324_s21 }
 0xbda   :  { %2028 = vrot.lane.b32.xlu0 %v4665_v5, %s3329_s25 }
 0xbdb   :  { %2074 = vrot.lane.b32.xlu1 %v4679_v23, %s3324_s21 }
 0xbde   :  { %2040 = vrot.lane.b32.xlu0 %v4673_v25, %s3326_s23 }
 0xbdf   :  { %2086 = vrot.lane.b32.xlu1 %v4667_v39, %s3323_s20 }
 0xbe2   :  { %2044 = vrot.lane.b32.xlu0 %v4665_v5, %s3326_s23 }
 0xbe3   :  { %2090 = vrot.lane.b32.xlu1 %v4679_v23, %s3323_s20 }
 0xbe6   :  { %1992 = vrot.lane.b32.xlu0 %v4673_v25, %s3327_s24 }
 0xbe7   :  { %2054 = vrot.lane.b32.xlu1 %v4667_v39, %s3322_s0 }
 0xbea   :  { %1996 = vrot.lane.b32.xlu0 %v4665_v5, %s3327_s24 }
 0xbeb   :  { %2058 = vrot.lane.b32.xlu1 %v4679_v23, %s3322_s0 }
 0xbee   :  { %2008 = vrot.lane.b32.xlu0 %v4673_v25, %s3325_s22 }
 0xbef   :  { %2022 = vrot.lane.b32.xlu1 %v4667_v39, %s3329_s25 }
 0xbf2   :  { %2012 = vrot.lane.b32.xlu0 %v4665_v5, %s3325_s22 }
 0xbf3   :  { %2026 = vrot.lane.b32.xlu1 %v4679_v23, %s3329_s25 }
 0xbf7   :  { %2038 = vrot.lane.b32.xlu1 %v4667_v39, %s3326_s23 }
 0xbfb   :  { %2042 = vrot.lane.b32.xlu1 %v4679_v23, %s3326_s23 }
 0xbff   :  { %1990 = vrot.lane.b32.xlu1 %v4667_v39, %s3327_s24 }
 0xc03   :  { %1994 = vrot.lane.b32.xlu1 %v4679_v23, %s3327_s24 }
 0xc07   :  { %2006 = vrot.lane.b32.xlu1 %v4667_v39, %s3325_s22 }
 0xc0b   :  { %2010 = vrot.lane.b32.xlu1 %v4679_v23, %s3325_s22 }
 0xc0f   :  { %2144 = vperm.xlu1 %3283, %v4740_v14  }
 0xc13   :  { %3284 = vset.pattern.permute.xlu1 %v5441_v32 }
 0xc34   :  { %v2077_v50 = vpop.permute.xlu0 %2076 }
 0xc35   :  { %v2103_v20 = vpop.permute.xlu1 %2102 }
 0xc38   :  { %v2089_v10 = vpop.permute.xlu0 %2088 }
 0xc39   :  { %v2105_v24 = vpop.permute.xlu1 %2104 }
 0xc3a   :  { %v2112_v22 = vsel %vm271_vm0, %v2103_v20, %v2105_v24 }
 0xc3b   :  { %v2114_v0 = vmul.f32 %v2112_v22, %v3479_v18 }
 0xc3c   :  { %v2093_v63 = vpop.permute.xlu0 %2092 }
 0xc3d   :  { %v2107_v38 = vpop.permute.xlu1 %2106  ;;  %v2136_v13 = vpack.c.bf16 %v2114_v0, %v2114_v0 }
 0xc3e   :  { %v2111_v12 = vsel %vm271_vm0, %v2105_v24, %v2107_v38 }
 0xc3f   :  { %v2115_v21 = vmul.f32 %v2111_v12, %v3473_v16  ;;  %v2151_v51 = vsel %vm344_vm5, %v2136_v13, 0 }
 0xc40   :  { %v2057_v56 = vpop.permute.xlu0 %2056 }
 0xc41   :  { %v2137_v59 = vpack.c.bf16 %v2115_v21, %v2115_v21  ;;  %v2109_v41 = vpop.permute.xlu1 %2108 }
 0xc42   :  { %v2110_v53 = vsel %vm271_vm0, %v2107_v38, %v2109_v41  ;;  %v2113_v61 = vsel %vm271_vm0, %v2109_v41, %v2103_v20 }
 0xc43   :  { %v2116_v31 = vmul.f32 %v2110_v53, %v3482_v19  ;;  %v2117_v2 = vmul.f32 %v2113_v61, %v3476_v17  ;;  %3238 = vmatprep.subr.msk.bf16.mxu0 %vm344_vm5, %v2137_v59 }
 0xc44   :  { %2169 = vmatpush1.bf16.msra.mxu0 %v2151_v51  ;;  %v2061_v24 = vpop.permute.xlu0 %2060 }
 0xc45   :  { %v2138_v58 = vpack.c.bf16 %v2116_v31, %v2116_v31  ;;  %v2139_v62 = vpack.c.bf16 %v2117_v2, %v2117_v2  ;;  %v2071_v9 = vpop.permute.xlu1 %2070 }
 0xc46   :  { %v2081_v38 = vsel %vm205_vm4, %v2077_v50, %v2071_v9 }
 0xc47   :  { %3240 = vmatprep.subr.msk.bf16.mxu1 %vm344_vm5, %v2139_v62  ;;  %v2157_v33 = vsel %vm344_vm5, %v2138_v58, 0  ;;  %v2085_v21 = vmul.f32 %v2081_v38, %v3556_v26 }
 0xc48   :  { %2210 = vmatpush1.bf16.msra.mxu1 %v2157_v33  ;;  %v2025_v0 = vpop.permute.xlu0 %2024 }
 0xc49   :  { %v2073_v20 = vpop.permute.xlu1 %2072 }
 0xc4a   :  { %v2080_v31 = vsel %vm205_vm4, %v2071_v9, %v2073_v20 }
 0xc4b   :  { %v2082_v9 = vmul.f32 %v2080_v31, %v3545_v6 }
 0xc4c   :  { %v2029_v2 = vpop.permute.xlu0 %2028 }
 0xc4d   :  { %v2075_v22 = vpop.permute.xlu1 %2074 }
 0xc4e   :  { %v2078_v53 = vsel %vm205_vm4, %v2075_v22, %v2077_v50  ;;  %v2079_v61 = vsel %vm205_vm4, %v2073_v20, %v2075_v22 }
 0xc4f   :  { %v2084_v50 = vmul.f32 %v2078_v53, %v3562_v28 }
 0xc50   :  { %v2041_v32 = vpop.permute.xlu0 %2040 }
 0xc51   :  { %v2087_v12 = vpop.permute.xlu1 %2086 }
 0xc52   :  { %v2097_v13 = vsel %vm238_vm3, %v2093_v63, %v2087_v12  ;;  %v2096_v59 = vsel %vm238_vm3, %v2087_v12, %v2089_v10  ;;  %v2083_v12 = vmul.f32 %v2079_v61, %v3559_v27 }
 0xc53   :  { %v2101_v41 = vmul.f32 %v2097_v13, %v3521_v52  ;;  %v2098_v62 = vmul.f32 %v2096_v59, %v3513_v48 }
 0xc55   :  { %v2091_v51 = vpop.permute.xlu1 %2090  ;;  %v2135_v58 = vpack.c.bf16 %v2101_v41, %v2085_v21  ;;  %v2132_v41 = vpack.c.bf16 %v2098_v62, %v2082_v9 }
 0xc56   :  { %v2094_v33 = vsel %vm238_vm3, %v2091_v51, %v2093_v63  ;;  %v2095_v38 = vsel %vm238_vm3, %v2089_v10, %v2091_v51 }
 0xc57   :  { %v2099_v22 = vmul.f32 %v2095_v38, %v3524_v54  ;;  %v2100_v13 = vmul.f32 %v2094_v33, %v3536_v60  ;;  %2211 = vmatprep.subr.bf16.mxu1 %v2135_v58 }
 0xc59   :  { %v2134_v20 = vpack.c.bf16 %v2100_v13, %v2084_v50  ;;  %v2055_v21 = vpop.permute.xlu1 %2054  ;;  %v2133_v59 = vpack.c.bf16 %v2099_v22, %v2083_v12  ;;  %v2045_v12 = vpop.permute.xlu0 %2044 }
 0xc5a   :  { %v2065_v63 = vsel %vm172_vm2, %v2061_v24, %v2055_v21  ;;  %v2064_v10 = vsel %vm172_vm2, %v2055_v21, %v2057_v56 }
 0xc5b   :  { %v2069_v53 = vmul.f32 %v2065_v63, %v3504_v45  ;;  %2170 = vmatprep.subr.bf16.mxu0 %v2133_v59  ;;  %2212 = vmatpush1.bf16.msra.mxu1 %v2134_v20  ;;  %v2066_v31 = vmul.f32 %v2064_v10, %v3500_v44 }
 0xc5c   :  { %2171 = vmatpush1.bf16.msra.mxu0 %v2132_v41 }
 0xc5d   :  { %v2059_v61 = vpop.permute.xlu1 %2058  ;;  %v2131_v51 = vpack.c.bf16 %v2069_v53, %v4665_v5  ;;  %v2128_v5 = vpack.c.bf16 %v2066_v31, %v4667_v39  ;;  %v1993_v9 = vpop.permute.xlu0 %1992 }
 0xc5e   :  { %v2062_v58 = vsel %vm172_vm2, %v2059_v61, %v2061_v24  ;;  %v2063_v62 = vsel %vm172_vm2, %v2057_v56, %v2059_v61 }
 0xc5f   :  { %v2067_v33 = vmul.f32 %v2063_v62, %v3507_v46  ;;  %v2068_v38 = vmul.f32 %v2062_v58, %v3510_v47  ;;  %2213 = vmatprep.subr.bf16.mxu1 %v2131_v51 }
 0xc61   :  { %v2130_v50 = vpack.c.bf16 %v2068_v38, %v4679_v23  ;;  %v2023_v22 = vpop.permute.xlu1 %2022  ;;  %v2129_v13 = vpack.c.bf16 %v2067_v33, %v4673_v25  ;;  %v1997_v61 = vpop.permute.xlu0 %1996 }
 0xc62   :  { %v2032_v56 = vsel %vm106_vm8, %v2023_v22, %v2025_v0  ;;  %v2033_v20 = vsel %vm106_vm8, %v2029_v2, %v2023_v22 }
 0xc63   :  { %2172 = vmatprep.subr.bf16.mxu0 %v2129_v13  ;;  %2214 = vmatpush1.bf16.msra.mxu1 %v2130_v50  ;;  %v2034_v39 = vmul.f32 %v2033_v20, %v3654_v3  ;;  %v2035_v59 = vmul.f32 %v2032_v56, %v3643_v57 }
 0xc64   :  { %2173 = vmatpush1.bf16.msra.mxu0 %v2128_v5 }
 0xc65   :  { %v2027_v24 = vpop.permute.xlu1 %2026 }
 0xc66   :  { %v2030_v10 = vsel %vm106_vm8, %v2027_v24, %v2029_v2  ;;  %v2031_v53 = vsel %vm106_vm8, %v2025_v0, %v2027_v24  ;;  %v2009_v24 = vpop.permute.xlu0 %2008 }
 0xc67   :  { %v2036_v38 = vmul.f32 %v2031_v53, %v3657_v11  ;;  %v2037_v50 = vmul.f32 %v2030_v10, %v3664_v15 }
 0xc69   :  { %v2039_v21 = vpop.permute.xlu1 %2038 }
 0xc6a   :  { %v2048_v23 = vsel %vm139_vm9, %v2039_v21, %v2041_v32  ;;  %v2049_v25 = vsel %vm139_vm9, %v2045_v12, %v2039_v21  ;;  %v2013_v20 = vpop.permute.xlu0 %2012 }
 0xc6b   :  { %v2050_v41 = vmul.f32 %v2049_v25, %v3610_v36  ;;  %v2051_v63 = vmul.f32 %v2048_v23, %v3607_v35 }
 0xc6d   :  { %v2124_v51 = vpack.c.bf16 %v2050_v41, %v2034_v39  ;;  %v2043_v31 = vpop.permute.xlu1 %2042  ;;  %v2125_v58 = vpack.c.bf16 %v2051_v63, %v2035_v59 }
 0xc6e   :  { %v2046_v62 = vsel %vm139_vm9, %v2043_v31, %v2045_v12  ;;  %v2047_v33 = vsel %vm139_vm9, %v2041_v32, %v2043_v31 }
 0xc6f   :  { %v2052_v22 = vmul.f32 %v2047_v33, %v3613_v37  ;;  %v2053_v2 = vmul.f32 %v2046_v62, %v3620_v7  ;;  %2174 = vmatprep.subr.bf16.mxu0 %v2125_v58 }
 0xc70   :  { %2175 = vmatpush1.bf16.msra.mxu0 %v2124_v51 }
 0xc71   :  { %v2126_v0 = vpack.c.bf16 %v2052_v22, %v2036_v38  ;;  %v1991_v13 = vpop.permute.xlu1 %1990  ;;  %v2127_v5 = vpack.c.bf16 %v2053_v2, %v2037_v50 }
 0xc72   :  { %v2000_v32 = vsel %vm40_vm6, %v1991_v13, %v1993_v9  ;;  %v2001_v56 = vsel %vm40_vm6, %v1997_v61, %v1991_v13 }
 0xc73   :  { %2215 = vmatprep.subr.bf16.mxu1 %v2127_v5  ;;  %v2002_v39 = vmul.f32 %v2001_v56, %v3630_v43  ;;  %v2003_v59 = vmul.f32 %v2000_v32, %v3623_v40 }
 0xc74   :  { %2216 = vmatpush1.bf16.msra.mxu1 %v2126_v0 }
 0xc75   :  { %v1995_v12 = vpop.permute.xlu1 %1994 }
 0xc76   :  { %v1998_v10 = vsel %vm40_vm6, %v1995_v12, %v1997_v61  ;;  %v1999_v53 = vsel %vm40_vm6, %v1993_v9, %v1995_v12  ;;  %v3236_v9 = vld [vmem:[%s5437_s1 + $0x18] sm:$0xf] }
 0xc77   :  { %v2004_v38 = vmul.f32 %v1999_v53, %v3633_v49  ;;  %v2005_v50 = vmul.f32 %v1998_v10, %v3640_v55 }
 0xc79   :  { %v2007_v21 = vpop.permute.xlu1 %2006 }
 0xc7a   :  { %v2016_v23 = vsel %vm73_vm7, %v2007_v21, %v2009_v24  ;;  %v2017_v25 = vsel %vm73_vm7, %v2013_v20, %v2007_v21 }
 0xc7b   :  { %v2018_v41 = vmul.f32 %v2017_v25, %v3597_v29  ;;  %v2019_v63 = vmul.f32 %v2016_v23, %v3594_v1 }
 0xc7d   :  { %v2120_v51 = vpack.c.bf16 %v2018_v41, %v2002_v39  ;;  %v2011_v31 = vpop.permute.xlu1 %2010  ;;  %v2121_v58 = vpack.c.bf16 %v2019_v63, %v2003_v59 }
 0xc7e   :  { %v2014_v62 = vsel %vm73_vm7, %v2011_v31, %v2013_v20  ;;  %v2015_v33 = vsel %vm73_vm7, %v2009_v24, %v2011_v31 }
 0xc7f   :  { %v2020_v22 = vmul.f32 %v2015_v33, %v3600_v30  ;;  %v2021_v61 = vmul.f32 %v2014_v62, %v3604_v34  ;;  %2176 = vmatprep.subr.bf16.mxu0 %v2121_v58 }
 0xc80   :  { %2177 = vmatpush1.bf16.msra.mxu0 %v2120_v51 }
 0xc81   :  { %v2122_v2 = vpack.c.bf16 %v2020_v22, %v2004_v38  ;;  %v2123_v0 = vpack.c.bf16 %v2021_v61, %v2005_v50 }
 0xc83   :  { %3239 = vmatmul.mubr.msk.bf16.vlgmr.msra.gmra.mxu0 %vm640_vm11, %v3236_v9  ;;  %2217 = vmatprep.subr.bf16.mxu1 %v2123_v0 }
 0xc84   :  { %2218 = vmatpush1.bf16.msra.mxu1 %v2122_v2  ;;  %2506 = vmatprep.mubr.bf16.mxu0 %v3328_v4 }
 0xc87   :  { %3241 = vmatmul.mubr.msk.bf16.vlgmr.msra.gmra.mxu1 %vm640_vm11, %v3236_v9 }
 0xc88   :  { %2547 = vmatprep.mubr.bf16.mxu1 %v3328_v4 }
 0xc8a   :  { %v2145_v5 = vpop.permute.xlu1 %2144 }
 0xd43   :  { %v2196_v13 = vpop.f32.mrf.mxu0 }
 0xd44   :  { %v2197_v32 = vadd.f32 %v2196_v13, %v2145_v5 }
 0xd45   :  { %v2198_v24 = vpop.f32.mrf.mxu0 }
 0xd46   :  { %v2199_v12 = vadd.f32 %v2198_v24, %v2145_v5  ;;  %v2247_v63 = vmul.f32 %v2197_v32, %v2197_v32 }
 0xd47   :  { %v2200_v56 = vpop.f32.mrf.mxu0  ;;  %v2237_v20 = vpop.f32.mrf.mxu1 }
 0xd48   :  { %v2248_v21 = vmul.f32 %v2199_v12, %v2199_v12  ;;  %v2244_v23 = vadd.f32 %v2199_v12, %v2197_v32  ;;  %v2238_v59 = vadd.f32 %v2237_v20, %v2145_v5 }
 0xd49   :  { %v2201_v25 = vpop.f32.mrf.mxu0  ;;  %v2239_v39 = vpop.f32.mrf.mxu1 }
 0xd4a   :  { %v2240_v41 = vadd.f32 %v2239_v39, %v2145_v5  ;;  %2245 = vadd.xlane.f32.xlu0 %v2244_v23  ;;  %v2249_v31 = vadd.f32 %v2248_v21, %v2247_v63  ;;  %v2266_v62 = vmul.f32 %v2238_v59, %v2238_v59 }
 0xd4b   :  { %v2241_v10 = vpop.f32.mrf.mxu1 }
 0xd4c   :  { %v2267_v53 = vmul.f32 %v2240_v41, %v2240_v41  ;;  %v2263_v51 = vadd.f32 %v2240_v41, %v2238_v59 }
 0xd4d   :  { %v2242_v58 = vpop.f32.mrf.mxu1 }
 0xd4e   :  { %2264 = vadd.xlane.f32.xlu1 %v2263_v51  ;;  %2250 = vadd.xlane.f32.xlu0 %v2249_v31  ;;  %v2268_v33 = vadd.f32 %v2267_v53, %v2266_v62 }
 0xd52   :  { %2269 = vadd.xlane.f32.xlu0 %v2268_v33 }
 0xd5f   :  { %2283 = vperm.xlu1 %3284, %v4740_v14  }
 0xd63   :  { %3286 = vset.pattern.permute.xlu1 %v3328_v4 }
 0xd68   :  { %2291 = vperm.xlu0 %3285, %v4740_v14  }
 0xdd3   :  { %v2246_v38 = vpop.xlane.xlu0 %2245 }
 0xdd4   :  { %v2252_v50 = vmul.f32 0.00390625, %v2246_v38 }
 0xdd6   :  { %v2254_v2 = vmul.f32 %v2252_v50, %v2252_v50  ;;  %v2257_v63 = vsub.f32 %v2197_v32, %v2252_v50  ;;  %v2258_v14 = vsub.f32 %v2199_v12, %v2252_v50 }
 0xdd7   :  { %v2265_v22 = vpop.xlane.xlu1 %2264  ;;  %v2251_v61 = vpop.xlane.xlu0 %2250 }
 0xdd8   :  { %v2271_v9 = vmul.f32 0.00390625, %v2265_v22  ;;  %v2253_v0 = vmul.f32 0.00390625, %v2251_v61 }
 0xdda   :  { %v2255_v13 = vsub.f32 %v2253_v0, %v2254_v2  ;;  %v2273_v56 = vmul.f32 %v2271_v9, %v2271_v9  ;;  %v2276_v62 = vsub.f32 %v2238_v59, %v2271_v9  ;;  %v2277_v33 = vsub.f32 %v2240_v41, %v2271_v9  ;;  %v4933_v9 = vld [vmem:[%s5435_s2 + $0x38] sm:$0xff] }
 0xddb   :  { %v2270_v5 = vpop.xlane.xlu0 %2269  ;;  %v2284_v53 = vpop.permute.xlu1 %2283 }
 0xddc   :  { %v2256_v24 = vmax.f32 %v2255_v13, 0.0  ;;  %v2272_v20 = vmul.f32 0.00390625, %v2270_v5 }
 0xdde   :  { %v2259_v21 = vadd.f32 1e-05, %v2256_v24  ;;  %v2274_v23 = vsub.f32 %v2272_v20, %v2273_v56 }
 0xde0   :  { %3309 = vrsqrt.f32 %v2259_v21  ;;  %v2275_v25 = vmax.f32 %v2274_v23, 0.0  ;;  %v5443_v21 = vmov 1  }
 0xde2   :  { %v2278_v39 = vadd.f32 1e-05, %v2275_v25 }
 0xde3   :  { %v2292_v58 = vpop.permute.xlu0 %2291 }
 0xde4   :  { %3311 = vrsqrt.f32 %v2278_v39 }
 0xded   :  { %v3310_v10 = vpop.eup %3309 }
 0xdee   :  { %v2261_v51 = vmul.f32 %v3310_v10, %v2257_v63  ;;  %v2262_v31 = vmul.f32 %v3310_v10, %v2258_v14 }
 0xdf0   :  { %v2286_v38 = vmul.f32 %v2284_v53, %v2261_v51  ;;  %v2287_v22 = vmul.f32 %v2284_v53, %v2262_v31 }
 0xdf1   :  { %v3312_v61 = vpop.eup %3311 }
 0xdf2   :  { %v2280_v2 = vmul.f32 %v3312_v61, %v2276_v62  ;;  %v2281_v0 = vmul.f32 %v3312_v61, %v2277_v33  ;;  %v2294_v13 = vadd.f32 %v2292_v58, %v2286_v38  ;;  %v2295_v56 = vadd.f32 %v2292_v58, %v2287_v22 }
 0xdf4   :  { %v2288_v5 = vmul.f32 %v2284_v53, %v2280_v2  ;;  %v2289_v24 = vmul.f32 %v2284_v53, %v2281_v0  ;;  %v4858_v20 = vmax.f32 %v2294_v13, 0.0  ;;  %v4862_v50 = vmax.f32 %v2295_v56, 0.0 }
 0xdf6   :  { %v2297_v32 = vadd.f32 %v2292_v58, %v2289_v24  ;;  %2414 = vrot.lane.b32.xlu1 %v4858_v20, %s3321_s19  ;;  %v2296_v12 = vadd.f32 %v2292_v58, %v2288_v5 }
 0xdf8   :  { %v4864_v59 = vmax.f32 %v2297_v32, 0.0  ;;  %v4870_v41 = vmax.f32 %v2296_v12, 0.0 }
 0xdfa   :  { %2388 = vrot.lane.b32.xlu0 %v4864_v59, %s3324_s21  ;;  %2416 = vrot.lane.b32.xlu1 %v4862_v50, %s3321_s19 }
 0xdfe   :  { %2400 = vrot.lane.b32.xlu0 %v4862_v50, %s3323_s20  ;;  %2418 = vrot.lane.b32.xlu1 %v4870_v41, %s3321_s19 }
 0xe02   :  { %2404 = vrot.lane.b32.xlu0 %v4864_v59, %s3323_s20  ;;  %2420 = vrot.lane.b32.xlu1 %v4864_v59, %s3321_s19 }
 0xe06   :  { %2368 = vrot.lane.b32.xlu0 %v4862_v50, %s3322_s0  ;;  %2382 = vrot.lane.b32.xlu1 %v4858_v20, %s3324_s21 }
 0xe0a   :  { %2372 = vrot.lane.b32.xlu0 %v4864_v59, %s3322_s0  ;;  %2384 = vrot.lane.b32.xlu1 %v4862_v50, %s3324_s21 }
 0xe0e   :  { %2336 = vrot.lane.b32.xlu0 %v4862_v50, %s3329_s25  ;;  %2386 = vrot.lane.b32.xlu1 %v4870_v41, %s3324_s21 }
 0xe12   :  { %2340 = vrot.lane.b32.xlu0 %v4864_v59, %s3329_s25  ;;  %2398 = vrot.lane.b32.xlu1 %v4858_v20, %s3323_s20 }
 0xe16   :  { %2352 = vrot.lane.b32.xlu0 %v4862_v50, %s3326_s23  ;;  %2402 = vrot.lane.b32.xlu1 %v4870_v41, %s3323_s20 }
 0xe1a   :  { %2356 = vrot.lane.b32.xlu0 %v4864_v59, %s3326_s23  ;;  %2366 = vrot.lane.b32.xlu1 %v4858_v20, %s3322_s0 }
 0xe1e   :  { %2304 = vrot.lane.b32.xlu0 %v4862_v50, %s3327_s24  ;;  %2370 = vrot.lane.b32.xlu1 %v4870_v41, %s3322_s0 }
 0xe22   :  { %2308 = vrot.lane.b32.xlu0 %v4864_v59, %s3327_s24  ;;  %2334 = vrot.lane.b32.xlu1 %v4858_v20, %s3329_s25 }
 0xe26   :  { %2320 = vrot.lane.b32.xlu0 %v4862_v50, %s3325_s22  ;;  %2338 = vrot.lane.b32.xlu1 %v4870_v41, %s3329_s25 }
 0xe2a   :  { %2324 = vrot.lane.b32.xlu0 %v4864_v59, %s3325_s22  ;;  %2350 = vrot.lane.b32.xlu1 %v4858_v20, %s3326_s23 }
 0xe2e   :  { %2354 = vrot.lane.b32.xlu1 %v4870_v41, %s3326_s23 }
 0xe32   :  { %2302 = vrot.lane.b32.xlu1 %v4858_v20, %s3327_s24 }
 0xe36   :  { %2306 = vrot.lane.b32.xlu1 %v4870_v41, %s3327_s24 }
 0xe3a   :  { %2318 = vrot.lane.b32.xlu1 %v4858_v20, %s3325_s22 }
 0xe3e   :  { %2322 = vrot.lane.b32.xlu1 %v4870_v41, %s3325_s22 }
 0xe42   :  { %2456 = vperm.xlu1 %3286, %v4933_v9  }
 0xe46   :  { %3287 = vset.pattern.permute.xlu1 %v5443_v21 }
 0xe68   :  { %v2415_v23 = vpop.permute.xlu1 %2414 }
 0xe6c   :  { %v2389_v25 = vpop.permute.xlu0 %2388  ;;  %v2417_v39 = vpop.permute.xlu1 %2416 }
 0xe6d   :  { %v2424_v63 = vsel %vm271_vm0, %v2415_v23, %v2417_v39 }
 0xe6e   :  { %v2426_v14 = vmul.f32 %v2424_v63, %v3479_v18 }
 0xe70   :  { %v2401_v10 = vpop.permute.xlu0 %2400  ;;  %v2419_v53 = vpop.permute.xlu1 %2418  ;;  %v2448_v31 = vpack.c.bf16 %v2426_v14, %v2426_v14 }
 0xe71   :  { %v2423_v51 = vsel %vm271_vm0, %v2417_v39, %v2419_v53 }
 0xe72   :  { %v2427_v58 = vmul.f32 %v2423_v51, %v3473_v16  ;;  %v2463_v13 = vsel %vm344_vm5, %v2448_v31, 0 }
 0xe74   :  { %v2449_v62 = vpack.c.bf16 %v2427_v58, %v2427_v58  ;;  %v2405_v33 = vpop.permute.xlu0 %2404  ;;  %v2421_v38 = vpop.permute.xlu1 %2420 }
 0xe75   :  { %v2422_v22 = vsel %vm271_vm0, %v2419_v53, %v2421_v38  ;;  %v2425_v61 = vsel %vm271_vm0, %v2421_v38, %v2415_v23 }
 0xe76   :  { %v2428_v2 = vmul.f32 %v2422_v22, %v3482_v19  ;;  %v2429_v0 = vmul.f32 %v2425_v61, %v3476_v17  ;;  %3244 = vmatprep.subr.msk.bf16.mxu0 %vm344_vm5, %v2449_v62 }
 0xe77   :  { %2481 = vmatpush1.bf16.msra.mxu0 %v2463_v13 }
 0xe78   :  { %v2450_v5 = vpack.c.bf16 %v2428_v2, %v2428_v2  ;;  %v2451_v24 = vpack.c.bf16 %v2429_v0, %v2429_v0  ;;  %v2369_v56 = vpop.permute.xlu0 %2368  ;;  %v2383_v32 = vpop.permute.xlu1 %2382 }
 0xe79   :  { %v2393_v14 = vsel %vm205_vm4, %v2389_v25, %v2383_v32 }
 0xe7a   :  { %3246 = vmatprep.subr.msk.bf16.mxu1 %vm344_vm5, %v2451_v24  ;;  %v2469_v12 = vsel %vm344_vm5, %v2450_v5, 0  ;;  %v2397_v31 = vmul.f32 %v2393_v14, %v3556_v26 }
 0xe7b   :  { %2522 = vmatpush1.bf16.msra.mxu1 %v2469_v12 }
 0xe7c   :  { %v2373_v21 = vpop.permute.xlu0 %2372  ;;  %v2385_v23 = vpop.permute.xlu1 %2384 }
 0xe7d   :  { %v2392_v61 = vsel %vm205_vm4, %v2383_v32, %v2385_v23 }
 0xe7e   :  { %v2394_v32 = vmul.f32 %v2392_v61, %v3545_v6 }
 0xe80   :  { %v2387_v39 = vpop.permute.xlu1 %2386  ;;  %v2337_v63 = vpop.permute.xlu0 %2336 }
 0xe81   :  { %v2390_v38 = vsel %vm205_vm4, %v2387_v39, %v2389_v25  ;;  %v2391_v22 = vsel %vm205_vm4, %v2385_v23, %v2387_v39 }
 0xe82   :  { %v2395_v14 = vmul.f32 %v2391_v22, %v3559_v27  ;;  %v2396_v25 = vmul.f32 %v2390_v38, %v3562_v28 }
 0xe84   :  { %v2399_v53 = vpop.permute.xlu1 %2398  ;;  %v2341_v2 = vpop.permute.xlu0 %2340 }
 0xe85   :  { %v2409_v51 = vsel %vm238_vm3, %v2405_v33, %v2399_v53  ;;  %v2408_v58 = vsel %vm238_vm3, %v2399_v53, %v2401_v10 }
 0xe86   :  { %v2413_v62 = vmul.f32 %v2409_v51, %v3521_v52  ;;  %v2410_v5 = vmul.f32 %v2408_v58, %v3513_v48 }
 0xe88   :  { %v2403_v0 = vpop.permute.xlu1 %2402  ;;  %v2447_v13 = vpack.c.bf16 %v2413_v62, %v2397_v31  ;;  %v2444_v58 = vpack.c.bf16 %v2410_v5, %v2394_v32  ;;  %v2353_v62 = vpop.permute.xlu0 %2352 }
 0xe89   :  { %v2406_v24 = vsel %vm238_vm3, %v2403_v0, %v2405_v33  ;;  %v2407_v12 = vsel %vm238_vm3, %v2401_v10, %v2403_v0 }
 0xe8a   :  { %v2411_v39 = vmul.f32 %v2407_v12, %v3524_v54  ;;  %v2412_v53 = vmul.f32 %v2406_v24, %v3536_v60  ;;  %2523 = vmatprep.subr.bf16.mxu1 %v2447_v13 }
 0xe8c   :  { %v2446_v23 = vpack.c.bf16 %v2412_v53, %v2396_v25  ;;  %v2367_v51 = vpop.permute.xlu1 %2366  ;;  %v2445_v31 = vpack.c.bf16 %v2411_v39, %v2395_v14  ;;  %v2357_v14 = vpop.permute.xlu0 %2356 }
 0xe8d   :  { %v2377_v33 = vsel %vm172_vm2, %v2373_v21, %v2367_v51  ;;  %v2376_v10 = vsel %vm172_vm2, %v2367_v51, %v2369_v56 }
 0xe8e   :  { %v2381_v38 = vmul.f32 %v2377_v33, %v3504_v45  ;;  %2482 = vmatprep.subr.bf16.mxu0 %v2445_v31  ;;  %2524 = vmatpush1.bf16.msra.mxu1 %v2446_v23  ;;  %v2378_v61 = vmul.f32 %v2376_v10, %v3500_v44 }
 0xe8f   :  { %2483 = vmatpush1.bf16.msra.mxu0 %v2444_v58 }
 0xe90   :  { %v2371_v22 = vpop.permute.xlu1 %2370  ;;  %v2443_v0 = vpack.c.bf16 %v2381_v38, %v4864_v59  ;;  %v2440_v59 = vpack.c.bf16 %v2378_v61, %v4858_v20  ;;  %v2305_v32 = vpop.permute.xlu0 %2304 }
 0xe91   :  { %v2374_v13 = vsel %vm172_vm2, %v2371_v22, %v2373_v21  ;;  %v2375_v5 = vsel %vm172_vm2, %v2369_v56, %v2371_v22 }
 0xe92   :  { %v2379_v24 = vmul.f32 %v2375_v5, %v3507_v46  ;;  %v2380_v12 = vmul.f32 %v2374_v13, %v3510_v47  ;;  %2525 = vmatprep.subr.bf16.mxu1 %v2443_v0 }
 0xe94   :  { %v2442_v25 = vpack.c.bf16 %v2380_v12, %v4870_v41  ;;  %v2335_v39 = vpop.permute.xlu1 %2334  ;;  %v2441_v53 = vpack.c.bf16 %v2379_v24, %v4862_v50  ;;  %v2309_v22 = vpop.permute.xlu0 %2308 }
 0xe95   :  { %v2344_v56 = vsel %vm106_vm8, %v2335_v39, %v2337_v63  ;;  %v2345_v23 = vsel %vm106_vm8, %v2341_v2, %v2335_v39 }
 0xe96   :  { %2484 = vmatprep.subr.bf16.mxu0 %v2441_v53  ;;  %2526 = vmatpush1.bf16.msra.mxu1 %v2442_v25  ;;  %v2346_v20 = vmul.f32 %v2345_v23, %v3654_v3  ;;  %v2347_v31 = vmul.f32 %v2344_v56, %v3643_v57 }
 0xe97   :  { %2485 = vmatpush1.bf16.msra.mxu0 %v2440_v59 }
 0xe98   :  { %v2339_v21 = vpop.permute.xlu1 %2338 }
 0xe99   :  { %v2342_v10 = vsel %vm106_vm8, %v2339_v21, %v2341_v2  ;;  %v2343_v38 = vsel %vm106_vm8, %v2337_v63, %v2339_v21  ;;  %v2321_v21 = vpop.permute.xlu0 %2320 }
 0xe9a   :  { %v2348_v12 = vmul.f32 %v2343_v38, %v3657_v11  ;;  %v2349_v25 = vmul.f32 %v2342_v10, %v3664_v15 }
 0xe9c   :  { %v2351_v51 = vpop.permute.xlu1 %2350 }
 0xe9d   :  { %v2360_v41 = vsel %vm139_vm9, %v2351_v51, %v2353_v62  ;;  %v2361_v50 = vsel %vm139_vm9, %v2357_v14, %v2351_v51  ;;  %v2325_v23 = vpop.permute.xlu0 %2324 }
 0xe9e   :  { %v2362_v58 = vmul.f32 %v2361_v50, %v3610_v36  ;;  %v2363_v33 = vmul.f32 %v2360_v41, %v3607_v35 }
 0xea0   :  { %v2436_v0 = vpack.c.bf16 %v2362_v58, %v2346_v20  ;;  %v2355_v61 = vpop.permute.xlu1 %2354  ;;  %v2437_v13 = vpack.c.bf16 %v2363_v33, %v2347_v31 }
 0xea1   :  { %v2358_v5 = vsel %vm139_vm9, %v2355_v61, %v2357_v14  ;;  %v2359_v24 = vsel %vm139_vm9, %v2353_v62, %v2355_v61 }
 0xea2   :  { %v2364_v39 = vmul.f32 %v2359_v24, %v3613_v37  ;;  %v2365_v2 = vmul.f32 %v2358_v5, %v3620_v7  ;;  %2486 = vmatprep.subr.bf16.mxu0 %v2437_v13 }
 0xea3   :  { %2487 = vmatpush1.bf16.msra.mxu0 %v2436_v0 }
 0xea4   :  { %v2438_v63 = vpack.c.bf16 %v2364_v39, %v2348_v12  ;;  %v2303_v53 = vpop.permute.xlu1 %2302  ;;  %v2439_v59 = vpack.c.bf16 %v2365_v2, %v2349_v25 }
 0xea5   :  { %v2312_v62 = vsel %vm40_vm6, %v2303_v53, %v2305_v32  ;;  %v2313_v56 = vsel %vm40_vm6, %v2309_v22, %v2303_v53 }
 0xea6   :  { %2527 = vmatprep.subr.bf16.mxu1 %v2439_v59  ;;  %v2314_v20 = vmul.f32 %v2313_v56, %v3630_v43  ;;  %v2315_v31 = vmul.f32 %v2312_v62, %v3623_v40 }
 0xea7   :  { %2528 = vmatpush1.bf16.msra.mxu1 %v2438_v63 }
 0xea8   :  { %v2307_v14 = vpop.permute.xlu1 %2306 }
 0xea9   :  { %v2310_v10 = vsel %vm40_vm6, %v2307_v14, %v2309_v22  ;;  %v2311_v38 = vsel %vm40_vm6, %v2305_v32, %v2307_v14  ;;  %v3242_v32 = vld [vmem:[%s5437_s1 + $0x1c] sm:$0xf] }
 0xeaa   :  { %v2316_v12 = vmul.f32 %v2311_v38, %v3633_v49  ;;  %v2317_v25 = vmul.f32 %v2310_v10, %v3640_v55 }
 0xeac   :  { %v2319_v51 = vpop.permute.xlu1 %2318 }
 0xead   :  { %v2328_v41 = vsel %vm73_vm7, %v2319_v51, %v2321_v21  ;;  %v2329_v50 = vsel %vm73_vm7, %v2325_v23, %v2319_v51 }
 0xeae   :  { %v2330_v58 = vmul.f32 %v2329_v50, %v3597_v29  ;;  %v2331_v33 = vmul.f32 %v2328_v41, %v3594_v1 }
 0xeb0   :  { %v2432_v0 = vpack.c.bf16 %v2330_v58, %v2314_v20  ;;  %v2323_v61 = vpop.permute.xlu1 %2322  ;;  %v2433_v13 = vpack.c.bf16 %v2331_v33, %v2315_v31 }
 0xeb1   :  { %v2326_v5 = vsel %vm73_vm7, %v2323_v61, %v2325_v23  ;;  %v2327_v24 = vsel %vm73_vm7, %v2321_v21, %v2323_v61 }
 0xeb2   :  { %v2332_v39 = vmul.f32 %v2327_v24, %v3600_v30  ;;  %v2333_v22 = vmul.f32 %v2326_v5, %v3604_v34  ;;  %2488 = vmatprep.subr.bf16.mxu0 %v2433_v13 }
 0xeb3   :  { %2489 = vmatpush1.bf16.msra.mxu0 %v2432_v0 }
 0xeb4   :  { %v2434_v2 = vpack.c.bf16 %v2332_v39, %v2316_v12  ;;  %v2435_v63 = vpack.c.bf16 %v2333_v22, %v2317_v25 }
 0xeb6   :  { %3245 = vmatmul.mubr.msk.bf16.vlgmr.msra.gmra.mxu0 %vm640_vm11, %v3242_v32  ;;  %2529 = vmatprep.subr.bf16.mxu1 %v2435_v63 }
 0xeb7   :  { %2530 = vmatpush1.bf16.msra.mxu1 %v2434_v2  ;;  %2818 = vmatprep.mubr.bf16.mxu0 %v3328_v4 }
 0xeba   :  { %3247 = vmatmul.mubr.msk.bf16.vlgmr.msra.gmra.mxu1 %vm640_vm11, %v3242_v32 }
 0xebb   :  { %2859 = vmatprep.mubr.bf16.mxu1 %v3328_v4 }
 0xebd   :  { %v2457_v59 = vpop.permute.xlu1 %2456 }
 0xf76   :  { %v2508_v53 = vpop.f32.mrf.mxu0 }
 0xf77   :  { %v2509_v14 = vadd.f32 %v2508_v53, %v2457_v59 }
 0xf78   :  { %v2510_v21 = vpop.f32.mrf.mxu0 }
 0xf79   :  { %v2511_v62 = vadd.f32 %v2510_v21, %v2457_v59  ;;  %v2559_v33 = vmul.f32 %v2509_v14, %v2509_v14 }
 0xf7a   :  { %v2512_v56 = vpop.f32.mrf.mxu0  ;;  %v2549_v23 = vpop.f32.mrf.mxu1 }
 0xf7b   :  { %v2560_v51 = vmul.f32 %v2511_v62, %v2511_v62  ;;  %v2556_v41 = vadd.f32 %v2511_v62, %v2509_v14  ;;  %v2550_v31 = vadd.f32 %v2549_v23, %v2457_v59 }
 0xf7c   :  { %v2513_v50 = vpop.f32.mrf.mxu0  ;;  %v2551_v20 = vpop.f32.mrf.mxu1 }
 0xf7d   :  { %v2552_v58 = vadd.f32 %v2551_v20, %v2457_v59  ;;  %2557 = vadd.xlane.f32.xlu0 %v2556_v41  ;;  %v2561_v61 = vadd.f32 %v2560_v51, %v2559_v33  ;;  %v2578_v5 = vmul.f32 %v2550_v31, %v2550_v31 }
 0xf7e   :  { %v2553_v10 = vpop.f32.mrf.mxu1 }
 0xf7f   :  { %v2579_v38 = vmul.f32 %v2552_v58, %v2552_v58  ;;  %v2575_v0 = vadd.f32 %v2552_v58, %v2550_v31 }
 0xf80   :  { %v2554_v13 = vpop.f32.mrf.mxu1 }
 0xf81   :  { %2576 = vadd.xlane.f32.xlu1 %v2575_v0  ;;  %2562 = vadd.xlane.f32.xlu0 %v2561_v61  ;;  %v2580_v24 = vadd.f32 %v2579_v38, %v2578_v5 }
 0xf85   :  { %2581 = vadd.xlane.f32.xlu0 %v2580_v24 }
 0xf92   :  { %2595 = vperm.xlu1 %3287, %v4933_v9  }
 0xf9b   :  { %2603 = vperm.xlu0 %3285, %v4933_v9  }
 0xf9f   :  { %3288 = vset.pattern.permute.xlu0 %v3328_v4 }
0x1006   :  { %v2558_v12 = vpop.xlane.xlu0 %2557 }
0x1007   :  { %v2564_v25 = vmul.f32 0.00390625, %v2558_v12 }
0x1009   :  { %v2566_v2 = vmul.f32 %v2564_v25, %v2564_v25  ;;  %v2569_v9 = vsub.f32 %v2509_v14, %v2564_v25  ;;  %v2570_v33 = vsub.f32 %v2511_v62, %v2564_v25 }
0x100a   :  { %v2577_v39 = vpop.xlane.xlu1 %2576  ;;  %v2563_v22 = vpop.xlane.xlu0 %2562 }
0x100b   :  { %v2583_v32 = vmul.f32 0.00390625, %v2577_v39  ;;  %v2565_v63 = vmul.f32 0.00390625, %v2563_v22 }
0x100d   :  { %v2567_v53 = vsub.f32 %v2565_v63, %v2566_v2  ;;  %v2585_v56 = vmul.f32 %v2583_v32, %v2583_v32  ;;  %v2588_v13 = vsub.f32 %v2550_v31, %v2583_v32  ;;  %v2589_v5 = vsub.f32 %v2552_v58, %v2583_v32  ;;  %v5124_v32 = vld [vmem:[%s5435_s2 + $0x40] sm:$0xff] }
0x100e   :  { %v2582_v59 = vpop.xlane.xlu0 %2581  ;;  %v2596_v38 = vpop.permute.xlu1 %2595 }
0x100f   :  { %v2568_v21 = vmax.f32 %v2567_v53, 0.0  ;;  %v2584_v23 = vmul.f32 0.00390625, %v2582_v59 }
0x1011   :  { %v2571_v51 = vadd.f32 1e-05, %v2568_v21  ;;  %v2586_v41 = vsub.f32 %v2584_v23, %v2585_v56 }
0x1013   :  { %3313 = vrsqrt.f32 %v2571_v51  ;;  %v2587_v50 = vmax.f32 %v2586_v41, 0.0 }
0x1015   :  { %v2590_v20 = vadd.f32 1e-05, %v2587_v50 }
0x1016   :  { %v2604_v22 = vpop.permute.xlu0 %2603 }
0x1017   :  { %3315 = vrsqrt.f32 %v2590_v20 }
0x1020   :  { %v3314_v10 = vpop.eup %3313 }
0x1021   :  { %v2573_v0 = vmul.f32 %v3314_v10, %v2569_v9  ;;  %v2574_v61 = vmul.f32 %v3314_v10, %v2570_v33 }
0x1023   :  { %v2598_v24 = vmul.f32 %v2596_v38, %v2573_v0  ;;  %v2599_v12 = vmul.f32 %v2596_v38, %v2574_v61 }
0x1024   :  { %v3316_v39 = vpop.eup %3315 }
0x1025   :  { %v2592_v2 = vmul.f32 %v3316_v39, %v2588_v13  ;;  %v2593_v63 = vmul.f32 %v3316_v39, %v2589_v5  ;;  %v2606_v53 = vadd.f32 %v2604_v22, %v2598_v24  ;;  %v2607_v56 = vadd.f32 %v2604_v22, %v2599_v12 }
0x1027   :  { %v2600_v59 = vmul.f32 %v2596_v38, %v2592_v2  ;;  %v2601_v21 = vmul.f32 %v2596_v38, %v2593_v63  ;;  %v5051_v23 = vmax.f32 %v2606_v53, 0.0  ;;  %v5055_v25 = vmax.f32 %v2607_v56, 0.0 }
0x1029   :  { %v2608_v14 = vadd.f32 %v2604_v22, %v2600_v59  ;;  %2726 = vrot.lane.b32.xlu1 %v5051_v23, %s3321_s19  ;;  %v2609_v62 = vadd.f32 %v2604_v22, %v2601_v21 }
0x102b   :  { %v5057_v31 = vmax.f32 %v2608_v14, 0.0  ;;  %v5063_v58 = vmax.f32 %v2609_v62, 0.0 }
0x102d   :  { %2730 = vrot.lane.b32.xlu0 %v5057_v31, %s3321_s19  ;;  %2728 = vrot.lane.b32.xlu1 %v5055_v25, %s3321_s19 }
0x1031   :  { %2694 = vrot.lane.b32.xlu0 %v5051_v23, %s3324_s21  ;;  %2732 = vrot.lane.b32.xlu1 %v5063_v58, %s3321_s19 }
0x1035   :  { %2698 = vrot.lane.b32.xlu0 %v5057_v31, %s3324_s21  ;;  %2696 = vrot.lane.b32.xlu1 %v5055_v25, %s3324_s21 }
0x1039   :  { %2710 = vrot.lane.b32.xlu0 %v5051_v23, %s3323_s20  ;;  %2700 = vrot.lane.b32.xlu1 %v5063_v58, %s3324_s21 }
0x103d   :  { %2714 = vrot.lane.b32.xlu0 %v5057_v31, %s3323_s20  ;;  %2712 = vrot.lane.b32.xlu1 %v5055_v25, %s3323_s20 }
0x1041   :  { %2678 = vrot.lane.b32.xlu0 %v5051_v23, %s3322_s0  ;;  %2716 = vrot.lane.b32.xlu1 %v5063_v58, %s3323_s20 }
0x1045   :  { %2682 = vrot.lane.b32.xlu0 %v5057_v31, %s3322_s0  ;;  %2680 = vrot.lane.b32.xlu1 %v5055_v25, %s3322_s0 }
0x1049   :  { %2646 = vrot.lane.b32.xlu0 %v5051_v23, %s3329_s25  ;;  %2684 = vrot.lane.b32.xlu1 %v5063_v58, %s3322_s0 }
0x104d   :  { %2650 = vrot.lane.b32.xlu0 %v5057_v31, %s3329_s25  ;;  %2648 = vrot.lane.b32.xlu1 %v5055_v25, %s3329_s25 }
0x1051   :  { %2662 = vrot.lane.b32.xlu0 %v5051_v23, %s3326_s23  ;;  %2652 = vrot.lane.b32.xlu1 %v5063_v58, %s3329_s25 }
0x1055   :  { %2666 = vrot.lane.b32.xlu0 %v5057_v31, %s3326_s23  ;;  %2664 = vrot.lane.b32.xlu1 %v5055_v25, %s3326_s23 }
0x1059   :  { %2614 = vrot.lane.b32.xlu0 %v5051_v23, %s3327_s24  ;;  %2668 = vrot.lane.b32.xlu1 %v5063_v58, %s3326_s23 }
0x105d   :  { %2618 = vrot.lane.b32.xlu0 %v5057_v31, %s3327_s24  ;;  %2616 = vrot.lane.b32.xlu1 %v5055_v25, %s3327_s24 }
0x1061   :  { %2630 = vrot.lane.b32.xlu0 %v5051_v23, %s3325_s22  ;;  %2620 = vrot.lane.b32.xlu1 %v5063_v58, %s3327_s24 }
0x1065   :  { %2634 = vrot.lane.b32.xlu0 %v5057_v31, %s3325_s22  ;;  %2632 = vrot.lane.b32.xlu1 %v5055_v25, %s3325_s22 }
0x1069   :  { %2636 = vrot.lane.b32.xlu1 %v5063_v58, %s3325_s22  ;;  %2768 = vperm.xlu0 %3288, %v5124_v32  }
0x106d   :  { %3289 = vset.pattern.permute.xlu0 %v5442_v42 }
0x109b   :  { %v2727_v51 = vpop.permute.xlu1 %2726 }
0x109f   :  { %v2731_v41 = vpop.permute.xlu0 %2730  ;;  %v2729_v50 = vpop.permute.xlu1 %2728 }
0x10a0   :  { %v2735_v20 = vsel %vm271_vm0, %v2729_v50, %v2731_v41  ;;  %v2736_v9 = vsel %vm271_vm0, %v2727_v51, %v2729_v50 }
0x10a1   :  { %v2738_v33 = vmul.f32 %v2736_v9, %v3479_v18  ;;  %v2739_v10 = vmul.f32 %v2735_v20, %v3473_v16 }
0x10a3   :  { %v2760_v38 = vpack.c.bf16 %v2738_v33, %v2738_v33  ;;  %v2761_v0 = vpack.c.bf16 %v2739_v10, %v2739_v10  ;;  %v2695_v61 = vpop.permute.xlu0 %2694  ;;  %v2733_v13 = vpop.permute.xlu1 %2732 }
0x10a4   :  { %v2734_v42 = vsel %vm271_vm0, %v2731_v41, %v2733_v13  ;;  %v2737_v5 = vsel %vm271_vm0, %v2733_v13, %v2727_v51 }
0x10a5   :  { %v2740_v24 = vmul.f32 %v2734_v42, %v3482_v19  ;;  %v2741_v12 = vmul.f32 %v2737_v5, %v3476_v17  ;;  %3250 = vmatprep.subr.msk.bf16.mxu0 %vm344_vm5, %v2761_v0  ;;  %v2775_v39 = vsel %vm344_vm5, %v2760_v38, 0 }
0x10a6   :  { %2793 = vmatpush1.bf16.msra.mxu0 %v2775_v39 }
0x10a7   :  { %v2762_v22 = vpack.c.bf16 %v2740_v24, %v2740_v24  ;;  %v2763_v2 = vpack.c.bf16 %v2741_v12, %v2741_v12  ;;  %v2699_v63 = vpop.permute.xlu0 %2698  ;;  %v2697_v53 = vpop.permute.xlu1 %2696 }
0x10a8   :  { %v2703_v14 = vsel %vm205_vm4, %v2697_v53, %v2699_v63  ;;  %v2704_v62 = vsel %vm205_vm4, %v2695_v61, %v2697_v53 }
0x10a9   :  { %3252 = vmatprep.subr.msk.bf16.mxu1 %vm344_vm5, %v2763_v2  ;;  %v2781_v59 = vsel %vm344_vm5, %v2762_v22, 0  ;;  %v2706_v9 = vmul.f32 %v2704_v62, %v3545_v6  ;;  %v2707_v33 = vmul.f32 %v2703_v14, %v3559_v27 }
0x10aa   :  { %2834 = vmatpush1.bf16.msra.mxu1 %v2781_v59 }
0x10ab   :  { %v2711_v21 = vpop.permute.xlu0 %2710  ;;  %v2701_v56 = vpop.permute.xlu1 %2700 }
0x10ac   :  { %v2702_v0 = vsel %vm205_vm4, %v2699_v63, %v2701_v56  ;;  %v2705_v13 = vsel %vm205_vm4, %v2701_v56, %v2695_v61 }
0x10ad   :  { %v2708_v2 = vmul.f32 %v2702_v0, %v3562_v28  ;;  %v2709_v53 = vmul.f32 %v2705_v13, %v3556_v26 }
0x10af   :  { %v2715_v51 = vpop.permute.xlu0 %2714  ;;  %v2713_v41 = vpop.permute.xlu1 %2712 }
0x10b0   :  { %v2719_v50 = vsel %vm238_vm3, %v2713_v41, %v2715_v51  ;;  %v2720_v20 = vsel %vm238_vm3, %v2711_v21, %v2713_v41 }
0x10b1   :  { %v2722_v10 = vmul.f32 %v2720_v20, %v3513_v48  ;;  %v2723_v38 = vmul.f32 %v2719_v50, %v3524_v54 }
0x10b3   :  { %v2756_v42 = vpack.c.bf16 %v2722_v10, %v2706_v9  ;;  %v2679_v5 = vpop.permute.xlu0 %2678  ;;  %v2717_v24 = vpop.permute.xlu1 %2716  ;;  %v2757_v12 = vpack.c.bf16 %v2723_v38, %v2707_v33 }
0x10b4   :  { %v2718_v39 = vsel %vm238_vm3, %v2715_v51, %v2717_v24  ;;  %v2721_v22 = vsel %vm238_vm3, %v2717_v24, %v2711_v21 }
0x10b5   :  { %v2724_v59 = vmul.f32 %v2718_v39, %v3536_v60  ;;  %v2725_v63 = vmul.f32 %v2721_v22, %v3521_v52  ;;  %2794 = vmatprep.subr.bf16.mxu0 %v2757_v12 }
0x10b6   :  { %2795 = vmatpush1.bf16.msra.mxu0 %v2756_v42 }
0x10b7   :  { %v2758_v61 = vpack.c.bf16 %v2724_v59, %v2708_v2  ;;  %v2683_v56 = vpop.permute.xlu0 %2682  ;;  %v2681_v14 = vpop.permute.xlu1 %2680  ;;  %v2759_v62 = vpack.c.bf16 %v2725_v63, %v2709_v53 }
0x10b8   :  { %v2687_v51 = vsel %vm172_vm2, %v2681_v14, %v2683_v56  ;;  %v2688_v21 = vsel %vm172_vm2, %v2679_v5, %v2681_v14 }
0x10b9   :  { %v2690_v41 = vmul.f32 %v2688_v21, %v3500_v44  ;;  %v2691_v50 = vmul.f32 %v2687_v51, %v3507_v46  ;;  %2835 = vmatprep.subr.bf16.mxu1 %v2759_v62 }
0x10ba   :  { %2836 = vmatpush1.bf16.msra.mxu1 %v2758_v61 }
0x10bb   :  { %v2752_v20 = vpack.c.bf16 %v2690_v41, %v5051_v23  ;;  %v2647_v9 = vpop.permute.xlu0 %2646  ;;  %v2685_v33 = vpop.permute.xlu1 %2684  ;;  %v2753_v10 = vpack.c.bf16 %v2691_v50, %v5055_v25 }
0x10bc   :  { %v2686_v38 = vsel %vm172_vm2, %v2683_v56, %v2685_v33  ;;  %v2689_v0 = vsel %vm172_vm2, %v2685_v33, %v2679_v5 }
0x10bd   :  { %v2692_v13 = vmul.f32 %v2686_v38, %v3510_v47  ;;  %v2693_v42 = vmul.f32 %v2689_v0, %v3504_v45  ;;  %2796 = vmatprep.subr.bf16.mxu0 %v2753_v10 }
0x10be   :  { %2797 = vmatpush1.bf16.msra.mxu0 %v2752_v20 }
0x10bf   :  { %v2754_v24 = vpack.c.bf16 %v2692_v13, %v5057_v31  ;;  %v2651_v12 = vpop.permute.xlu0 %2650  ;;  %v2649_v23 = vpop.permute.xlu1 %2648  ;;  %v2755_v39 = vpack.c.bf16 %v2693_v42, %v5063_v58 }
0x10c0   :  { %v2656_v2 = vsel %vm106_vm8, %v2647_v9, %v2649_v23  ;;  %v2655_v14 = vsel %vm106_vm8, %v2649_v23, %v2651_v12 }
0x10c1   :  { %2837 = vmatprep.subr.bf16.mxu1 %v2755_v39  ;;  %v2659_v63 = vmul.f32 %v2656_v2, %v3643_v57  ;;  %v2660_v0 = vmul.f32 %v2655_v14, %v3657_v11 }
0x10c2   :  { %2838 = vmatpush1.bf16.msra.mxu1 %v2754_v24 }
0x10c3   :  { %v2663_v25 = vpop.permute.xlu0 %2662  ;;  %v2653_v22 = vpop.permute.xlu1 %2652 }
0x10c4   :  { %v2654_v58 = vsel %vm106_vm8, %v2651_v12, %v2653_v22  ;;  %v2657_v56 = vsel %vm106_vm8, %v2653_v22, %v2647_v9 }
0x10c5   :  { %v2658_v33 = vmul.f32 %v2657_v56, %v3654_v3  ;;  %v2661_v10 = vmul.f32 %v2654_v58, %v3664_v15 }
0x10c7   :  { %v2667_v5 = vpop.permute.xlu0 %2666  ;;  %v2665_v53 = vpop.permute.xlu1 %2664 }
0x10c8   :  { %v2672_v59 = vsel %vm139_vm9, %v2663_v25, %v2665_v53  ;;  %v2671_v31 = vsel %vm139_vm9, %v2665_v53, %v2667_v5 }
0x10c9   :  { %v2675_v61 = vmul.f32 %v2672_v59, %v3607_v35  ;;  %v2676_v41 = vmul.f32 %v2671_v31, %v3613_v37 }
0x10cb   :  { %v2615_v62 = vpop.permute.xlu0 %2614  ;;  %v2669_v51 = vpop.permute.xlu1 %2668  ;;  %v2749_v21 = vpack.c.bf16 %v2675_v61, %v2659_v63  ;;  %v2750_v23 = vpack.c.bf16 %v2676_v41, %v2660_v0 }
0x10cc   :  { %v2670_v50 = vsel %vm139_vm9, %v2667_v5, %v2669_v51  ;;  %v2673_v20 = vsel %vm139_vm9, %v2669_v51, %v2663_v25 }
0x10cd   :  { %v2674_v9 = vmul.f32 %v2673_v20, %v3610_v36  ;;  %v2677_v38 = vmul.f32 %v2670_v50, %v3620_v7  ;;  %2798 = vmatprep.subr.bf16.mxu0 %v2749_v21 }
0x10cf   :  { %v2748_v13 = vpack.c.bf16 %v2674_v9, %v2658_v33  ;;  %v2619_v42 = vpop.permute.xlu0 %2618  ;;  %v2617_v24 = vpop.permute.xlu1 %2616  ;;  %v2751_v12 = vpack.c.bf16 %v2677_v38, %v2661_v10 }
0x10d0   :  { %v2624_v22 = vsel %vm40_vm6, %v2615_v62, %v2617_v24  ;;  %v2623_v56 = vsel %vm40_vm6, %v2617_v24, %v2619_v42 }
0x10d1   :  { %2799 = vmatpush1.bf16.msra.mxu0 %v2748_v13  ;;  %2839 = vmatprep.subr.bf16.mxu1 %v2751_v12  ;;  %v2627_v59 = vmul.f32 %v2624_v22, %v3623_v40  ;;  %v2628_v9 = vmul.f32 %v2623_v56, %v3633_v49 }
0x10d2   :  { %2840 = vmatpush1.bf16.msra.mxu1 %v2750_v23 }
0x10d3   :  { %v2631_v39 = vpop.permute.xlu0 %2630  ;;  %v2621_v25 = vpop.permute.xlu1 %2620 }
0x10d4   :  { %v2622_v61 = vsel %vm40_vm6, %v2619_v42, %v2621_v25  ;;  %v2625_v58 = vsel %vm40_vm6, %v2621_v25, %v2615_v62  ;;  %v3248_v42 = vld [vmem:[%s5437_s1 + $0x20] sm:$0xf] }
0x10d5   :  { %v2626_v20 = vmul.f32 %v2625_v58, %v3630_v43  ;;  %v2629_v33 = vmul.f32 %v2622_v61, %v3640_v55 }
0x10d7   :  { %v2635_v2 = vpop.permute.xlu0 %2634  ;;  %v2633_v5 = vpop.permute.xlu1 %2632 }
0x10d8   :  { %v2640_v53 = vsel %vm73_vm7, %v2631_v39, %v2633_v5  ;;  %v2639_v63 = vsel %vm73_vm7, %v2633_v5, %v2635_v2 }
0x10d9   :  { %v2643_v31 = vmul.f32 %v2640_v53, %v3594_v1  ;;  %v2644_v21 = vmul.f32 %v2639_v63, %v3600_v30 }
0x10db   :  { %v2637_v14 = vpop.permute.xlu1 %2636  ;;  %v2745_v51 = vpack.c.bf16 %v2643_v31, %v2627_v59  ;;  %v2746_v13 = vpack.c.bf16 %v2644_v21, %v2628_v9 }
0x10dc   :  { %v2638_v41 = vsel %vm73_vm7, %v2635_v2, %v2637_v14  ;;  %v2641_v50 = vsel %vm73_vm7, %v2637_v14, %v2631_v39 }
0x10dd   :  { %v2642_v10 = vmul.f32 %v2641_v50, %v3597_v29  ;;  %v2645_v62 = vmul.f32 %v2638_v41, %v3604_v34  ;;  %2800 = vmatprep.subr.bf16.mxu0 %v2745_v51 }
0x10df   :  { %v2744_v38 = vpack.c.bf16 %v2642_v10, %v2626_v20  ;;  %v2747_v0 = vpack.c.bf16 %v2645_v62, %v2629_v33 }
0x10e1   :  { %2801 = vmatpush1.bf16.msra.mxu0 %v2744_v38  ;;  %2841 = vmatprep.subr.bf16.mxu1 %v2747_v0 }
0x10e2   :  { %2842 = vmatpush1.bf16.msra.mxu1 %v2746_v13 }
0x10e4   :  { %3251 = vmatmul.mubr.msk.bf16.vlgmr.msra.gmra.mxu0 %vm640_vm11, %v3248_v42  ;;  %v2769_v24 = vpop.permute.xlu0 %2768 }
0x10e5   :  { %3253 = vmatmul.mubr.msk.bf16.vlgmr.msra.gmra.mxu1 %vm640_vm11, %v3248_v42  ;;  %3130 = vmatprep.mubr.bf16.mxu0 %v3328_v4 }
0x10e6   :  { %3171 = vmatprep.mubr.bf16.mxu1 %v3328_v4 }
0x11a4   :  { %v2820_v12 = vpop.f32.mrf.mxu0 }
0x11a5   :  { %v2861_v23 = vpop.f32.mrf.mxu1  ;;  %v2821_v22 = vadd.f32 %v2820_v12, %v2769_v24 }
0x11a6   :  { %v2862_v39 = vadd.f32 %v2861_v23, %v2769_v24  ;;  %v2822_v25 = vpop.f32.mrf.mxu0 }
0x11a7   :  { %v2823_v2 = vadd.f32 %v2822_v25, %v2769_v24  ;;  %v2863_v5 = vpop.f32.mrf.mxu1  ;;  %v2871_v21 = vmul.f32 %v2821_v22, %v2821_v22 }
0x11a8   :  { %v2864_v53 = vadd.f32 %v2863_v5, %v2769_v24  ;;  %v2824_v59 = vpop.f32.mrf.mxu0  ;;  %v2890_v58 = vmul.f32 %v2862_v39, %v2862_v39 }
0x11a9   :  { %v2872_v63 = vmul.f32 %v2823_v2, %v2823_v2  ;;  %v2865_v31 = vpop.f32.mrf.mxu1  ;;  %v2868_v61 = vadd.f32 %v2823_v2, %v2821_v22 }
0x11aa   :  { %v2891_v56 = vmul.f32 %v2864_v53, %v2864_v53  ;;  %v2825_v14 = vpop.f32.mrf.mxu0  ;;  %v2887_v51 = vadd.f32 %v2864_v53, %v2862_v39 }
0x11ab   :  { %2869 = vadd.xlane.f32.xlu1 %v2868_v61  ;;  %v2866_v41 = vpop.f32.mrf.mxu1  ;;  %v2873_v50 = vadd.f32 %v2872_v63, %v2871_v21 }
0x11ac   :  { %2888 = vadd.xlane.f32.xlu0 %v2887_v51  ;;  %v2892_v20 = vadd.f32 %v2891_v56, %v2890_v58 }
0x11af   :  { %2874 = vadd.xlane.f32.xlu1 %v2873_v50 }
0x11b0   :  { %2893 = vadd.xlane.f32.xlu0 %v2892_v20 }
0x11c0   :  { %2907 = vperm.xlu1 %3287, %v5124_v32  }
0x11c6   :  { %2915 = vperm.xlu0 %3289, %v5124_v32  }
0x11ca   :  { %3290 = vset.pattern.permute.xlu0 %v3328_v4 }
0x1234   :  { %v2870_v33 = vpop.xlane.xlu1 %2869 }
0x1235   :  { %v2876_v10 = vmul.f32 0.00390625, %v2870_v33  ;;  %v2889_v62 = vpop.xlane.xlu0 %2888 }
0x1236   :  { %v2895_v9 = vmul.f32 0.00390625, %v2889_v62 }
0x1237   :  { %v2878_v0 = vmul.f32 %v2876_v10, %v2876_v10  ;;  %v2881_v32 = vsub.f32 %v2821_v22, %v2876_v10  ;;  %v2882_v4 = vsub.f32 %v2823_v2, %v2876_v10 }
0x1238   :  { %v2875_v38 = vpop.xlane.xlu1 %2874  ;;  %v2897_v24 = vmul.f32 %v2895_v9, %v2895_v9  ;;  %v2900_v58 = vsub.f32 %v2862_v39, %v2895_v9 }
0x1239   :  { %v2877_v13 = vmul.f32 0.00390625, %v2875_v38  ;;  %v2894_v42 = vpop.xlane.xlu0 %2893  ;;  %v2901_v38 = vsub.f32 %v2864_v53, %v2895_v9  ;;  %v3255_v9 = vld [vmem:[%s5435_s2 + $0x48] sm:$0xff] }
0x123a   :  { %v2896_v12 = vmul.f32 0.00390625, %v2894_v42 }
0x123b   :  { %v2879_v23 = vsub.f32 %v2877_v13, %v2878_v0 }
0x123c   :  { %v2898_v25 = vsub.f32 %v2896_v12, %v2897_v24  ;;  %v2908_v21 = vpop.permute.xlu1 %2907 }
0x123d   :  { %v2880_v5 = vmax.f32 %v2879_v23, 0.0 }
0x123e   :  { %v2899_v59 = vmax.f32 %v2898_v25, 0.0 }
0x123f   :  { %v2883_v63 = vadd.f32 1e-05, %v2880_v5 }
0x1240   :  { %v2902_v31 = vadd.f32 1e-05, %v2899_v59 }
0x1241   :  { %3317 = vrsqrt.f32 %v2883_v63  ;;  %v2916_v50 = vpop.permute.xlu0 %2915 }
0x1242   :  { %3319 = vrsqrt.f32 %v2902_v31 }
0x124e   :  { %v3318_v61 = vpop.eup %3317 }
0x124f   :  { %v3320_v56 = vpop.eup %3319  ;;  %v2885_v14 = vmul.f32 %v3318_v61, %v2881_v32  ;;  %v2886_v51 = vmul.f32 %v3318_v61, %v2882_v4 }
0x1250   :  { %v2904_v41 = vmul.f32 %v3320_v56, %v2900_v58  ;;  %v2905_v13 = vmul.f32 %v3320_v56, %v2901_v38 }
0x1251   :  { %v2910_v20 = vmul.f32 %v2908_v21, %v2885_v14  ;;  %v2911_v33 = vmul.f32 %v2908_v21, %v2886_v51 }
0x1252   :  { %v2912_v62 = vmul.f32 %v2908_v21, %v2904_v41  ;;  %v2913_v39 = vmul.f32 %v2908_v21, %v2905_v13 }
0x1253   :  { %v2918_v0 = vadd.f32 %v2916_v50, %v2910_v20  ;;  %v2919_v42 = vadd.f32 %v2916_v50, %v2911_v33 }
0x1254   :  { %v2920_v24 = vadd.f32 %v2916_v50, %v2912_v62  ;;  %v2921_v53 = vadd.f32 %v2916_v50, %v2913_v39 }
0x1255   :  { %v5244_v12 = vmax.f32 %v2918_v0, 0.0  ;;  %v5250_v22 = vmax.f32 %v2919_v42, 0.0 }
0x1256   :  { %v5252_v2 = vmax.f32 %v2920_v24, 0.0  ;;  %v5262_v10 = vmax.f32 %v2921_v53, 0.0 }
0x1257   :  { %3022 = vrot.lane.b32.xlu0 %v5244_v12, %s3323_s20  ;;  %3038 = vrot.lane.b32.xlu1 %v5244_v12, %s3321_s19 }
0x125b   :  { %3026 = vrot.lane.b32.xlu0 %v5252_v2, %s3323_s20  ;;  %3040 = vrot.lane.b32.xlu1 %v5250_v22, %s3321_s19 }
0x125f   :  { %2990 = vrot.lane.b32.xlu0 %v5244_v12, %s3322_s0  ;;  %3042 = vrot.lane.b32.xlu1 %v5252_v2, %s3321_s19 }
0x1263   :  { %2994 = vrot.lane.b32.xlu0 %v5252_v2, %s3322_s0  ;;  %3044 = vrot.lane.b32.xlu1 %v5262_v10, %s3321_s19 }
0x1267   :  { %2958 = vrot.lane.b32.xlu0 %v5244_v12, %s3329_s25  ;;  %3006 = vrot.lane.b32.xlu1 %v5244_v12, %s3324_s21 }
0x126b   :  { %2962 = vrot.lane.b32.xlu0 %v5252_v2, %s3329_s25  ;;  %3008 = vrot.lane.b32.xlu1 %v5250_v22, %s3324_s21 }
0x126f   :  { %2974 = vrot.lane.b32.xlu0 %v5244_v12, %s3326_s23  ;;  %3010 = vrot.lane.b32.xlu1 %v5252_v2, %s3324_s21 }
0x1273   :  { %2978 = vrot.lane.b32.xlu0 %v5252_v2, %s3326_s23  ;;  %3012 = vrot.lane.b32.xlu1 %v5262_v10, %s3324_s21 }
0x1277   :  { %2926 = vrot.lane.b32.xlu0 %v5244_v12, %s3327_s24  ;;  %3024 = vrot.lane.b32.xlu1 %v5250_v22, %s3323_s20 }
0x127b   :  { %2930 = vrot.lane.b32.xlu0 %v5252_v2, %s3327_s24  ;;  %3028 = vrot.lane.b32.xlu1 %v5262_v10, %s3323_s20 }
0x127f   :  { %2942 = vrot.lane.b32.xlu0 %v5244_v12, %s3325_s22  ;;  %2992 = vrot.lane.b32.xlu1 %v5250_v22, %s3322_s0 }
0x1283   :  { %2946 = vrot.lane.b32.xlu0 %v5252_v2, %s3325_s22  ;;  %2996 = vrot.lane.b32.xlu1 %v5262_v10, %s3322_s0 }
0x1287   :  { %2960 = vrot.lane.b32.xlu1 %v5250_v22, %s3329_s25  ;;  %3080 = vperm.xlu0 %3290, %v3255_v9  }
0x128b   :  { %2964 = vrot.lane.b32.xlu1 %v5262_v10, %s3329_s25 }
0x128f   :  { %2976 = vrot.lane.b32.xlu1 %v5250_v22, %s3326_s23 }
0x1293   :  { %2980 = vrot.lane.b32.xlu1 %v5262_v10, %s3326_s23 }
0x1297   :  { %2928 = vrot.lane.b32.xlu1 %v5250_v22, %s3327_s24 }
0x129b   :  { %2932 = vrot.lane.b32.xlu1 %v5262_v10, %s3327_s24 }
0x129f   :  { %2944 = vrot.lane.b32.xlu1 %v5250_v22, %s3325_s22 }
0x12a3   :  { %2948 = vrot.lane.b32.xlu1 %v5262_v10, %s3325_s22 }
0x12c9   :  { %v3039_v23 = vpop.permute.xlu1 %3038  ;;  %v3023_v63 = vpop.permute.xlu0 %3022 }
0x12cd   :  { %v3041_v25 = vpop.permute.xlu1 %3040  ;;  %v3027_v14 = vpop.permute.xlu0 %3026 }
0x12ce   :  { %v3048_v5 = vsel %vm271_vm0, %v3039_v23, %v3041_v25 }
0x12cf   :  { %v3050_v59 = vmul.f32 %v3048_v5, %v3479_v18 }
0x12d1   :  { %v3043_v31 = vpop.permute.xlu1 %3042  ;;  %v3072_v4 = vpack.c.bf16 %v3050_v59, %v3050_v59  ;;  %v2991_v38 = vpop.permute.xlu0 %2990 }
0x12d2   :  { %v3047_v32 = vsel %vm271_vm0, %v3041_v25, %v3043_v31 }
0x12d3   :  { %v3051_v61 = vmul.f32 %v3047_v32, %v3473_v16  ;;  %v3087_v50 = vsel %vm344_vm5, %v3072_v4, 0 }
0x12d5   :  { %v3073_v58 = vpack.c.bf16 %v3051_v61, %v3051_v61  ;;  %v3045_v56 = vpop.permute.xlu1 %3044  ;;  %v2995_v42 = vpop.permute.xlu0 %2994 }
0x12d6   :  { %v3046_v51 = vsel %vm271_vm0, %v3043_v31, %v3045_v56  ;;  %v3049_v21 = vsel %vm271_vm0, %v3045_v56, %v3039_v23 }
0x12d7   :  { %v3052_v41 = vmul.f32 %v3046_v51, %v3482_v19  ;;  %v3053_v18 = vmul.f32 %v3049_v21, %v3476_v17  ;;  %3256 = vmatprep.subr.msk.bf16.mxu0 %vm344_vm5, %v3073_v58 }
0x12d8   :  { %3105 = vmatpush1.bf16.msra.mxu0 %v3087_v50 }
0x12d9   :  { %v3074_v20 = vpack.c.bf16 %v3052_v41, %v3052_v41  ;;  %v3075_v16 = vpack.c.bf16 %v3053_v18, %v3053_v18  ;;  %v3007_v33 = vpop.permute.xlu1 %3006  ;;  %v2959_v24 = vpop.permute.xlu0 %2958 }
0x12db   :  { %3258 = vmatprep.subr.msk.bf16.mxu1 %vm344_vm5, %v3075_v16  ;;  %v3093_v62 = vsel %vm344_vm5, %v3074_v20, 0 }
0x12dc   :  { %3146 = vmatpush1.bf16.msra.mxu1 %v3093_v62 }
0x12dd   :  { %v3009_v0 = vpop.permute.xlu1 %3008  ;;  %v2963_v51 = vpop.permute.xlu0 %2962 }
0x12de   :  { %v3016_v17 = vsel %vm205_vm4, %v3007_v33, %v3009_v0 }
0x12df   :  { %v3018_v25 = vmul.f32 %v3016_v17, %v3545_v6 }
0x12e1   :  { %v3011_v13 = vpop.permute.xlu1 %3010 }
0x12e2   :  { %v3015_v39 = vsel %vm205_vm4, %v3009_v0, %v3011_v13 }
0x12e3   :  { %v3019_v5 = vmul.f32 %v3015_v39, %v3559_v27 }
0x12e5   :  { %v3013_v19 = vpop.permute.xlu1 %3012 }
0x12e6   :  { %v3014_v32 = vsel %vm205_vm4, %v3011_v13, %v3013_v19  ;;  %v3017_v4 = vsel %vm205_vm4, %v3013_v19, %v3007_v33 }
0x12e9   :  { %v3025_v53 = vpop.permute.xlu1 %3024 }
0x12ea   :  { %v3031_v9 = vsel %vm238_vm3, %v3025_v53, %v3027_v14  ;;  %v3032_v23 = vsel %vm238_vm3, %v3023_v63, %v3025_v53 }
0x12eb   :  { %v3034_v59 = vmul.f32 %v3032_v23, %v3513_v48  ;;  %v3035_v31 = vmul.f32 %v3031_v9, %v3524_v54  ;;  %v3020_v48 = vmul.f32 %v3014_v32, %v3562_v28  ;;  %v3021_v54 = vmul.f32 %v3017_v4, %v3556_v26  ;;  %v2975_v26 = vpop.permute.xlu0 %2974 }
0x12ed   :  { %v3068_v61 = vpack.c.bf16 %v3034_v59, %v3018_v25  ;;  %v3029_v58 = vpop.permute.xlu1 %3028  ;;  %v3069_v56 = vpack.c.bf16 %v3035_v31, %v3019_v5 }
0x12ee   :  { %v3030_v21 = vsel %vm238_vm3, %v3027_v14, %v3029_v58  ;;  %v3033_v6 = vsel %vm238_vm3, %v3029_v58, %v3023_v63 }
0x12ef   :  { %v3036_v27 = vmul.f32 %v3030_v21, %v3536_v60  ;;  %v3037_v41 = vmul.f32 %v3033_v6, %v3521_v52  ;;  %3106 = vmatprep.subr.bf16.mxu0 %v3069_v56  ;;  %v2979_v17 = vpop.permute.xlu0 %2978 }
0x12f0   :  { %3107 = vmatpush1.bf16.msra.mxu0 %v3068_v61 }
0x12f1   :  { %v3070_v18 = vpack.c.bf16 %v3036_v27, %v3020_v48  ;;  %v2993_v50 = vpop.permute.xlu1 %2992  ;;  %v3071_v20 = vpack.c.bf16 %v3037_v41, %v3021_v54 }
0x12f2   :  { %v2999_v16 = vsel %vm172_vm2, %v2993_v50, %v2995_v42  ;;  %v3000_v14 = vsel %vm172_vm2, %v2991_v38, %v2993_v50 }
0x12f3   :  { %v3002_v63 = vmul.f32 %v3000_v14, %v3500_v44  ;;  %v3003_v28 = vmul.f32 %v2999_v16, %v3507_v46  ;;  %3147 = vmatprep.subr.bf16.mxu1 %v3071_v20  ;;  %v2927_v39 = vpop.permute.xlu0 %2926 }
0x12f4   :  { %3148 = vmatpush1.bf16.msra.mxu1 %v3070_v18 }
0x12f5   :  { %v3064_v52 = vpack.c.bf16 %v3002_v63, %v5244_v12  ;;  %v2997_v60 = vpop.permute.xlu1 %2996  ;;  %v3065_v33 = vpack.c.bf16 %v3003_v28, %v5250_v22 }
0x12f6   :  { %v2998_v62 = vsel %vm172_vm2, %v2995_v42, %v2997_v60  ;;  %v3001_v0 = vsel %vm172_vm2, %v2997_v60, %v2991_v38 }
0x12f7   :  { %v3004_v13 = vmul.f32 %v2998_v62, %v3510_v47  ;;  %v3005_v44 = vmul.f32 %v3001_v0, %v3504_v45  ;;  %3108 = vmatprep.subr.bf16.mxu0 %v3065_v33  ;;  %v2931_v59 = vpop.permute.xlu0 %2930 }
0x12f8   :  { %3109 = vmatpush1.bf16.msra.mxu0 %v3064_v52 }
0x12f9   :  { %v3066_v46 = vpack.c.bf16 %v3004_v13, %v5252_v2  ;;  %v2961_v19 = vpop.permute.xlu1 %2960  ;;  %v3067_v12 = vpack.c.bf16 %v3005_v44, %v5262_v10 }
0x12fa   :  { %v2968_v42 = vsel %vm106_vm8, %v2959_v24, %v2961_v19  ;;  %v2967_v23 = vsel %vm106_vm8, %v2961_v19, %v2963_v51 }
0x12fb   :  { %3149 = vmatprep.subr.bf16.mxu1 %v3067_v12  ;;  %v2971_v45 = vmul.f32 %v2968_v42, %v3643_v57  ;;  %v2972_v58 = vmul.f32 %v2967_v23, %v3657_v11  ;;  %v2943_v6 = vpop.permute.xlu0 %2942 }
0x12fc   :  { %3150 = vmatpush1.bf16.msra.mxu1 %v3066_v46  ;;  %v3332_v46 = vmov 0.0  }
0x12fd   :  { %v2965_v22 = vpop.permute.xlu1 %2964 }
0x12fe   :  { %v2966_v10 = vsel %vm106_vm8, %v2963_v51, %v2965_v22  ;;  %v2969_v9 = vsel %vm106_vm8, %v2965_v22, %v2959_v24 }
0x12ff   :  { %v2970_v32 = vmul.f32 %v2969_v9, %v3654_v3  ;;  %v2973_v4 = vmul.f32 %v2966_v10, %v3664_v15  ;;  %v2947_v54 = vpop.permute.xlu0 %2946 }
0x1301   :  { %v2977_v38 = vpop.permute.xlu1 %2976 }
0x1302   :  { %v2984_v47 = vsel %vm139_vm9, %v2975_v26, %v2977_v38  ;;  %v2983_v2 = vsel %vm139_vm9, %v2977_v38, %v2979_v17 }
0x1303   :  { %v2987_v53 = vmul.f32 %v2984_v47, %v3607_v35  ;;  %v2988_v31 = vmul.f32 %v2983_v2, %v3613_v37 }
0x1305   :  { %v2981_v25 = vpop.permute.xlu1 %2980  ;;  %v3061_v5 = vpack.c.bf16 %v2987_v53, %v2971_v45  ;;  %v3062_v21 = vpack.c.bf16 %v2988_v31, %v2972_v58 }
0x1306   :  { %v2982_v57 = vsel %vm139_vm9, %v2979_v17, %v2981_v25  ;;  %v2985_v35 = vsel %vm139_vm9, %v2981_v25, %v2975_v26 }
0x1307   :  { %v2986_v24 = vmul.f32 %v2985_v35, %v3610_v36  ;;  %v2989_v61 = vmul.f32 %v2982_v57, %v3620_v7  ;;  %3110 = vmatprep.subr.bf16.mxu0 %v3061_v5 }
0x1309   :  { %v3060_v56 = vpack.c.bf16 %v2986_v24, %v2970_v32  ;;  %v2929_v51 = vpop.permute.xlu1 %2928  ;;  %v3063_v37 = vpack.c.bf16 %v2989_v61, %v2973_v4 }
0x130a   :  { %v2936_v3 = vsel %vm40_vm6, %v2927_v39, %v2929_v51  ;;  %v2935_v50 = vsel %vm40_vm6, %v2929_v51, %v2931_v59 }
0x130b   :  { %3111 = vmatpush1.bf16.msra.mxu0 %v3060_v56  ;;  %3151 = vmatprep.subr.bf16.mxu1 %v3063_v37  ;;  %v2939_v7 = vmul.f32 %v2936_v3, %v3623_v40  ;;  %v2940_v60 = vmul.f32 %v2935_v50, %v3633_v49 }
0x130c   :  { %3152 = vmatpush1.bf16.msra.mxu1 %v3062_v21 }
0x130d   :  { %v2933_v48 = vpop.permute.xlu1 %2932 }
0x130e   :  { %v2934_v41 = vsel %vm40_vm6, %v2931_v59, %v2933_v48  ;;  %v2937_v18 = vsel %vm40_vm6, %v2933_v48, %v2927_v39 }
0x130f   :  { %v2941_v28 = vmul.f32 %v2934_v41, %v3640_v55 }
0x1311   :  { %v2945_v15 = vpop.permute.xlu1 %2944 }
0x1312   :  { %v2952_v36 = vsel %vm73_vm7, %v2943_v6, %v2945_v15  ;;  %v2951_v11 = vsel %vm73_vm7, %v2945_v15, %v2947_v54 }
0x1313   :  { %v2955_v27 = vmul.f32 %v2952_v36, %v3594_v1  ;;  %v2956_v14 = vmul.f32 %v2951_v11, %v3600_v30  ;;  %v2938_v1 = vmul.f32 %v2937_v18, %v3630_v43 }
0x1315   :  { %v2949_v20 = vpop.permute.xlu1 %2948  ;;  %v3057_v16 = vpack.c.bf16 %v2955_v27, %v2939_v7  ;;  %v3058_v30 = vpack.c.bf16 %v2956_v14, %v2940_v60 }
0x1316   :  { %v2950_v40 = vsel %vm73_vm7, %v2947_v54, %v2949_v20  ;;  %v2953_v63 = vsel %vm73_vm7, %v2949_v20, %v2943_v6 }
0x1317   :  { %v2954_v26 = vmul.f32 %v2953_v63, %v3597_v29  ;;  %v2957_v52 = vmul.f32 %v2950_v40, %v3604_v34  ;;  %3112 = vmatprep.subr.bf16.mxu0 %v3057_v16  ;;  %v3081_v29 = vpop.permute.xlu0 %3080 }
0x1319   :  { %v3056_v33 = vpack.c.bf16 %v2954_v26, %v2938_v1  ;;  %v3059_v62 = vpack.c.bf16 %v2957_v52, %v2941_v28 }
0x131b   :  { %3113 = vmatpush1.bf16.msra.mxu0 %v3056_v33  ;;  %3153 = vmatprep.subr.bf16.mxu1 %v3059_v62 }
0x131c   :  { %3154 = vmatpush1.bf16.msra.mxu1 %v3058_v30 }
0x131e   :  { %3257 = vmatmul.mubr.msk.bf16.vlgmr.msra.gmra.mxu0 %vm640_vm11, %v3254_v8 }
0x131f   :  { %3259 = vmatmul.mubr.msk.bf16.vlgmr.msra.gmra.mxu1 %vm640_vm11, %v3254_v8 }
0x13de   :  { %v3132_v43 = vpop.f32.mrf.mxu0 }
0x13df   :  { %v3133_v34 = vadd.f32 %v3132_v43, %v3081_v29  ;;  %v3173_v55 = vpop.f32.mrf.mxu1 }
0x13e0   :  { %v3174_v0 = vadd.f32 %v3173_v55, %v3081_v29  ;;  %v3134_v49 = vpop.f32.mrf.mxu0 }
0x13e1   :  { %vm3180_vm12 = vcmp.gt.f32.partialorder %v3133_v34, 0.0  ;;  %v3135_v13 = vadd.f32 %v3134_v49, %v3081_v29  ;;  %v3175_v44 = vpop.f32.mrf.mxu1 }
0x13e2   :  { %vm3182_vm13 = vcmp.gt.f32.partialorder %v3174_v0, 0.0  ;;  %v3184_v19 = vsel %vm3180_vm12, 1.0, %v3332_v46  ;;  %v3176_v12 = vadd.f32 %v3175_v44, %v3081_v29  ;;  %v3136_v17 = vpop.f32.mrf.mxu0 }
0x13e3   :  { %vm3181_vm14 = vcmp.gt.f32.partialorder %v3135_v13, 0.0  ;;  %v3177_v22 = vpop.f32.mrf.mxu1  ;;  %v3186_v38 = vsel %vm3182_vm13, 1.0, %v3332_v46 }
0x13e4   :  { %v3185_v39 = vsel %vm3181_vm14, 1.0, %v3332_v46  ;;  %vm3183_vm15 = vcmp.gt.f32.partialorder %v3176_v12, 0.0  ;;  %v3137_v42 = vpop.f32.mrf.mxu0 }
0x13e5   :  { %v3192_v47 = vcombine.low %v3184_v19, %v3185_v39  ;;  %v3187_v45 = vsel %vm3183_vm15, 1.0, %v3332_v46  ;;  %v3178_v2 = vpop.f32.mrf.mxu1 }
0x13e6   :  { %v3193_v53 = vcombine.low %v3186_v38, %v3187_v45 }
0x13e7   :  { %3196 = vst [vmem:[%s5438_s4] sm:$0xff] %v3192_v47 }
0x13e8   :  { %3197 = vst [vmem:[%s5438_s4 + $0x8] sm:$0xff] %v3193_v53 }

</bundles_post_ra>
